<compile_context>
chip_gen: v6e
topology: v6e:2x2x1
jax: 0.10.0
libtpu: 0.0.40
codegen_flags: <defaults>
</compile_context>

<pallas_src>
import functools

import jax
import jax.numpy as jnp
from jax.experimental import pallas as pl
from jax.experimental.pallas import tpu as pltpu


def _make_bottleneck_kernel(num_hidden_layers):
    """Build a kernel over one (tb, d_in) batch tile; weights/biases are VMEM-resident."""

    def kernel(*refs):
        x_ref = refs[0]
        o_ref = refs[-1]
        wo_ref = refs[1 + 2 * num_hidden_layers]
        bo_ref = refs[2 + 2 * num_hidden_layers]

        h = x_ref[...]  # f32 tile straight from the input stream (no wrapper convert)
        for l in range(num_hidden_layers):
            w_ref = refs[1 + 2 * l]
            b_ref = refs[2 + 2 * l]
            h = jnp.dot(h, w_ref[...], preferred_element_type=jnp.float32)
            h = jnp.maximum(h + b_ref[...], 0.0)
        # TODO(synk): dropout (config.drop_out=True) not implemented; module default is False.
        # Output layer (output_dim == 1): VPU broadcast-multiply + lane reduce instead of
        # a (tb x K x 1) MXU matmul.
        o_ref[...] = jnp.sum(h * wo_ref[...], axis=-1, keepdims=True) + bo_ref[...]

    return kernel


def choose_batch_tile(batch, target_tb=1024):
    """Largest tile <= target that is a multiple of 8; when the batch allows it,
    prefer an even grid of >= 4 steps (v7x megacore sizing rule)."""
    tb = max(8, min(target_tb, batch))
    tb = max(8, (tb // 8) * 8)
    if batch >= 4 * tb:
        while (pl.cdiv(batch, tb) % 2 != 0) and tb > 8:
            tb -= 8
    return tb


@functools.partial(jax.jit, static_argnames=("tb",))
def bottleneck_forward(x, params, *, tb=1024):
    """x: [B, input_dim] f32.  params: {"layers": [(w, b), ...], "wo": w, "bo": b},
    weights stored pre-transposed as [in, out] (PyTorch nn.Linear stores [out, in])."""
    B, d_in = x.shape
    layers = params["layers"]
    num_layers = len(layers)
    wo_row = params["wo"].T.astype(jnp.float32)   # (1, d_last) row for the VPU reduce
    bo = params["bo"].astype(jnp.float32)         # (1, 1)
    out_dim = params["wo"].shape[1]
    assert out_dim == 1, "VPU-reduce output path assumes output_dim == 1 (module default)"

    # Tile the batch; pad ragged batches with zero rows (sliced off at the end).
    tb = choose_batch_tile(B, tb)
    n_tiles = pl.cdiv(B, tb)
    B_pad = n_tiles * tb
    x = x.astype(jnp.float32)
    if B_pad != B:
        x = jnp.pad(x, ((0, B_pad - B), (0, 0)))

    def resident(shape):
        # Constant block index -> fetched once, stays VMEM-resident across grid steps.
        return pl.BlockSpec(shape, lambda i: (0, 0))

    # Streamed input: one batch tile per grid step (double-buffered by the pipeliner).
    in_specs = [pl.BlockSpec((tb, d_in), lambda i: (i, 0))]
    operands = [x]
    for w, b in layers:
        w = w.astype(jnp.float32)
        b = b.astype(jnp.float32).reshape(1, -1)
        in_specs += [resident(w.shape), resident(b.shape)]
        operands += [w, b]
    in_specs += [resident(wo_row.shape), resident(bo.shape)]
    operands += [wo_row, bo]

    # Raise scoped VMEM only when needed (v5e default is 16 MiB); cap well under any
    # generation's physical VMEM.
    d_max = max([d_in] + [w.shape[1] for w, _ in layers])
    weight_bytes = 4 * (sum(w.size + b.size for w, b in layers) + wo_row.size + bo.size)
    vmem_est = (2 * tb * d_in * 4          # double-buffered x stream
                + 2 * tb * out_dim * 4     # double-buffered out stream
                + 2 * weight_bytes         # resident weights (conservative x2)
                + 3 * tb * d_max * 4)      # f32 intermediates
    vmem_limit = None
    if vmem_est > (16 << 20):
        vmem_limit = min(int(vmem_est * 5 // 4), 64 << 20)

    out = pl.pallas_call(
        _make_bottleneck_kernel(num_layers),
        out_shape=jax.ShapeDtypeStruct((B_pad, out_dim), jnp.float32),
        grid=(n_tiles,),
        in_specs=in_specs,
        out_specs=pl.BlockSpec((tb, out_dim), lambda i: (i, 0)),
        compiler_params=pltpu.CompilerParams(
            dimension_semantics=("parallel",),   # independent batch tiles (v7x megacore)
            vmem_limit_bytes=vmem_limit,
        ),
    )(*operands)
    return out[:B]


def init_params(key, input_dim, layer_number, output_dim):
    """Deterministic synthetic parameters, stored pre-transposed ([in, out])."""
    dims = [input_dim]
    cur = input_dim
    for _ in range(layer_number):
        cur = int(cur / 2)
        dims.append(cur)
    keys = jax.random.split(key, 2 * layer_number + 2)
    layers = []
    for l in range(layer_number):
        w = 0.05 * jax.random.normal(keys[2 * l], (dims[l], dims[l + 1]), jnp.float32)
        b = 0.01 * jax.random.normal(keys[2 * l + 1], (1, dims[l + 1]), jnp.float32)
        layers.append((w, b))
    wo = 0.05 * jax.random.normal(keys[-2], (dims[-1], output_dim), jnp.float32)
    bo = 0.01 * jax.random.normal(keys[-1], (1, output_dim), jnp.float32)
    return {"layers": layers, "wo": wo, "bo": bo}


if __name__ == "__main__":
    # Gridded config: batch=4096 with 1024-row tiles -> grid of 4 (even, >= 4 steps:
    # each v7x TensorCore gets 2 pipelined steps).  Bottleneck dims 256 -> 128 -> 64 -> 1.
    batch, input_dim, layer_number, output_dim = 4096, 256, 2, 1
    tb = 1024   # sweep 1024-4096 for larger batches; biggest even-grid tile wins

    key = jax.random.PRNGKey(0)
    k_x, k_p = jax.random.split(key)
    x = jax.random.normal(k_x, (batch, input_dim), jnp.float32)
    params = init_params(k_p, input_dim, layer_number, output_dim)

    out = bottleneck_forward(x, params, tb=tb)
    out = jax.block_until_ready(out)
    assert out.shape == (batch, output_dim)

    # Full-f32 reference mirroring the PyTorch forward (kernel is f32 end-to-end now).
    h = x
    for w, b in params["layers"]:
        h = jnp.maximum(h @ w + b, 0.0)
    ref = h @ params["wo"] + params["bo"]
    err = float(jnp.max(jnp.abs(out - ref)))
    assert jnp.allclose(out, ref, atol=1e-2, rtol=1e-2), err

    print("KERNEL_OK")
</pallas_src>

<mosaic_0001>
module attributes {stable_mosaic.version = 11 : i64} {
  func.func @kernel(%arg0: i32, %arg1: memref<1024x256xf32, #tpu.memory_space<vmem>>, %arg2: memref<256x128xf32, #tpu.memory_space<vmem>>, %arg3: memref<1x128xf32, #tpu.memory_space<vmem>>, %arg4: memref<128x64xf32, #tpu.memory_space<vmem>>, %arg5: memref<1x64xf32, #tpu.memory_space<vmem>>, %arg6: memref<1x64xf32, #tpu.memory_space<vmem>>, %arg7: memref<1x1xf32, #tpu.memory_space<vmem>>, %arg8: memref<1024x1xf32, #tpu.memory_space<vmem>>) attributes {dimension_semantics = [#tpu.dimension_semantics<parallel>], iteration_bounds = array<i64: 4>, scalar_prefetch = 0 : i64, scratch_operands = 0 : i64, tpu.core_type = #tpu.core_type<tc>, window_params = [{transform_indices = @transform_0, window_bounds = array<i64: 1024, 256>}, {pipeline_mode = #tpu.pipeline_mode<synchronous>, transform_indices = @transform_1, window_bounds = array<i64: 256, 128>}, {pipeline_mode = #tpu.pipeline_mode<synchronous>, transform_indices = @transform_2, window_bounds = array<i64: 1, 128>}, {pipeline_mode = #tpu.pipeline_mode<synchronous>, transform_indices = @transform_3, window_bounds = array<i64: 128, 64>}, {pipeline_mode = #tpu.pipeline_mode<synchronous>, transform_indices = @transform_4, window_bounds = array<i64: 1, 64>}, {pipeline_mode = #tpu.pipeline_mode<synchronous>, transform_indices = @transform_5, window_bounds = array<i64: 1, 64>}, {pipeline_mode = #tpu.pipeline_mode<synchronous>, transform_indices = @transform_6, window_bounds = array<i64: 1, 1>}, {transform_indices = @transform_7, window_bounds = array<i64: 1024, 1>}]} {
    %c0 = arith.constant 0 : index
    %c0_0 = arith.constant 0 : index
    %0 = vector.load %arg1[%c0, %c0_0] : memref<1024x256xf32, #tpu.memory_space<vmem>>, vector<1024x256xf32>
    %c0_1 = arith.constant 0 : index
    %c0_2 = arith.constant 0 : index
    %1 = vector.load %arg2[%c0_1, %c0_2] : memref<256x128xf32, #tpu.memory_space<vmem>>, vector<256x128xf32>
    %cst = arith.constant dense<0.000000e+00> : vector<1024x128xf32>
    %2 = tpu.matmul %0, %1, %cst {dimension_numbers = #tpu.dot_dimension_numbers<[1], [0], [0], [1], [0, 0, 1, 1], [], []>} : vector<1024x256xf32>, vector<256x128xf32>, vector<1024x128xf32> -> vector<1024x128xf32>
    %c0_3 = arith.constant 0 : index
    %c0_4 = arith.constant 0 : index
    %3 = vector.load %arg3[%c0_3, %c0_4] : memref<1x128xf32, #tpu.memory_space<vmem>>, vector<1x128xf32>
    %4 = vector.broadcast %3 : vector<1x128xf32> to vector<1024x128xf32>
    %5 = arith.addf %2, %4 : vector<1024x128xf32>
    %cst_5 = arith.constant 0.000000e+00 : f32
    %6 = vector.broadcast %cst_5 : f32 to vector<1024x128xf32>
    %7 = arith.maximumf %5, %6 : vector<1024x128xf32>
    %c0_6 = arith.constant 0 : index
    %c0_7 = arith.constant 0 : index
    %8 = vector.load %arg4[%c0_6, %c0_7] : memref<128x64xf32, #tpu.memory_space<vmem>>, vector<128x64xf32>
    %cst_8 = arith.constant dense<0.000000e+00> : vector<1024x64xf32>
    %9 = tpu.matmul %7, %8, %cst_8 {dimension_numbers = #tpu.dot_dimension_numbers<[1], [0], [0], [1], [0, 0, 1, 1], [], []>} : vector<1024x128xf32>, vector<128x64xf32>, vector<1024x64xf32> -> vector<1024x64xf32>
    %c0_9 = arith.constant 0 : index
    %c0_10 = arith.constant 0 : index
    %10 = vector.load %arg5[%c0_9, %c0_10] : memref<1x64xf32, #tpu.memory_space<vmem>>, vector<1x64xf32>
    %11 = vector.broadcast %10 : vector<1x64xf32> to vector<1024x64xf32>
    %12 = arith.addf %9, %11 : vector<1024x64xf32>
    %cst_11 = arith.constant 0.000000e+00 : f32
    %13 = vector.broadcast %cst_11 : f32 to vector<1024x64xf32>
    %14 = arith.maximumf %12, %13 : vector<1024x64xf32>
    %c0_12 = arith.constant 0 : index
    %c0_13 = arith.constant 0 : index
    %15 = vector.load %arg6[%c0_12, %c0_13] : memref<1x64xf32, #tpu.memory_space<vmem>>, vector<1x64xf32>
    %16 = vector.broadcast %15 : vector<1x64xf32> to vector<1024x64xf32>
    %17 = arith.mulf %14, %16 : vector<1024x64xf32>
    %cst_14 = arith.constant dense<0.000000e+00> : vector<1024xf32>
    %18 = vector.multi_reduction <add>, %17, %cst_14 [1] : vector<1024x64xf32> to vector<1024xf32>
    %19 = vector.shape_cast %18 : vector<1024xf32> to vector<1024x1xf32>
    %c0_15 = arith.constant 0 : index
    %c0_16 = arith.constant 0 : index
    %20 = vector.load %arg7[%c0_15, %c0_16] : memref<1x1xf32, #tpu.memory_space<vmem>>, vector<1x1xf32>
    %21 = vector.broadcast %20 : vector<1x1xf32> to vector<1024x1xf32>
    %22 = arith.addf %19, %21 : vector<1024x1xf32>
    %c0_17 = arith.constant 0 : index
    %c0_18 = arith.constant 0 : index
    %23 = vector.load %arg8[%c0_17, %c0_18] : memref<1024x1xf32, #tpu.memory_space<vmem>>, vector<1024x1xf32>
    tpu.vector_store %arg8[%c0_17, %c0_18], %22 {strides = array<i32>} : memref<1024x1xf32, #tpu.memory_space<vmem>>, vector<1024x1xf32>,
    return
  }
  func.func @transform_0(%arg0: i32) -> (i32, i32) {
    %c0_i32 = arith.constant 0 : i32
    %c0_i32_0 = arith.constant 0 : i32
    return %arg0, %c0_i32 : i32, i32
  }
  func.func @transform_1(%arg0: i32) -> (i32, i32) {
    %c0_i32 = arith.constant 0 : i32
    %c0_i32_0 = arith.constant 0 : i32
    %c0_i32_1 = arith.constant 0 : i32
    return %c0_i32, %c0_i32_0 : i32, i32
  }
  func.func @transform_2(%arg0: i32) -> (i32, i32) {
    %c0_i32 = arith.constant 0 : i32
    %c0_i32_0 = arith.constant 0 : i32
    %c0_i32_1 = arith.constant 0 : i32
    return %c0_i32, %c0_i32_0 : i32, i32
  }
  func.func @transform_3(%arg0: i32) -> (i32, i32) {
    %c0_i32 = arith.constant 0 : i32
    %c0_i32_0 = arith.constant 0 : i32
    %c0_i32_1 = arith.constant 0 : i32
    return %c0_i32, %c0_i32_0 : i32, i32
  }
  func.func @transform_4(%arg0: i32) -> (i32, i32) {
    %c0_i32 = arith.constant 0 : i32
    %c0_i32_0 = arith.constant 0 : i32
    %c0_i32_1 = arith.constant 0 : i32
    return %c0_i32, %c0_i32_0 : i32, i32
  }
  func.func @transform_5(%arg0: i32) -> (i32, i32) {
    %c0_i32 = arith.constant 0 : i32
    %c0_i32_0 = arith.constant 0 : i32
    %c0_i32_1 = arith.constant 0 : i32
    return %c0_i32, %c0_i32_0 : i32, i32
  }
  func.func @transform_6(%arg0: i32) -> (i32, i32) {
    %c0_i32 = arith.constant 0 : i32
    %c0_i32_0 = arith.constant 0 : i32
    %c0_i32_1 = arith.constant 0 : i32
    return %c0_i32, %c0_i32_0 : i32, i32
  }
  func.func @transform_7(%arg0: i32) -> (i32, i32) {
    %c0_i32 = arith.constant 0 : i32
    %c0_i32_0 = arith.constant 0 : i32
    return %arg0, %c0_i32 : i32, i32
  }
}

</mosaic_0001>

<bundles_post_ra>
// kernel: bottleneck_forward.1
= control target key start
LH: loop header
LB: loop body
LE: loop exit
PB: predicated region body
PF: predicated region fallthrough
CT: control target
= control target key end

     0   :  { %s5537_s0 = inlined_call_operand.hbm [shape: f32[4096,256], index: 0, kind: input, shape index: {}]   ;;  %s5538_s1 = inlined_call_operand.hbm [shape: f32[256,128], index: 1, kind: input, shape index: {}]   ;;  %s5539_s2 = inlined_call_operand.hbm [shape: f32[1,128], index: 2, kind: input, shape index: {}]   ;;  %s5540_s3 = inlined_call_operand.vmem [shape: f32[128,64], index: 3, kind: input, shape index: {}]   ;;  %s5541_s4 = inlined_call_operand.hbm [shape: f32[1,64], index: 4, kind: input, shape index: {}]   ;;  %s5542_s5 = inlined_call_operand.hbm [shape: f32[1,64], index: 5, kind: input, shape index: {}]   ;;  %s5543_s6 = inlined_call_operand.<no memory space> [shape: f32[1,1], index: 6, kind: input, shape index: {}]   ;;  %s5544_s7 = inlined_call_operand.vmem [shape: f32[4096,1], index: 7, kind: output, shape index: {}]  }
   0x1   :  { %v12_v0 = vstv %s5543_s6 }
   0x2   :  { %13 = vst [vmem:[#allocation2] sm:$0x1] %v12_v0 }
   0x3   :  { %14 = vsyncpa [#allocation4], 0 }
   0x4   :  { %16 = vsyncpa [#allocation4 + $0x1], 0 }
   0x5   :  { %17 = vsyncpa [#allocation6], 0 }
   0x6   :  { %18 = vsyncpa [#allocation9], 0  ;;  %s4011_s26 = smov 0   ;;  %s4013_s27 = smov 0  }
   0x7   :  { %s4015_s28 = smov 0   ;;  %s4017_s29 = smov 0  }
   0x8 LB: > { %s3229_s6 = sadd.s32 4294967295, %s3956_s29   ;;  %p44_p0 = scmp.ne.s32.totalorder %s3948_s27, %s3944_s26  ;;  %s3956_s29 = sphi %s4017_s29, %s5560_s29   ;;  %s3952_s28 = sphi %s4015_s28, %s5559_s28   ;;  %s3948_s27 = sphi %s4013_s27, %s5558_s27   ;;  %s3944_s26 = sphi %s4011_s26, %s5557_s26  }
   0x9   : > { %p4033_p1 = scmp.eq.s32.totalorder %s3229_s6, 0  ;;  %p3231_p2 = scmp.ge.s32.totalorder %s3956_s29, 1 }
   0xa   : > { %p207_p3 = scmp.lt.s32.totalorder %s3956_s29, 5  ;;  %s3958_s10 = smov [#allocation5]  }
   0xb   : > { %s5549_s30 = scalar_select %p4033_p1, 1, 0 }
   0xc   : > { %p4041_p4 = por %p4033_p1, %p44_p0  ;;  %p4045_p5 = pnand %p3231_p2, %p207_p3 }
   0xd   : > { %s219_s11 = sshll.u32 %s3958_s10, 4  ;;  %s3959_s13 = smov [#allocation8]   ;;  %s220_s11 = int_to_ptr.vmem [resolvable:$true] %s219_s11 }
   0xe   : > { %s5550_s8 = scalar_select %p4041_p4, 1, 0 }
   0xf   : > { %s5551_s9 = scalar_select %p4045_p5, 1, 0 }
  0x10   : > { %p3707_p6 = pneg %p4045_p5  ;;  %s247_s14 = sshll.u32 %s3959_s13, 4  ;;  %s248_s14 = int_to_ptr.vmem [resolvable:$true] %s247_s14 }
  0x11   : > { %s3960_s15 = smov [#allocation7]   ;;  %s3793_s17 = scalar_lea.vmem %s220_s11, 4096 }
  0x12   : > { %p4053_p7 = pnand %p3707_p6, %p4033_p1  ;;  %s233_s16 = sshll.u32 %s3960_s15, 4  ;;  %s234_s16 = int_to_ptr.vmem [resolvable:$true] %s233_s16 }
  0x13   : > { %p3794_p9 = scmp.ne.s32.totalorder %s220_s11, %s3793_s17  ;;  %p3801_p12 = scmp.lt.s32.totalorder %s220_s11, %s220_s11 }
  0x14   : > { %p3784_p8 = pneg %p4053_p7  ;;  %p3802_p13 = scmp.lt.s32.totalorder %s3793_s17, %s3793_s17 }
  0x16   : > { %p3796_p10 = pnand %p3794_p9, %p3784_p8  ;;  %p3803_p0 = por %p3802_p13, %p3801_p12 }
  0x18   : > { %p3797_p11 = pneg %p3796_p10 }
  0x1a   : > { %p3804_p2 = pnand %p3803_p0, %p3797_p11 }
  0x1c   : > { %3807 = shalt.err (!%p3804_p2)
}
  0x1d   : > { %s3961_s18 = smov 128   ;;  %s3962_s19 = smov 8  }
  0x1e   : > { %3710 = dma.hbm_to_vmem [thread:$0]  (!%p4053_p7), %s5538_s1, 4096, %s220_s11, [#allocation6], %s3961_s18, %s3961_s18, %s3962_s19  }
  0x1f   : > { %s3819_s22 = scalar_lea.vmem %s248_s14, 16  ;;  %s3826_s23 = scalar_lea.vmem %s248_s14, 32 }
  0x20   : > { %p3820_p3 = scmp.ne.s32.totalorder %s248_s14, %s3819_s22  ;;  %p3827_p10 = scmp.lt.s32.totalorder %s248_s14, %s248_s14 }
  0x21   : > { %p3828_p12 = scmp.lt.s32.totalorder %s3826_s23, %s3819_s22 }
  0x22   : > { %p3822_p6 = pnand %p3820_p3, %p3784_p8 }
  0x23   : > { %p3829_p11 = por %p3828_p12, %p3827_p10 }
  0x24   : > { %p3823_p9 = pneg %p3822_p6 }
  0x26   : > { %p3830_p13 = pnand %p3829_p11, %p3823_p9 }
  0x28   : > { %3833 = shalt.err (!%p3830_p13)
}
  0x29   : > { %3716 = dma.hbm_to_vmem [thread:$0]  (!%p4053_p7), %s5541_s4, 16, %s248_s14, [#allocation9]  }
  0x2a   : > { %s3845_s26 = scalar_lea.vmem %s234_s16, 16  ;;  %s3852_s10 = scalar_lea.vmem %s234_s16, 32 }
  0x2b   : > { %p3846_p0 = scmp.ne.s32.totalorder %s234_s16, %s3845_s26  ;;  %p3853_p6 = scmp.lt.s32.totalorder %s234_s16, %s234_s16 }
  0x2c   : > { %p3854_p1 = scmp.lt.s32.totalorder %s3852_s10, %s3845_s26 }
  0x2d   : > { %p3848_p2 = pnand %p3846_p0, %p3784_p8 }
  0x2e   : > { %p3855_p10 = por %p3854_p1, %p3853_p6 }
  0x2f   : > { %p3849_p3 = pneg %p3848_p2 }
  0x31   : > { %p3856_p9 = pnand %p3855_p10, %p3849_p3 }
  0x33   : > { %3859 = shalt.err (!%p3856_p9)
}
  0x34   : > { %3713 = dma.hbm_to_vmem [thread:$0]  (!%p4053_p7), %s5539_s2, 16, %s234_s16, [#allocation6]  }
  0x35   : > { %s3963_s14 = smov [#allocation10]  }
  0x36   : > { %s258_s15 = sshll.u32 %s3963_s14, 4  ;;  %s259_s15 = int_to_ptr.vmem [resolvable:$true] %s258_s15 }
  0x37   : > { %s3871_s17 = scalar_lea.vmem %s259_s15, 16  ;;  %s3878_s18 = scalar_lea.vmem %s259_s15, 32 }
  0x38   : > { %p3872_p12 = scmp.ne.s32.totalorder %s259_s15, %s3871_s17  ;;  %p3879_p1 = scmp.lt.s32.totalorder %s259_s15, %s259_s15 }
  0x39   : > { %p3880_p0 = scmp.lt.s32.totalorder %s3878_s18, %s3871_s17 }
  0x3a   : > { %p3874_p11 = pnand %p3872_p12, %p3784_p8 }
  0x3b   : > { %p3881_p2 = por %p3880_p0, %p3879_p1 }
  0x3c   : > { %p3875_p13 = pneg %p3874_p11 }
  0x3e   : > { %p3882_p3 = pnand %p3881_p2, %p3875_p13 }
  0x40   : > { %3885 = shalt.err (!%p3882_p3)
}
  0x41   : > { %3719 = dma.hbm_to_vmem [thread:$0]  (!%p4053_p7), %s5542_s5, 16, %s259_s15, [#allocation9]  }
  0x42   : > { %s4092_s16 = sadd.s32 1, %s3956_s29   ;;  %s31_s21 = sadd.s32 1, %s3952_s28 }
  0x43   : > { %s28_s22 = ssub.s32 %s3956_s29, %s4092_s16  ;;  %p38_p8 = scmp.ne.s32.totalorder %s3952_s28, %s3948_s27 }
  0x44   : > { %p29_p6 = scmp.eq.s32.totalorder %s28_s22, 0  ;;  %p39_p10 = scmp.eq.s32.totalorder %s3956_s29, 0 }
  0x45   : > { %p3728_p9 = scmp.lt.s32.totalorder %s3956_s29, 4  ;;  %s272_s12 = sand.u32 1, %s3952_s28  }
  0x46   : > { %s4103_s23 = scalar_select %p29_p6, %s3952_s28, %s31_s21  }
  0x47   : > { %p40_p12 = por %p39_p10, %p38_p8  ;;  %s3237_s24 = sshll.u32 %s272_s12, 11 }
  0x48   : > { %s3256_s25 = sshll.u32 %s3956_s29, 15  ;;  %s276_s13 = scalar_lea.vmem [#allocation3], %s3237_s24 }
  0x49   : > { %s4109_s11 = scalar_lea.hbm %s5537_s0, %s3256_s25  ;;  %s284_s14 = sshll.u32 %s276_s13, 4  ;;  %s4115_s14 = int_to_ptr.vmem [resolvable:$true] %s284_s14 }
  0x4a   : > { %p4111_p7 = pnand %p3728_p9, %p40_p12  ;;  %s4117_s17 = scalar_lea.sflag [#allocation4], %s272_s12 }
  0x4b   : > { %s3886_s18 = scalar_lea.hbm %s4109_s11, 32768  ;;  %s3891_s21 = scalar_lea.hbm %s5537_s0, 131072 }
  0x4c   : > { %p3887_p11 = scmp.ne.s32.totalorder %s4109_s11, %s3886_s18  ;;  %p3888_p13 = pneg %p4111_p7 }
  0x4d   : > { %p3892_p2 = scmp.lt.s32.totalorder %s4109_s11, %s5537_s0  ;;  %p3893_p3 = scmp.lt.s32.totalorder %s3891_s21, %s3886_s18 }
  0x4e   : > { %p3889_p1 = pnand %p3888_p13, %p3887_p11 }
  0x4f   : > { %p3894_p8 = por %p3893_p3, %p3892_p2 }
  0x50   : > { %p3890_p0 = pneg %p3889_p1 }
  0x52   : > { %p3895_p6 = pnand %p3894_p8, %p3890_p0 }
  0x54   : > { %3898 = shalt.err (!%p3895_p6)
}
  0x55   : > { %s3899_s12 = scalar_lea.vmem %s4115_s14, 32768  ;;  %s3964_s25 = smov [#allocation3]  }
  0x56   : > { %p3900_p10 = scmp.ne.s32.totalorder %s4115_s14, %s3899_s12  ;;  %s3904_s26 = sshll.u32 %s3964_s25, 4  ;;  %s3905_s26 = int_to_ptr.vmem [resolvable:$false] %s3904_s26 }
  0x57   : > { %s3906_s10 = scalar_lea.vmem %s3905_s26, 65536  ;;  %p3907_p11 = scmp.lt.s32.totalorder %s4115_s14, %s3905_s26 }
  0x58   : > { %p3902_p9 = pnand %p3900_p10, %p3888_p13  ;;  %p3908_p1 = scmp.lt.s32.totalorder %s3906_s10, %s3899_s12 }
  0x5a   : > { %p3903_p12 = pneg %p3902_p9  ;;  %p3909_p4 = por %p3908_p1, %p3907_p11 }
  0x5c   : > { %p3910_p5 = pnand %p3909_p4, %p3903_p12 }
  0x5e   : > { %3913 = shalt.err (!%p3910_p5)
}
  0x5f   : > { %s3965_s13 = smov 256   ;;  %s3966_s18 = smov 16  }
  0x60   : > { %3723 = dma.hbm_to_vmem [thread:$0]  (!%p4111_p7), %s4109_s11, 32768, %s4115_s14, %s4117_s17, %s3965_s13, %s3965_s13, %s3966_s18  }
  0x61   : > { %p5554_p13 = scmp.ne.s32.totalorder %s5551_s9, 0 }
  0x62   : > { %s298_s19 = sand.u32 (!%p5554_p13), 1, %s3948_s27   ;;  %p5555_p4 = scmp.ne.s32.totalorder (!%p5554_p13), %s5550_s8, 0 }
  0x63   : > { %296 = sbr.rel (%p5554_p13) target bundleno = 1159 (0x487), region = 48  ;;  %s3242_s20 = sshll.u32 (!%p5554_p13), %s298_s19, 11 }
  0x64   : > { %s299_s21 = scalar_lea.sflag (!%p5554_p13), [#allocation4], %s298_s19  ;;  %s4141_s22 = scalar_lea.vmem (!%p5554_p13), [#allocation3], %s3242_s20 }
  0x68   : > { %3931 = dma.done.wait (%p5555_p4), %s299_s21, 32768  }
  0x69   : > { %3933 = vsyncadd (%p5555_p4), %s299_s21, 4294934528  ;;  %p5556_p5 = scmp.ne.s32.totalorder %s5549_s30, 0 }
  0x6b   : > { %3935 = dma.done.wait (%p5556_p5), [#allocation6], 4112  }
  0x6c   : > { %3937 = vsyncadd (%p5556_p5), [#allocation6], 4294963184 }
  0x6d   : > { %3939 = dma.done.wait (%p5556_p5), [#allocation9], 32  }
  0x6e   : > { %3941 = vsyncadd (%p5556_p5), [#allocation9], 4294967264  ;;  %v3967_v1 = vmov 0.0   ;;  %v627_v2 = vld [vmem:[#allocation5 + $0x78] sm:$0xff]  ;;  %v626_v3 = vld [vmem:[#allocation5 + $0x70] sm:$0xff]  ;;  %vm2475_vm0 = vcmask 523264  }
  0x6f   : > { %651 = vmatprep.subr.mxu0 %v3967_v1  ;;  %3625 = vmatprep.subr.mxu1 %v3967_v1  ;;  %v625_v4 = vld [vmem:[#allocation5 + $0x68] sm:$0xff]  ;;  %v624_v5 = vld [vmem:[#allocation5 + $0x60] sm:$0xff]  ;;  %v623_v6 = vld [vmem:[#allocation5 + $0x58] sm:$0xff]  ;;  %vm2995_vm1 = vcmask 7168  }
  0x70   : > { %652 = vmatpush1.msra.mxu0 %v627_v2  ;;  %3657 = vmatpush1.msra.mxu1 %v627_v2  ;;  %v622_v7 = vld [vmem:[#allocation5 + $0x50] sm:$0xff]  ;;  %v621_v8 = vld [vmem:[#allocation5 + $0x48] sm:$0xff]  ;;  %v620_v10 = vld [vmem:[#allocation5 + $0x40] sm:$0xff] }
  0x71   : > { %653 = vmatprep.subr.mxu0 %v3967_v1  ;;  %3626 = vmatprep.subr.mxu1 %v3967_v1  ;;  %v357_v9 = vld [vmem:[%s4141_s22 + $0x8] sm:$0xff]  ;;  %v619_v11 = vld [vmem:[#allocation5 + $0x38] sm:$0xff]  ;;  %v618_v12 = vld [vmem:[#allocation5 + $0x30] sm:$0xff] }
  0x72   : > { %654 = vmatpush1.msra.mxu0 %v626_v3  ;;  %3658 = vmatpush1.msra.mxu1 %v626_v3  ;;  %v617_v13 = vld [vmem:[#allocation5 + $0x28] sm:$0xff]  ;;  %v616_v14 = vld [vmem:[#allocation5 + $0x20] sm:$0xff]  ;;  %v615_v15 = vld [vmem:[#allocation5 + $0x18] sm:$0xff] }
  0x73   : > { %655 = vmatprep.subr.mxu0 %v3967_v1  ;;  %3627 = vmatprep.subr.mxu1 %v3967_v1  ;;  %v614_v16 = vld [vmem:[#allocation5 + $0x10] sm:$0xff]  ;;  %v613_v17 = vld [vmem:[#allocation5 + $0x8] sm:$0xff]  ;;  %v612_v18 = vld [vmem:[#allocation5] sm:$0xff] }
  0x74   : > { %656 = vmatpush1.msra.mxu0 %v625_v4  ;;  %3659 = vmatpush1.msra.mxu1 %v625_v4  ;;  %v643_v19 = vld [vmem:[#allocation5 + $0xf8] sm:$0xff]  ;;  %v642_v20 = vld [vmem:[#allocation5 + $0xf0] sm:$0xff]  ;;  %v641_v21 = vld [vmem:[#allocation5 + $0xe8] sm:$0xff] }
  0x75   : > { %657 = vmatprep.subr.mxu0 %v3967_v1  ;;  %3628 = vmatprep.subr.mxu1 %v3967_v1  ;;  %v640_v22 = vld [vmem:[#allocation5 + $0xe0] sm:$0xff]  ;;  %v639_v23 = vld [vmem:[#allocation5 + $0xd8] sm:$0xff]  ;;  %v638_v24 = vld [vmem:[#allocation5 + $0xd0] sm:$0xff] }
  0x76   : > { %658 = vmatpush1.msra.mxu0 %v624_v5  ;;  %3660 = vmatpush1.msra.mxu1 %v624_v5  ;;  %v637_v25 = vld [vmem:[#allocation5 + $0xc8] sm:$0xff]  ;;  %v636_v26 = vld [vmem:[#allocation5 + $0xc0] sm:$0xff]  ;;  %v635_v27 = vld [vmem:[#allocation5 + $0xb8] sm:$0xff] }
  0x77   : > { %659 = vmatprep.subr.mxu0 %v3967_v1  ;;  %3629 = vmatprep.subr.mxu1 %v3967_v1  ;;  %v634_v28 = vld [vmem:[#allocation5 + $0xb0] sm:$0xff]  ;;  %v633_v29 = vld [vmem:[#allocation5 + $0xa8] sm:$0xff]  ;;  %v632_v30 = vld [vmem:[#allocation5 + $0xa0] sm:$0xff] }
  0x78   : > { %660 = vmatpush1.msra.mxu0 %v623_v6  ;;  %3661 = vmatpush1.msra.mxu1 %v623_v6  ;;  %v631_v31 = vld [vmem:[#allocation5 + $0x98] sm:$0xff]  ;;  %v630_v32 = vld [vmem:[#allocation5 + $0x90] sm:$0xff]  ;;  %v629_v33 = vld [vmem:[#allocation5 + $0x88] sm:$0xff] }
  0x79   : > { %661 = vmatprep.subr.mxu0 %v3967_v1  ;;  %3630 = vmatprep.subr.mxu1 %v3967_v1  ;;  %v628_v34 = vld [vmem:[#allocation5 + $0x80] sm:$0xff]  ;;  %v359_v36 = vld [vmem:[%s4141_s22 + $0x18] sm:$0xff]  ;;  %v549_v37 = vld [vmem:[%s4141_s22 + $0x608] sm:$0xff] }
  0x7a   : > { %662 = vmatpush1.msra.mxu0 %v622_v7  ;;  %715 = vmatprep.mubr.f32.mxu0 %v357_v9  ;;  %v356_v35 = vld [vmem:[%s4141_s22] sm:$0xff]  ;;  %v551_v39 = vld [vmem:[%s4141_s22 + $0x618] sm:$0xff]  ;;  %v358_v40 = vld [vmem:[%s4141_s22 + $0x10] sm:$0xff] }
  0x7b   : > { %663 = vmatprep.subr.mxu0 %v3967_v1  ;;  %3662 = vmatpush1.msra.mxu1 %v622_v7  ;;  %v548_v38 = vld [vmem:[%s4141_s22 + $0x600] sm:$0xff]  ;;  %v361_v41 = vld [vmem:[%s4141_s22 + $0x28] sm:$0xff]  ;;  %v550_v42 = vld [vmem:[%s4141_s22 + $0x610] sm:$0xff] }
  0x7c   : > { %664 = vmatpush1.msra.mxu0 %v621_v8  ;;  %3631 = vmatprep.subr.mxu1 %v3967_v1  ;;  %v553_v43 = vld [vmem:[%s4141_s22 + $0x628] sm:$0xff]  ;;  %v360_v44 = vld [vmem:[%s4141_s22 + $0x20] sm:$0xff]  ;;  %v363_v45 = vld [vmem:[%s4141_s22 + $0x38] sm:$0xff] }
  0x7d   : > { %665 = vmatprep.subr.mxu0 %v3967_v1  ;;  %3663 = vmatpush1.msra.mxu1 %v621_v8  ;;  %v552_v46 = vld [vmem:[%s4141_s22 + $0x620] sm:$0xff]  ;;  %v555_v47 = vld [vmem:[%s4141_s22 + $0x638] sm:$0xff]  ;;  %v362_v48 = vld [vmem:[%s4141_s22 + $0x30] sm:$0xff] }
  0x7e   : > { %666 = vmatpush1.msra.mxu0 %v620_v10  ;;  %3632 = vmatprep.subr.mxu1 %v3967_v1  ;;  %v365_v49 = vld [vmem:[%s4141_s22 + $0x48] sm:$0xff]  ;;  %v554_v50 = vld [vmem:[%s4141_s22 + $0x630] sm:$0xff]  ;;  %v364_v52 = vld [vmem:[%s4141_s22 + $0x40] sm:$0xff] }
  0x7f   : > { %667 = vmatprep.subr.mxu0 %v3967_v1  ;;  %3664 = vmatpush1.msra.mxu1 %v620_v10  ;;  %v557_v51 = vld [vmem:[%s4141_s22 + $0x648] sm:$0xff]  ;;  %v367_v53 = vld [vmem:[%s4141_s22 + $0x58] sm:$0xff]  ;;  %v556_v54 = vld [vmem:[%s4141_s22 + $0x640] sm:$0xff] }
  0x80   : > { %668 = vmatpush1.msra.mxu0 %v619_v11  ;;  %3633 = vmatprep.subr.mxu1 %v3967_v1  ;;  %v559_v55 = vld [vmem:[%s4141_s22 + $0x658] sm:$0xff]  ;;  %v366_v56 = vld [vmem:[%s4141_s22 + $0x50] sm:$0xff]  ;;  %v369_v57 = vld [vmem:[%s4141_s22 + $0x68] sm:$0xff] }
  0x81   : > { %669 = vmatprep.subr.mxu0 %v3967_v1  ;;  %3665 = vmatpush1.msra.mxu1 %v619_v11  ;;  %v558_v58 = vld [vmem:[%s4141_s22 + $0x650] sm:$0xff]  ;;  %v561_v59 = vld [vmem:[%s4141_s22 + $0x668] sm:$0xff]  ;;  %v368_v60 = vld [vmem:[%s4141_s22 + $0x60] sm:$0xff] }
  0x82   : > { %670 = vmatpush1.msra.mxu0 %v618_v12  ;;  %3634 = vmatprep.subr.mxu1 %v3967_v1  ;;  %v371_v61 = vld [vmem:[%s4141_s22 + $0x78] sm:$0xff]  ;;  %v560_v62 = vld [vmem:[%s4141_s22 + $0x660] sm:$0xff]  ;;  %v370_v0 = vld [vmem:[%s4141_s22 + $0x70] sm:$0xff] }
  0x83   : > { %671 = vmatprep.subr.mxu0 %v3967_v1  ;;  %3666 = vmatpush1.msra.mxu1 %v618_v12  ;;  %v563_v63 = vld [vmem:[%s4141_s22 + $0x678] sm:$0xff]  ;;  %v562_v2 = vld [vmem:[%s4141_s22 + $0x670] sm:$0xff]  ;;  %v565_v3 = vld [vmem:[%s4141_s22 + $0x688] sm:$0xff] }
  0x84   : > { %672 = vmatpush1.msra.mxu0 %v617_v13  ;;  %3635 = vmatprep.subr.mxu1 %v3967_v1  ;;  %v372_v4 = vld [vmem:[%s4141_s22 + $0x80] sm:$0xff]  ;;  %v375_v5 = vld [vmem:[%s4141_s22 + $0x98] sm:$0xff]  ;;  %v374_v8 = vld [vmem:[%s4141_s22 + $0x90] sm:$0xff] }
  0x85   : > { %673 = vmatprep.subr.mxu0 %v3967_v1  ;;  %3667 = vmatpush1.msra.mxu1 %v617_v13  ;;  %v564_v6 = vld [vmem:[%s4141_s22 + $0x680] sm:$0xff]  ;;  %v567_v7 = vld [vmem:[%s4141_s22 + $0x698] sm:$0xff]  ;;  %v377_v9 = vld [vmem:[%s4141_s22 + $0xa8] sm:$0xff] }
  0x86   : > { %674 = vmatpush1.msra.mxu0 %v616_v14  ;;  %3636 = vmatprep.subr.mxu1 %v3967_v1  ;;  %v566_v10 = vld [vmem:[%s4141_s22 + $0x690] sm:$0xff]  ;;  %v569_v11 = vld [vmem:[%s4141_s22 + $0x6a8] sm:$0xff]  ;;  %v376_v12 = vld [vmem:[%s4141_s22 + $0xa0] sm:$0xff] }
  0x87   : > { %675 = vmatprep.subr.mxu0 %v3967_v1  ;;  %3668 = vmatpush1.msra.mxu1 %v616_v14  ;;  %v379_v13 = vld [vmem:[%s4141_s22 + $0xb8] sm:$0xff]  ;;  %v568_v14 = vld [vmem:[%s4141_s22 + $0x6a0] sm:$0xff] }
  0x88   : > { %676 = vmatpush1.msra.mxu0 %v615_v15  ;;  %3637 = vmatprep.subr.mxu1 %v3967_v1 }
  0x89   : > { %677 = vmatprep.subr.mxu0 %v3967_v1  ;;  %3669 = vmatpush1.msra.mxu1 %v615_v15  ;;  %v571_v15 = vld [vmem:[%s4141_s22 + $0x6b8] sm:$0xff] }
  0x8a   : > { %678 = vmatpush1.msra.mxu0 %v614_v16  ;;  %3638 = vmatprep.subr.mxu1 %v3967_v1 }
  0x8b   : > { %679 = vmatprep.subr.mxu0 %v3967_v1  ;;  %3670 = vmatpush1.msra.mxu1 %v614_v16  ;;  %v1499_v16 = vld [vmem:[%s5540_s3 + $0x78] sm:$0xff] }
  0x8c   : > { %680 = vmatpush1.msra.mxu0 %v613_v17  ;;  %3639 = vmatprep.subr.mxu1 %v3967_v1 }
  0x8d   : > { %681 = vmatprep.subr.mxu0 %v3967_v1  ;;  %3671 = vmatpush1.msra.mxu1 %v613_v17  ;;  %v378_v17 = vld [vmem:[%s4141_s22 + $0xb0] sm:$0xff] }
  0x8e   : > { %682 = vmatpush1.msra.mxu0 %v612_v18  ;;  %3640 = vmatprep.subr.mxu1 %v3967_v1 }
  0x8f   : > { %683 = vmatprep.subr.mxu0 %v3967_v1  ;;  %3672 = vmatpush1.msra.mxu1 %v612_v18  ;;  %v1498_v18 = vld [vmem:[%s5540_s3 + $0x70] sm:$0xff] }
  0x90   : > { %684 = vmatpush2.msra.mxu0 %v643_v19  ;;  %3641 = vmatprep.subr.mxu1 %v3967_v1 }
  0x91   : > { %685 = vmatprep.subr.mxu0 %v3967_v1  ;;  %3673 = vmatpush2.msra.mxu1 %v643_v19  ;;  %v381_v19 = vld [vmem:[%s4141_s22 + $0xc8] sm:$0xff] }
  0x92   : > { %686 = vmatpush2.msra.mxu0 %v642_v20  ;;  %3642 = vmatprep.subr.mxu1 %v3967_v1 }
  0x93   : > { %687 = vmatprep.subr.mxu0 %v3967_v1  ;;  %3674 = vmatpush2.msra.mxu1 %v642_v20  ;;  %v570_v20 = vld [vmem:[%s4141_s22 + $0x6b0] sm:$0xff] }
  0x94   : > { %688 = vmatpush2.msra.mxu0 %v641_v21  ;;  %3643 = vmatprep.subr.mxu1 %v3967_v1 }
  0x95   : > { %689 = vmatprep.subr.mxu0 %v3967_v1  ;;  %3675 = vmatpush2.msra.mxu1 %v641_v21  ;;  %v573_v21 = vld [vmem:[%s4141_s22 + $0x6c8] sm:$0xff] }
  0x96   : > { %690 = vmatpush2.msra.mxu0 %v640_v22  ;;  %3644 = vmatprep.subr.mxu1 %v3967_v1 }
  0x97   : > { %691 = vmatprep.subr.mxu0 %v3967_v1  ;;  %3676 = vmatpush2.msra.mxu1 %v640_v22  ;;  %v1497_v22 = vld [vmem:[%s5540_s3 + $0x68] sm:$0xff] }
  0x98   : > { %692 = vmatpush2.msra.mxu0 %v639_v23  ;;  %3645 = vmatprep.subr.mxu1 %v3967_v1 }
  0x99   : > { %693 = vmatprep.subr.mxu0 %v3967_v1  ;;  %3677 = vmatpush2.msra.mxu1 %v639_v23  ;;  %v380_v23 = vld [vmem:[%s4141_s22 + $0xc0] sm:$0xff] }
  0x9a   : > { %694 = vmatpush2.msra.mxu0 %v638_v24  ;;  %3646 = vmatprep.subr.mxu1 %v3967_v1 }
  0x9b   : > { %695 = vmatprep.subr.mxu0 %v3967_v1  ;;  %3678 = vmatpush2.msra.mxu1 %v638_v24  ;;  %v1496_v24 = vld [vmem:[%s5540_s3 + $0x60] sm:$0xff] }
  0x9c   : > { %696 = vmatpush2.msra.mxu0 %v637_v25  ;;  %3647 = vmatprep.subr.mxu1 %v3967_v1 }
  0x9d   : > { %697 = vmatprep.subr.mxu0 %v3967_v1  ;;  %3679 = vmatpush2.msra.mxu1 %v637_v25  ;;  %v383_v25 = vld [vmem:[%s4141_s22 + $0xd8] sm:$0xff] }
  0x9e   : > { %698 = vmatpush2.msra.mxu0 %v636_v26  ;;  %3648 = vmatprep.subr.mxu1 %v3967_v1 }
  0x9f   : > { %699 = vmatprep.subr.mxu0 %v3967_v1  ;;  %3680 = vmatpush2.msra.mxu1 %v636_v26  ;;  %v572_v26 = vld [vmem:[%s4141_s22 + $0x6c0] sm:$0xff] }
  0xa0   : > { %700 = vmatpush2.msra.mxu0 %v635_v27  ;;  %3649 = vmatprep.subr.mxu1 %v3967_v1 }
  0xa1   : > { %701 = vmatprep.subr.mxu0 %v3967_v1  ;;  %3681 = vmatpush2.msra.mxu1 %v635_v27  ;;  %v575_v27 = vld [vmem:[%s4141_s22 + $0x6d8] sm:$0xff] }
  0xa2   : > { %702 = vmatpush2.msra.mxu0 %v634_v28  ;;  %3650 = vmatprep.subr.mxu1 %v3967_v1 }
  0xa3   : > { %703 = vmatprep.subr.mxu0 %v3967_v1  ;;  %3682 = vmatpush2.msra.mxu1 %v634_v28  ;;  %v1495_v28 = vld [vmem:[%s5540_s3 + $0x58] sm:$0xff] }
  0xa4   : > { %704 = vmatpush2.msra.mxu0 %v633_v29  ;;  %3651 = vmatprep.subr.mxu1 %v3967_v1 }
  0xa5   : > { %705 = vmatprep.subr.mxu0 %v3967_v1  ;;  %3683 = vmatpush2.msra.mxu1 %v633_v29  ;;  %v382_v29 = vld [vmem:[%s4141_s22 + $0xd0] sm:$0xff] }
  0xa6   : > { %706 = vmatpush2.msra.mxu0 %v632_v30  ;;  %3652 = vmatprep.subr.mxu1 %v3967_v1 }
  0xa7   : > { %707 = vmatprep.subr.mxu0 %v3967_v1  ;;  %3684 = vmatpush2.msra.mxu1 %v632_v30  ;;  %v1494_v30 = vld [vmem:[%s5540_s3 + $0x50] sm:$0xff] }
  0xa8   : > { %708 = vmatpush2.msra.mxu0 %v631_v31  ;;  %3653 = vmatprep.subr.mxu1 %v3967_v1 }
  0xa9   : > { %709 = vmatprep.subr.mxu0 %v3967_v1  ;;  %3685 = vmatpush2.msra.mxu1 %v631_v31  ;;  %v385_v31 = vld [vmem:[%s4141_s22 + $0xe8] sm:$0xff] }
  0xaa   : > { %710 = vmatpush2.msra.mxu0 %v630_v32  ;;  %3654 = vmatprep.subr.mxu1 %v3967_v1 }
  0xab   : > { %711 = vmatprep.subr.mxu0 %v3967_v1  ;;  %3686 = vmatpush2.msra.mxu1 %v630_v32  ;;  %v574_v32 = vld [vmem:[%s4141_s22 + $0x6d0] sm:$0xff] }
  0xac   : > { %712 = vmatpush2.msra.mxu0 %v629_v33  ;;  %3655 = vmatprep.subr.mxu1 %v3967_v1 }
  0xad   : > { %713 = vmatprep.subr.mxu0 %v3967_v1  ;;  %3687 = vmatpush2.msra.mxu1 %v629_v33  ;;  %v577_v33 = vld [vmem:[%s4141_s22 + $0x6e8] sm:$0xff] }
  0xae   : > { %714 = vmatpush2.msra.mxu0 %v628_v34  ;;  %3656 = vmatprep.subr.mxu1 %v3967_v1  ;;  %v373_v1 = vld [vmem:[%s4141_s22 + $0x88] sm:$0xff] }
  0xaf   : > { %716 = vmatmul.mubr.f32.vlgmr.msra.gmra.mxu0 %v356_v35  ;;  %3688 = vmatpush2.msra.mxu1 %v628_v34  ;;  %v1493_v34 = vld [vmem:[%s5540_s3 + $0x48] sm:$0xff] }
  0xb0   : > { %720 = vmatprep.mubr.f32.mxu0 %v359_v36  ;;  %1195 = vmatprep.mubr.f32.mxu1 %v549_v37  ;;  %v384_v35 = vld [vmem:[%s4141_s22 + $0xe0] sm:$0xff]  ;;  %v387_v37 = vld [vmem:[%s4141_s22 + $0xf8] sm:$0xff] }
  0xb1   : > { %1196 = vmatmul.mubr.f32.vlgmr.msra.gmra.mxu1 %v548_v38  ;;  %3401 = vmatprep.subr.mxu1 %v1499_v16  ;;  %v1492_v36 = vld [vmem:[%s5540_s3 + $0x40] sm:$0xff] }
  0xb2   : > { %1200 = vmatprep.mubr.f32.mxu1 %v551_v39  ;;  %3402 = vmatpush3.msra.mxu1 %v1499_v16  ;;  %v576_v38 = vld [vmem:[%s4141_s22 + $0x6e0] sm:$0xff]  ;;  %v579_v39 = vld [vmem:[%s4141_s22 + $0x6f8] sm:$0xff]  ;;  %v402_v16 = vld [vmem:[%s4141_s22 + $0x170] sm:$0xff] }
  0xb3   : > { %721 = vmatmul.mubr.f32.gmra.mxu0 %v358_v40  ;;  %3403 = vmatprep.subr.mxu1 %v1498_v18  ;;  %v1491_v40 = vld [vmem:[%s5540_s3 + $0x38] sm:$0xff] }
  0xb4   : > { %725 = vmatprep.mubr.f32.mxu0 %v361_v41  ;;  %3404 = vmatpush3.msra.mxu1 %v1498_v18  ;;  %v386_v41 = vld [vmem:[%s4141_s22 + $0xf0] sm:$0xff] }
  0xb5   : > { %1201 = vmatmul.mubr.f32.gmra.mxu1 %v550_v42  ;;  %3405 = vmatprep.subr.mxu1 %v1497_v22  ;;  %v1490_v42 = vld [vmem:[%s5540_s3 + $0x30] sm:$0xff] }
  0xb6   : > { %1205 = vmatprep.mubr.f32.mxu1 %v553_v43  ;;  %3406 = vmatpush3.msra.mxu1 %v1497_v22  ;;  %v389_v43 = vld [vmem:[%s4141_s22 + $0x108] sm:$0xff]  ;;  %v594_v18 = vld [vmem:[%s4141_s22 + $0x770] sm:$0xff]  ;;  %v596_v22 = vld [vmem:[%s4141_s22 + $0x780] sm:$0xff] }
  0xb7   : > { %726 = vmatmul.mubr.f32.gmra.mxu0 %v360_v44  ;;  %3407 = vmatprep.subr.mxu1 %v1496_v24  ;;  %v578_v44 = vld [vmem:[%s4141_s22 + $0x6f0] sm:$0xff] }
  0xb8   : > { %730 = vmatprep.mubr.f32.mxu0 %v363_v45  ;;  %3408 = vmatpush3.msra.mxu1 %v1496_v24  ;;  %v581_v45 = vld [vmem:[%s4141_s22 + $0x708] sm:$0xff]  ;;  %v406_v24 = vld [vmem:[%s4141_s22 + $0x190] sm:$0xff] }
  0xb9   : > { %1206 = vmatmul.mubr.f32.gmra.mxu1 %v552_v46  ;;  %3409 = vmatprep.subr.mxu1 %v1495_v28  ;;  %v1489_v46 = vld [vmem:[%s5540_s3 + $0x28] sm:$0xff] }
  0xba   : > { %1210 = vmatprep.mubr.f32.mxu1 %v555_v47  ;;  %3410 = vmatpush3.msra.mxu1 %v1495_v28  ;;  %v388_v47 = vld [vmem:[%s4141_s22 + $0x100] sm:$0xff] }
  0xbb   : > { %731 = vmatmul.mubr.f32.gmra.mxu0 %v362_v48  ;;  %3411 = vmatprep.subr.mxu1 %v1494_v30  ;;  %v1488_v48 = vld [vmem:[%s5540_s3 + $0x20] sm:$0xff] }
  0xbc   : > { %735 = vmatprep.mubr.f32.mxu0 %v365_v49  ;;  %3412 = vmatpush3.msra.mxu1 %v1494_v30  ;;  %v391_v49 = vld [vmem:[%s4141_s22 + $0x118] sm:$0xff]  ;;  %v408_v28 = vld [vmem:[%s4141_s22 + $0x1a0] sm:$0xff] }
  0xbd   : > { %1211 = vmatmul.mubr.f32.gmra.mxu1 %v554_v50  ;;  %3413 = vmatprep.subr.mxu1 %v1493_v34  ;;  %v580_v50 = vld [vmem:[%s4141_s22 + $0x700] sm:$0xff] }
  0xbe   : > { %1215 = vmatprep.mubr.f32.mxu1 %v557_v51  ;;  %3414 = vmatpush3.msra.mxu1 %v1493_v34  ;;  %v583_v51 = vld [vmem:[%s4141_s22 + $0x718] sm:$0xff]  ;;  %v600_v30 = vld [vmem:[%s4141_s22 + $0x7a0] sm:$0xff]  ;;  %v602_v34 = vld [vmem:[%s4141_s22 + $0x7b0] sm:$0xff] }
  0xbf   : > { %736 = vmatmul.mubr.f32.gmra.mxu0 %v364_v52  ;;  %3415 = vmatprep.subr.mxu1 %v1492_v36  ;;  %v1487_v52 = vld [vmem:[%s5540_s3 + $0x18] sm:$0xff] }
  0xc0   : > { %740 = vmatprep.mubr.f32.mxu0 %v367_v53  ;;  %3416 = vmatpush3.msra.mxu1 %v1492_v36  ;;  %v390_v53 = vld [vmem:[%s4141_s22 + $0x110] sm:$0xff]  ;;  %v412_v36 = vld [vmem:[%s4141_s22 + $0x1c0] sm:$0xff] }
  0xc1   : > { %1216 = vmatmul.mubr.f32.gmra.mxu1 %v556_v54  ;;  %3417 = vmatprep.subr.mxu1 %v1491_v40  ;;  %v393_v54 = vld [vmem:[%s4141_s22 + $0x128] sm:$0xff] }
  0xc2   : > { %1220 = vmatprep.mubr.f32.mxu1 %v559_v55  ;;  %3418 = vmatpush3.msra.mxu1 %v1491_v40  ;;  %v1486_v55 = vld [vmem:[%s5540_s3 + $0x10] sm:$0xff] }
  0xc3   : > { %741 = vmatmul.mubr.f32.gmra.mxu0 %v366_v56  ;;  %3419 = vmatprep.subr.mxu1 %v1490_v42  ;;  %v582_v56 = vld [vmem:[%s4141_s22 + $0x710] sm:$0xff] }
  0xc4   : > { %745 = vmatprep.mubr.f32.mxu0 %v369_v57  ;;  %3420 = vmatpush3.msra.mxu1 %v1490_v42  ;;  %v585_v57 = vld [vmem:[%s4141_s22 + $0x728] sm:$0xff]  ;;  %v414_v40 = vld [vmem:[%s4141_s22 + $0x1d0] sm:$0xff] }
  0xc5   : > { %1221 = vmatmul.mubr.f32.gmra.mxu1 %v558_v58  ;;  %3421 = vmatprep.subr.mxu1 %v1489_v46  ;;  %v1485_v58 = vld [vmem:[%s5540_s3 + $0x8] sm:$0xff]  ;;  %v606_v42 = vld [vmem:[%s4141_s22 + $0x7d0] sm:$0xff] }
  0xc6   : > { %1225 = vmatprep.mubr.f32.mxu1 %v561_v59  ;;  %3422 = vmatpush3.msra.mxu1 %v1489_v46  ;;  %v392_v59 = vld [vmem:[%s4141_s22 + $0x120] sm:$0xff] }
  0xc7   : > { %746 = vmatmul.mubr.f32.gmra.mxu0 %v368_v60  ;;  %3423 = vmatprep.subr.mxu1 %v1488_v48  ;;  %v395_v60 = vld [vmem:[%s4141_s22 + $0x138] sm:$0xff]  ;;  %v608_v46 = vld [vmem:[%s4141_s22 + $0x7e0] sm:$0xff] }
  0xc8   : > { %750 = vmatprep.mubr.f32.mxu0 %v371_v61  ;;  %3424 = vmatpush3.msra.mxu1 %v1488_v48  ;;  %v1484_v61 = vld [vmem:[%s5540_s3] sm:$0xff]  ;;  %v418_v48 = vld [vmem:[%s4141_s22 + $0x1f0] sm:$0xff] }
  0xc9   : > { %1226 = vmatmul.mubr.f32.gmra.mxu1 %v560_v62  ;;  %3425 = vmatprep.subr.mxu1 %v1487_v52  ;;  %v584_v62 = vld [vmem:[%s4141_s22 + $0x720] sm:$0xff] }
  0xca   : > { %1230 = vmatprep.mubr.f32.mxu1 %v563_v63  ;;  %3426 = vmatpush3.msra.mxu1 %v1487_v52  ;;  %v587_v63 = vld [vmem:[%s4141_s22 + $0x738] sm:$0xff] }
  0xcb   : > { %751 = vmatmul.mubr.f32.gmra.mxu0 %v370_v0  ;;  %3427 = vmatprep.subr.mxu1 %v1486_v55  ;;  %v394_v0 = vld [vmem:[%s4141_s22 + $0x130] sm:$0xff]  ;;  %v423_v52 = vld [vmem:[%s4141_s22 + $0x218] sm:$0xff] }
  0xcc   : > { %755 = vmatprep.mubr.f32.mxu0 %v373_v1  ;;  %3428 = vmatpush3.msra.mxu1 %v1486_v55  ;;  %v397_v1 = vld [vmem:[%s4141_s22 + $0x148] sm:$0xff]  ;;  %v424_v55 = vld [vmem:[%s4141_s22 + $0x220] sm:$0xff] }
  0xcd   : > { %1231 = vmatmul.mubr.f32.gmra.mxu1 %v562_v2  ;;  %3429 = vmatprep.subr.mxu1 %v1485_v58  ;;  %v586_v2 = vld [vmem:[%s4141_s22 + $0x730] sm:$0xff] }
  0xce   : > { %1235 = vmatprep.mubr.f32.mxu1 %v565_v3  ;;  %3430 = vmatpush3.msra.mxu1 %v1485_v58  ;;  %v589_v3 = vld [vmem:[%s4141_s22 + $0x748] sm:$0xff] }
  0xcf   : > { %756 = vmatmul.mubr.f32.gmra.mxu0 %v372_v4  ;;  %3431 = vmatprep.subr.mxu1 %v1484_v61  ;;  %v396_v4 = vld [vmem:[%s4141_s22 + $0x140] sm:$0xff]  ;;  %v429_v58 = vld [vmem:[%s4141_s22 + $0x248] sm:$0xff] }
  0xd0   : > { %760 = vmatprep.mubr.f32.mxu0 %v375_v5  ;;  %3432 = vmatpush3.msra.mxu1 %v1484_v61  ;;  %v399_v5 = vld [vmem:[%s4141_s22 + $0x158] sm:$0xff]  ;;  %v430_v61 = vld [vmem:[%s4141_s22 + $0x250] sm:$0xff] }
  0xd1   : > { %1236 = vmatmul.mubr.f32.gmra.mxu1 %v564_v6  ;;  %v588_v6 = vld [vmem:[%s4141_s22 + $0x740] sm:$0xff] }
  0xd2   : > { %1240 = vmatprep.mubr.f32.mxu1 %v567_v7  ;;  %v591_v7 = vld [vmem:[%s4141_s22 + $0x758] sm:$0xff] }
  0xd3   : > { %761 = vmatmul.mubr.f32.gmra.mxu0 %v374_v8  ;;  %v398_v8 = vld [vmem:[%s4141_s22 + $0x150] sm:$0xff] }
  0xd4   : > { %765 = vmatprep.mubr.f32.mxu0 %v377_v9  ;;  %v401_v9 = vld [vmem:[%s4141_s22 + $0x168] sm:$0xff] }
  0xd5   : > { %1241 = vmatmul.mubr.f32.gmra.mxu1 %v566_v10  ;;  %v590_v10 = vld [vmem:[%s4141_s22 + $0x750] sm:$0xff] }
  0xd6   : > { %1245 = vmatprep.mubr.f32.mxu1 %v569_v11  ;;  %v593_v11 = vld [vmem:[%s4141_s22 + $0x768] sm:$0xff] }
  0xd7   : > { %766 = vmatmul.mubr.f32.gmra.mxu0 %v376_v12  ;;  %v400_v12 = vld [vmem:[%s4141_s22 + $0x160] sm:$0xff] }
  0xd8   : > { %770 = vmatprep.mubr.f32.mxu0 %v379_v13  ;;  %v403_v13 = vld [vmem:[%s4141_s22 + $0x178] sm:$0xff] }
  0xd9   : > { %1246 = vmatmul.mubr.f32.gmra.mxu1 %v568_v14  ;;  %v592_v14 = vld [vmem:[%s4141_s22 + $0x760] sm:$0xff] }
  0xda   : > { %1250 = vmatprep.mubr.f32.mxu1 %v571_v15  ;;  %v595_v15 = vld [vmem:[%s4141_s22 + $0x778] sm:$0xff] }
  0xdb   : > { %771 = vmatmul.mubr.f32.gmra.mxu0 %v378_v17  ;;  %v405_v17 = vld [vmem:[%s4141_s22 + $0x188] sm:$0xff] }
  0xdc   : > { %775 = vmatprep.mubr.f32.mxu0 %v381_v19  ;;  %v597_v19 = vld [vmem:[%s4141_s22 + $0x788] sm:$0xff] }
  0xdd   : > { %1251 = vmatmul.mubr.f32.gmra.mxu1 %v570_v20  ;;  %v404_v20 = vld [vmem:[%s4141_s22 + $0x180] sm:$0xff] }
  0xde   : > { %1255 = vmatprep.mubr.f32.mxu1 %v573_v21  ;;  %v407_v21 = vld [vmem:[%s4141_s22 + $0x198] sm:$0xff] }
  0xdf   : > { %776 = vmatmul.mubr.f32.gmra.mxu0 %v380_v23  ;;  %v599_v23 = vld [vmem:[%s4141_s22 + $0x798] sm:$0xff] }
  0xe0   : > { %780 = vmatprep.mubr.f32.mxu0 %v383_v25  ;;  %v409_v25 = vld [vmem:[%s4141_s22 + $0x1a8] sm:$0xff] }
  0xe1   : > { %1256 = vmatmul.mubr.f32.gmra.mxu1 %v572_v26  ;;  %v598_v26 = vld [vmem:[%s4141_s22 + $0x790] sm:$0xff] }
  0xe2   : > { %1260 = vmatprep.mubr.f32.mxu1 %v575_v27  ;;  %v601_v27 = vld [vmem:[%s4141_s22 + $0x7a8] sm:$0xff] }
  0xe3   : > { %781 = vmatmul.mubr.f32.gmra.mxu0 %v382_v29  ;;  %v411_v29 = vld [vmem:[%s4141_s22 + $0x1b8] sm:$0xff] }
  0xe4   : > { %785 = vmatprep.mubr.f32.mxu0 %v385_v31  ;;  %v603_v31 = vld [vmem:[%s4141_s22 + $0x7b8] sm:$0xff] }
  0xe5   : > { %1261 = vmatmul.mubr.f32.gmra.mxu1 %v574_v32  ;;  %v410_v32 = vld [vmem:[%s4141_s22 + $0x1b0] sm:$0xff] }
  0xe6   : > { %1265 = vmatprep.mubr.f32.mxu1 %v577_v33  ;;  %v413_v33 = vld [vmem:[%s4141_s22 + $0x1c8] sm:$0xff] }
  0xe7   : > { %786 = vmatmul.mubr.f32.gmra.mxu0 %v384_v35  ;;  %v605_v35 = vld [vmem:[%s4141_s22 + $0x7c8] sm:$0xff] }
  0xe8   : > { %790 = vmatprep.mubr.f32.mxu0 %v387_v37  ;;  %v415_v37 = vld [vmem:[%s4141_s22 + $0x1d8] sm:$0xff] }
  0xe9   : > { %1266 = vmatmul.mubr.f32.gmra.mxu1 %v576_v38  ;;  %v604_v38 = vld [vmem:[%s4141_s22 + $0x7c0] sm:$0xff] }
  0xea   : > { %1270 = vmatprep.mubr.f32.mxu1 %v579_v39  ;;  %v607_v39 = vld [vmem:[%s4141_s22 + $0x7d8] sm:$0xff] }
  0xeb   : > { %791 = vmatmul.mubr.f32.gmra.mxu0 %v386_v41  ;;  %v417_v41 = vld [vmem:[%s4141_s22 + $0x1e8] sm:$0xff] }
  0xec   : > { %795 = vmatprep.mubr.f32.mxu0 %v389_v43  ;;  %v609_v43 = vld [vmem:[%s4141_s22 + $0x7e8] sm:$0xff] }
  0xed   : > { %1271 = vmatmul.mubr.f32.gmra.mxu1 %v578_v44  ;;  %v416_v44 = vld [vmem:[%s4141_s22 + $0x1e0] sm:$0xff] }
  0xee   : > { %1275 = vmatprep.mubr.f32.mxu1 %v581_v45  ;;  %v419_v45 = vld [vmem:[%s4141_s22 + $0x1f8] sm:$0xff] }
  0xef   : > { %796 = vmatmul.mubr.f32.gmra.mxu0 %v388_v47  ;;  %v611_v47 = vld [vmem:[%s4141_s22 + $0x7f8] sm:$0xff] }
  0xf0   : > { %800 = vmatprep.mubr.f32.mxu0 %v391_v49  ;;  %v421_v49 = vld [vmem:[%s4141_s22 + $0x208] sm:$0xff] }
  0xf1   : > { %1276 = vmatmul.mubr.f32.gmra.mxu1 %v580_v50  ;;  %v610_v50 = vld [vmem:[%s4141_s22 + $0x7f0] sm:$0xff] }
  0xf2   : > { %1280 = vmatprep.mubr.f32.mxu1 %v583_v51  ;;  %v420_v51 = vld [vmem:[%s4141_s22 + $0x200] sm:$0xff] }
  0xf3   : > { %801 = vmatmul.mubr.f32.gmra.mxu0 %v390_v53  ;;  %v422_v53 = vld [vmem:[%s4141_s22 + $0x210] sm:$0xff] }
  0xf4   : > { %805 = vmatprep.mubr.f32.mxu0 %v393_v54  ;;  %v425_v54 = vld [vmem:[%s4141_s22 + $0x228] sm:$0xff] }
  0xf5   : > { %1281 = vmatmul.mubr.f32.gmra.mxu1 %v582_v56  ;;  %v427_v56 = vld [vmem:[%s4141_s22 + $0x238] sm:$0xff] }
  0xf6   : > { %1285 = vmatprep.mubr.f32.mxu1 %v585_v57  ;;  %v426_v57 = vld [vmem:[%s4141_s22 + $0x230] sm:$0xff] }
  0xf7   : > { %806 = vmatmul.mubr.f32.gmra.mxu0 %v392_v59  ;;  %v428_v59 = vld [vmem:[%s4141_s22 + $0x240] sm:$0xff] }
  0xf8   : > { %810 = vmatprep.mubr.f32.mxu0 %v395_v60  ;;  %v431_v60 = vld [vmem:[%s4141_s22 + $0x258] sm:$0xff] }
  0xf9   : > { %1286 = vmatmul.mubr.f32.gmra.mxu1 %v584_v62  ;;  %v433_v62 = vld [vmem:[%s4141_s22 + $0x268] sm:$0xff] }
  0xfa   : > { %1290 = vmatprep.mubr.f32.mxu1 %v587_v63  ;;  %v432_v63 = vld [vmem:[%s4141_s22 + $0x260] sm:$0xff] }
  0xfb   : > { %811 = vmatmul.mubr.f32.gmra.mxu0 %v394_v0  ;;  %v435_v0 = vld [vmem:[%s4141_s22 + $0x278] sm:$0xff] }
  0xfc   : > { %815 = vmatprep.mubr.f32.mxu0 %v397_v1  ;;  %v434_v1 = vld [vmem:[%s4141_s22 + $0x270] sm:$0xff] }
  0xfd   : > { %1291 = vmatmul.mubr.f32.gmra.mxu1 %v586_v2  ;;  %v437_v2 = vld [vmem:[%s4141_s22 + $0x288] sm:$0xff] }
  0xfe   : > { %1295 = vmatprep.mubr.f32.mxu1 %v589_v3  ;;  %v436_v3 = vld [vmem:[%s4141_s22 + $0x280] sm:$0xff] }
  0xff   : > { %816 = vmatmul.mubr.f32.gmra.mxu0 %v396_v4  ;;  %v439_v4 = vld [vmem:[%s4141_s22 + $0x298] sm:$0xff] }
 0x100   : > { %820 = vmatprep.mubr.f32.mxu0 %v399_v5  ;;  %v438_v5 = vld [vmem:[%s4141_s22 + $0x290] sm:$0xff] }
 0x101   : > { %1296 = vmatmul.mubr.f32.gmra.mxu1 %v588_v6  ;;  %v441_v6 = vld [vmem:[%s4141_s22 + $0x2a8] sm:$0xff] }
 0x102   : > { %1300 = vmatprep.mubr.f32.mxu1 %v591_v7  ;;  %v440_v7 = vld [vmem:[%s4141_s22 + $0x2a0] sm:$0xff] }
 0x103   : > { %821 = vmatmul.mubr.f32.gmra.mxu0 %v398_v8  ;;  %v443_v8 = vld [vmem:[%s4141_s22 + $0x2b8] sm:$0xff] }
 0x104   : > { %825 = vmatprep.mubr.f32.mxu0 %v401_v9  ;;  %v442_v9 = vld [vmem:[%s4141_s22 + $0x2b0] sm:$0xff] }
 0x105   : > { %1301 = vmatmul.mubr.f32.gmra.mxu1 %v590_v10  ;;  %v445_v10 = vld [vmem:[%s4141_s22 + $0x2c8] sm:$0xff] }
 0x106   : > { %1305 = vmatprep.mubr.f32.mxu1 %v593_v11  ;;  %v444_v11 = vld [vmem:[%s4141_s22 + $0x2c0] sm:$0xff] }
 0x107   : > { %826 = vmatmul.mubr.f32.gmra.mxu0 %v400_v12  ;;  %v447_v12 = vld [vmem:[%s4141_s22 + $0x2d8] sm:$0xff] }
 0x108   : > { %830 = vmatprep.mubr.f32.mxu0 %v403_v13  ;;  %v446_v13 = vld [vmem:[%s4141_s22 + $0x2d0] sm:$0xff] }
 0x109   : > { %1306 = vmatmul.mubr.f32.gmra.mxu1 %v592_v14  ;;  %v449_v14 = vld [vmem:[%s4141_s22 + $0x2e8] sm:$0xff] }
 0x10a   : > { %1310 = vmatprep.mubr.f32.mxu1 %v595_v15  ;;  %v448_v15 = vld [vmem:[%s4141_s22 + $0x2e0] sm:$0xff] }
 0x10b   : > { %831 = vmatmul.mubr.f32.gmra.mxu0 %v402_v16  ;;  %v451_v16 = vld [vmem:[%s4141_s22 + $0x2f8] sm:$0xff] }
 0x10c   : > { %835 = vmatprep.mubr.f32.mxu0 %v405_v17  ;;  %v450_v17 = vld [vmem:[%s4141_s22 + $0x2f0] sm:$0xff] }
 0x10d   : > { %1311 = vmatmul.mubr.f32.gmra.mxu1 %v594_v18  ;;  %v453_v18 = vld [vmem:[%s4141_s22 + $0x308] sm:$0xff] }
 0x10e   : > { %1315 = vmatprep.mubr.f32.mxu1 %v597_v19  ;;  %v452_v19 = vld [vmem:[%s4141_s22 + $0x300] sm:$0xff] }
 0x10f   : > { %836 = vmatmul.mubr.f32.gmra.mxu0 %v404_v20  ;;  %v4429_v20 = vld [vmem:[#allocation7] ss:$0 sm:$0xff] }
 0x110   : > { %840 = vmatprep.mubr.f32.mxu0 %v407_v21  ;;  %v455_v21 = vld [vmem:[%s4141_s22 + $0x318] sm:$0xff] }
 0x111   : > { %1316 = vmatmul.mubr.f32.gmra.mxu1 %v596_v22 }
 0x112   : > { %1320 = vmatprep.mubr.f32.mxu1 %v599_v23 }
 0x113   : > { %841 = vmatmul.mubr.f32.gmra.mxu0 %v406_v24  ;;  %v454_v24 = vld [vmem:[%s4141_s22 + $0x310] sm:$0xff] }
 0x114   : > { %845 = vmatprep.mubr.f32.mxu0 %v409_v25 }
 0x115   : > { %1321 = vmatmul.mubr.f32.gmra.mxu1 %v598_v26  ;;  %v457_v26 = vld [vmem:[%s4141_s22 + $0x328] sm:$0xff] }
 0x116   : > { %1325 = vmatprep.mubr.f32.mxu1 %v601_v27 }
 0x117   : > { %846 = vmatmul.mubr.f32.gmra.mxu0 %v408_v28 }
 0x118   : > { %850 = vmatprep.mubr.f32.mxu0 %v411_v29 }
 0x119   : > { %1326 = vmatmul.mubr.f32.gmra.mxu1 %v600_v30 }
 0x11a   : > { %1330 = vmatprep.mubr.f32.mxu1 %v603_v31 }
 0x11b   : > { %851 = vmatmul.mubr.f32.gmra.mxu0 %v410_v32  ;;  %v456_v32 = vld [vmem:[%s4141_s22 + $0x320] sm:$0xff] }
 0x11c   : > { %855 = vmatprep.mubr.f32.mxu0 %v413_v33 }
 0x11d   : > { %1331 = vmatmul.mubr.f32.gmra.mxu1 %v602_v34  ;;  %v459_v34 = vld [vmem:[%s4141_s22 + $0x338] sm:$0xff] }
 0x11e   : > { %1335 = vmatprep.mubr.f32.mxu1 %v605_v35 }
 0x11f   : > { %856 = vmatmul.mubr.f32.gmra.mxu0 %v412_v36 }
 0x120   : > { %860 = vmatprep.mubr.f32.mxu0 %v415_v37 }
 0x121   : > { %1336 = vmatmul.mubr.f32.gmra.mxu1 %v604_v38 }
 0x122   : > { %1340 = vmatprep.mubr.f32.mxu1 %v607_v39 }
 0x123   : > { %861 = vmatmul.mubr.f32.gmra.mxu0 %v414_v40  ;;  %v458_v40 = vld [vmem:[%s4141_s22 + $0x330] sm:$0xff] }
 0x124   : > { %865 = vmatprep.mubr.f32.mxu0 %v417_v41 }
 0x125   : > { %1341 = vmatmul.mubr.f32.gmra.mxu1 %v606_v42  ;;  %v461_v42 = vld [vmem:[%s4141_s22 + $0x348] sm:$0xff] }
 0x126   : > { %1345 = vmatprep.mubr.f32.mxu1 %v609_v43 }
 0x127   : > { %866 = vmatmul.mubr.f32.gmra.mxu0 %v416_v44 }
 0x128   : > { %870 = vmatprep.mubr.f32.mxu0 %v419_v45 }
 0x129   : > { %1346 = vmatmul.mubr.f32.gmra.mxu1 %v608_v46 }
 0x12a   : > { %1350 = vmatprep.mubr.f32.mxu1 %v611_v47 }
 0x12b   : > { %871 = vmatmul.mubr.f32.gmra.mxu0 %v418_v48  ;;  %v460_v48 = vld [vmem:[%s4141_s22 + $0x340] sm:$0xff] }
 0x12c   : > { %875 = vmatprep.mubr.f32.mxu0 %v421_v49 }
 0x12d   : > { %1351 = vmatmul.mubr.f32.gmra.mxu1 %v610_v50  ;;  %v463_v50 = vld [vmem:[%s4141_s22 + $0x358] sm:$0xff] }
 0x12f   : > { %876 = vmatmul.mubr.f32.gmra.mxu0 %v420_v51 }
 0x130   : > { %880 = vmatprep.mubr.f32.mxu0 %v423_v52 }
 0x133   : > { %881 = vmatmul.mubr.f32.gmra.mxu0 %v422_v53 }
 0x134   : > { %885 = vmatprep.mubr.f32.mxu0 %v425_v54 }
 0x137   : > { %886 = vmatmul.mubr.f32.gmra.mxu0 %v424_v55 }
 0x138   : > { %890 = vmatprep.mubr.f32.mxu0 %v427_v56  ;;  %v462_v56 = vld [vmem:[%s4141_s22 + $0x350] sm:$0xff] }
 0x13b   : > { %891 = vmatmul.mubr.f32.gmra.mxu0 %v426_v57 }
 0x13c   : > { %895 = vmatprep.mubr.f32.mxu0 %v429_v58  ;;  %v465_v58 = vld [vmem:[%s4141_s22 + $0x368] sm:$0xff] }
 0x13f   : > { %896 = vmatmul.mubr.f32.gmra.mxu0 %v428_v59 }
 0x140   : > { %900 = vmatprep.mubr.f32.mxu0 %v431_v60 }
 0x143   : > { %901 = vmatmul.mubr.f32.gmra.mxu0 %v430_v61 }
 0x144   : > { %905 = vmatprep.mubr.f32.mxu0 %v433_v62 }
 0x147   : > { %906 = vmatmul.mubr.f32.gmra.mxu0 %v432_v63 }
 0x148   : > { %910 = vmatprep.mubr.f32.mxu0 %v435_v0  ;;  %v464_v0 = vld [vmem:[%s4141_s22 + $0x360] sm:$0xff] }
 0x14b   : > { %911 = vmatmul.mubr.f32.gmra.mxu0 %v434_v1 }
 0x14c   : > { %915 = vmatprep.mubr.f32.mxu0 %v437_v2  ;;  %v467_v2 = vld [vmem:[%s4141_s22 + $0x378] sm:$0xff] }
 0x14f   : > { %916 = vmatmul.mubr.f32.gmra.mxu0 %v436_v3 }
 0x150   : > { %920 = vmatprep.mubr.f32.mxu0 %v439_v4 }
 0x153   : > { %921 = vmatmul.mubr.f32.gmra.mxu0 %v438_v5 }
 0x154   : > { %925 = vmatprep.mubr.f32.mxu0 %v441_v6 }
 0x157   : > { %926 = vmatmul.mubr.f32.gmra.mxu0 %v440_v7 }
 0x158   : > { %930 = vmatprep.mubr.f32.mxu0 %v443_v8  ;;  %v466_v8 = vld [vmem:[%s4141_s22 + $0x370] sm:$0xff] }
 0x15b   : > { %931 = vmatmul.mubr.f32.gmra.mxu0 %v442_v9 }
 0x15c   : > { %935 = vmatprep.mubr.f32.mxu0 %v445_v10  ;;  %v469_v10 = vld [vmem:[%s4141_s22 + $0x388] sm:$0xff] }
 0x15f   : > { %936 = vmatmul.mubr.f32.gmra.mxu0 %v444_v11 }
 0x160   : > { %940 = vmatprep.mubr.f32.mxu0 %v447_v12 }
 0x163   : > { %941 = vmatmul.mubr.f32.gmra.mxu0 %v446_v13 }
 0x164   : > { %945 = vmatprep.mubr.f32.mxu0 %v449_v14 }
 0x167   : > { %946 = vmatmul.mubr.f32.gmra.mxu0 %v448_v15 }
 0x168   : > { %950 = vmatprep.mubr.f32.mxu0 %v451_v16  ;;  %v468_v16 = vld [vmem:[%s4141_s22 + $0x380] sm:$0xff] }
 0x16b   : > { %951 = vmatmul.mubr.f32.gmra.mxu0 %v450_v17 }
 0x16c   : > { %955 = vmatprep.mubr.f32.mxu0 %v453_v18  ;;  %v471_v18 = vld [vmem:[%s4141_s22 + $0x398] sm:$0xff] }
 0x16f   : > { %v717_v22 = vpop.f32.mrf.mxu0  ;;  %956 = vmatmul.mubr.f32.gmra.mxu0 %v452_v19 }
 0x170   : > { %v718_v23 = vadd.f32 %v4429_v20, %v717_v22  ;;  %960 = vmatprep.mubr.f32.mxu0 %v455_v21 }
 0x171   : > { %v719_v25 = vpop.f32.mrf.mxu0  ;;  %v4435_v27 = vpop.f32.mrf.mxu1 }
 0x172   : > { %v1356_v28 = vmax.f32 %v718_v23, 0.0  ;;  %v470_v25 = vld [vmem:[%s4141_s22 + $0x390] sm:$0xff] }
 0x173   : > { %v722_v29 = vpop.f32.mrf.mxu0  ;;  %961 = vmatmul.mubr.f32.gmra.mxu0 %v454_v24  ;;  %v1199_v30 = vpop.f32.mrf.mxu1 }
 0x174   : > { %v723_v31 = vadd.f32 %v4429_v20, %v722_v29  ;;  %3433 = vmatprep.mubr.f32.mxu1 %v1356_v28  ;;  %965 = vmatprep.mubr.f32.mxu0 %v457_v26  ;;  %v473_v28 = vld [vmem:[%s4141_s22 + $0x3a8] sm:$0xff] }
 0x175   : > { %v724_v33 = vpop.f32.mrf.mxu0  ;;  %v4440_v35 = vpop.f32.mrf.mxu1 }
 0x176   : > { %v1357_v36 = vmax.f32 %v723_v31, 0.0 }
 0x177   : > { %v727_v37 = vpop.f32.mrf.mxu0  ;;  %966 = vmatmul.mubr.f32.gmra.mxu0 %v456_v32  ;;  %v1204_v38 = vpop.f32.mrf.mxu1 }
 0x178   : > { %v728_v39 = vadd.f32 %v4429_v20, %v727_v37  ;;  %3434 = vmatmul.mubr.f32.vlgmr.msra.gmra.mxu1 %v1357_v36  ;;  %970 = vmatprep.mubr.f32.mxu0 %v459_v34  ;;  %v472_v34 = vld [vmem:[%s4141_s22 + $0x3a0] sm:$0xff]  ;;  %v475_v37 = vld [vmem:[%s4141_s22 + $0x3b8] sm:$0xff] }
 0x179   : > { %v729_v41 = vpop.f32.mrf.mxu0  ;;  %v4445_v43 = vpop.f32.mrf.mxu1 }
 0x17a   : > { %v1358_v44 = vmax.f32 %v728_v39, 0.0 }
 0x17b   : > { %v732_v45 = vpop.f32.mrf.mxu0  ;;  %971 = vmatmul.mubr.f32.gmra.mxu0 %v458_v40  ;;  %v1209_v46 = vpop.f32.mrf.mxu1 }
 0x17c   : > { %v733_v47 = vadd.f32 %v4429_v20, %v732_v45  ;;  %3436 = vmatprep.mubr.f32.mxu1 %v1358_v44  ;;  %975 = vmatprep.mubr.f32.mxu0 %v461_v42  ;;  %v474_v44 = vld [vmem:[%s4141_s22 + $0x3b0] sm:$0xff]  ;;  %v477_v46 = vld [vmem:[%s4141_s22 + $0x3c8] sm:$0xff] }
 0x17d   : > { %v734_v49 = vpop.f32.mrf.mxu0  ;;  %v4450_v51 = vpop.f32.mrf.mxu1 }
 0x17e   : > { %v1359_v52 = vmax.f32 %v733_v47, 0.0 }
 0x17f   : > { %v737_v53 = vpop.f32.mrf.mxu0  ;;  %976 = vmatmul.mubr.f32.gmra.mxu0 %v460_v48  ;;  %v1214_v54 = vpop.f32.mrf.mxu1 }
 0x180   : > { %v738_v55 = vadd.f32 %v4429_v20, %v737_v53  ;;  %3437 = vmatmul.mubr.f32.gmra.mxu1 %v1359_v52  ;;  %980 = vmatprep.mubr.f32.mxu0 %v463_v50  ;;  %v476_v53 = vld [vmem:[%s4141_s22 + $0x3c0] sm:$0xff] }
 0x181   : > { %v739_v57 = vpop.f32.mrf.mxu0  ;;  %v4455_v59 = vpop.f32.mrf.mxu1 }
 0x182   : > { %v1360_v60 = vmax.f32 %v738_v55, 0.0  ;;  %v479_v55 = vld [vmem:[%s4141_s22 + $0x3d8] sm:$0xff] }
 0x183   : > { %v742_v61 = vpop.f32.mrf.mxu0  ;;  %981 = vmatmul.mubr.f32.gmra.mxu0 %v462_v56  ;;  %v1219_v62 = vpop.f32.mrf.mxu1 }
 0x184   : > { %v743_v63 = vadd.f32 %v4429_v20, %v742_v61  ;;  %3439 = vmatprep.mubr.f32.mxu1 %v1360_v60  ;;  %985 = vmatprep.mubr.f32.mxu0 %v465_v58  ;;  %v478_v62 = vld [vmem:[%s4141_s22 + $0x3d0] sm:$0xff] }
 0x185   : > { %v744_v1 = vpop.f32.mrf.mxu0  ;;  %v4460_v3 = vpop.f32.mrf.mxu1 }
 0x186   : > { %v1361_v4 = vmax.f32 %v743_v63, 0.0 }
 0x187   : > { %v747_v5 = vpop.f32.mrf.mxu0  ;;  %986 = vmatmul.mubr.f32.gmra.mxu0 %v464_v0  ;;  %v1224_v6 = vpop.f32.mrf.mxu1  ;;  %v481_v0 = vld [vmem:[%s4141_s22 + $0x3e8] sm:$0xff] }
 0x188   : > { %v748_v7 = vadd.f32 %v4429_v20, %v747_v5  ;;  %3440 = vmatmul.mubr.f32.gmra.mxu1 %v1361_v4  ;;  %990 = vmatprep.mubr.f32.mxu0 %v467_v2 }
 0x189   : > { %v749_v9 = vpop.f32.mrf.mxu0  ;;  %v4465_v11 = vpop.f32.mrf.mxu1 }
 0x18a   : > { %v1362_v12 = vmax.f32 %v748_v7, 0.0  ;;  %v480_v7 = vld [vmem:[%s4141_s22 + $0x3e0] sm:$0xff]  ;;  %v483_v9 = vld [vmem:[%s4141_s22 + $0x3f8] sm:$0xff] }
 0x18b   : > { %v752_v13 = vpop.f32.mrf.mxu0  ;;  %991 = vmatmul.mubr.f32.gmra.mxu0 %v466_v8  ;;  %v1229_v14 = vpop.f32.mrf.mxu1 }
 0x18c   : > { %v753_v15 = vadd.f32 %v4429_v20, %v752_v13  ;;  %3442 = vmatprep.mubr.f32.mxu1 %v1362_v12  ;;  %995 = vmatprep.mubr.f32.mxu0 %v469_v10 }
 0x18d   : > { %v754_v17 = vpop.f32.mrf.mxu0  ;;  %v4470_v19 = vpop.f32.mrf.mxu1 }
 0x18e   : > { %v1363_v21 = vmax.f32 %v753_v15, 0.0 }
 0x18f   : > { %v757_v22 = vpop.f32.mrf.mxu0  ;;  %996 = vmatmul.mubr.f32.gmra.mxu0 %v468_v16  ;;  %v1234_v23 = vpop.f32.mrf.mxu1  ;;  %v482_v16 = vld [vmem:[%s4141_s22 + $0x3f0] sm:$0xff] }
 0x190   : > { %v758_v24 = vadd.f32 %v4429_v20, %v757_v22  ;;  %3443 = vmatmul.mubr.f32.gmra.mxu1 %v1363_v21  ;;  %1000 = vmatprep.mubr.f32.mxu0 %v471_v18  ;;  %v485_v18 = vld [vmem:[%s4141_s22 + $0x408] sm:$0xff] }
 0x191   : > { %v759_v26 = vpop.f32.mrf.mxu0  ;;  %v4475_v29 = vpop.f32.mrf.mxu1 }
 0x192   : > { %v1364_v30 = vmax.f32 %v758_v24, 0.0  ;;  %v484_v26 = vld [vmem:[%s4141_s22 + $0x400] sm:$0xff] }
 0x193   : > { %v762_v31 = vpop.f32.mrf.mxu0  ;;  %1001 = vmatmul.mubr.f32.gmra.mxu0 %v470_v25  ;;  %v1239_v32 = vpop.f32.mrf.mxu1 }
 0x194   : > { %v763_v33 = vadd.f32 %v4429_v20, %v762_v31  ;;  %3445 = vmatprep.mubr.f32.mxu1 %v1364_v30  ;;  %1005 = vmatprep.mubr.f32.mxu0 %v473_v28  ;;  %v487_v30 = vld [vmem:[%s4141_s22 + $0x418] sm:$0xff] }
 0x195   : > { %v764_v36 = vpop.f32.mrf.mxu0  ;;  %v4480_v38 = vpop.f32.mrf.mxu1 }
 0x196   : > { %v1365_v39 = vmax.f32 %v763_v33, 0.0 }
 0x197   : > { %v767_v40 = vpop.f32.mrf.mxu0  ;;  %1006 = vmatmul.mubr.f32.gmra.mxu0 %v472_v34  ;;  %v1244_v41 = vpop.f32.mrf.mxu1 }
 0x198   : > { %v768_v42 = vadd.f32 %v4429_v20, %v767_v40  ;;  %3446 = vmatmul.mubr.f32.gmra.mxu1 %v1365_v39  ;;  %1010 = vmatprep.mubr.f32.mxu0 %v475_v37  ;;  %v486_v37 = vld [vmem:[%s4141_s22 + $0x410] sm:$0xff]  ;;  %v489_v40 = vld [vmem:[%s4141_s22 + $0x428] sm:$0xff] }
 0x199   : > { %v769_v45 = vpop.f32.mrf.mxu0  ;;  %v4485_v47 = vpop.f32.mrf.mxu1 }
 0x19a   : > { %v1366_v48 = vmax.f32 %v768_v42, 0.0 }
 0x19b   : > { %v772_v49 = vpop.f32.mrf.mxu0  ;;  %1011 = vmatmul.mubr.f32.gmra.mxu0 %v474_v44  ;;  %v1249_v50 = vpop.f32.mrf.mxu1 }
 0x19c   : > { %v773_v52 = vadd.f32 %v4429_v20, %v772_v49  ;;  %3448 = vmatprep.mubr.f32.mxu1 %v1366_v48  ;;  %1015 = vmatprep.mubr.f32.mxu0 %v477_v46  ;;  %v488_v48 = vld [vmem:[%s4141_s22 + $0x420] sm:$0xff]  ;;  %v491_v50 = vld [vmem:[%s4141_s22 + $0x438] sm:$0xff] }
 0x19d   : > { %v774_v54 = vpop.f32.mrf.mxu0  ;;  %v4490_v56 = vpop.f32.mrf.mxu1 }
 0x19e   : > { %v1367_v57 = vmax.f32 %v773_v52, 0.0 }
 0x19f   : > { %v777_v58 = vpop.f32.mrf.mxu0  ;;  %1016 = vmatmul.mubr.f32.gmra.mxu0 %v476_v53  ;;  %v1254_v60 = vpop.f32.mrf.mxu1 }
 0x1a0   : > { %v778_v61 = vadd.f32 %v4429_v20, %v777_v58  ;;  %3449 = vmatmul.mubr.f32.gmra.mxu1 %v1367_v57  ;;  %1020 = vmatprep.mubr.f32.mxu0 %v479_v55  ;;  %v490_v58 = vld [vmem:[%s4141_s22 + $0x430] sm:$0xff] }
 0x1a1   : > { %v779_v63 = vpop.f32.mrf.mxu0  ;;  %v4495_v1 = vpop.f32.mrf.mxu1 }
 0x1a2   : > { %v1368_v2 = vmax.f32 %v778_v61, 0.0  ;;  %v493_v61 = vld [vmem:[%s4141_s22 + $0x448] sm:$0xff] }
 0x1a3   : > { %v782_v4 = vpop.f32.mrf.mxu0  ;;  %1021 = vmatmul.mubr.f32.gmra.mxu0 %v478_v62  ;;  %v1259_v5 = vpop.f32.mrf.mxu1 }
 0x1a4   : > { %v783_v6 = vadd.f32 %v4429_v20, %v782_v4  ;;  %3451 = vmatprep.mubr.f32.mxu1 %v1368_v2  ;;  %1025 = vmatprep.mubr.f32.mxu0 %v481_v0  ;;  %v492_v5 = vld [vmem:[%s4141_s22 + $0x440] sm:$0xff] }
 0x1a5   : > { %v784_v8 = vpop.f32.mrf.mxu0  ;;  %v4500_v10 = vpop.f32.mrf.mxu1 }
 0x1a6   : > { %v1369_v12 = vmax.f32 %v783_v6, 0.0 }
 0x1a7   : > { %v787_v13 = vpop.f32.mrf.mxu0  ;;  %1026 = vmatmul.mubr.f32.gmra.mxu0 %v480_v7  ;;  %v1264_v14 = vpop.f32.mrf.mxu1  ;;  %v495_v7 = vld [vmem:[%s4141_s22 + $0x458] sm:$0xff] }
 0x1a8   : > { %v788_v15 = vadd.f32 %v4429_v20, %v787_v13  ;;  %3452 = vmatmul.mubr.f32.gmra.mxu1 %v1369_v12  ;;  %1030 = vmatprep.mubr.f32.mxu0 %v483_v9 }
 0x1a9   : > { %v789_v17 = vpop.f32.mrf.mxu0  ;;  %v4505_v21 = vpop.f32.mrf.mxu1 }
 0x1aa   : > { %v1370_v22 = vmax.f32 %v788_v15, 0.0  ;;  %v494_v15 = vld [vmem:[%s4141_s22 + $0x450] sm:$0xff]  ;;  %v497_v17 = vld [vmem:[%s4141_s22 + $0x468] sm:$0xff] }
 0x1ab   : > { %v792_v23 = vpop.f32.mrf.mxu0  ;;  %1031 = vmatmul.mubr.f32.gmra.mxu0 %v482_v16  ;;  %v1269_v24 = vpop.f32.mrf.mxu1 }
 0x1ac   : > { %v793_v25 = vadd.f32 %v4429_v20, %v792_v23  ;;  %3454 = vmatprep.mubr.f32.mxu1 %v1370_v22  ;;  %1035 = vmatprep.mubr.f32.mxu0 %v485_v18 }
 0x1ad   : > { %v794_v28 = vpop.f32.mrf.mxu0  ;;  %v4510_v31 = vpop.f32.mrf.mxu1 }
 0x1ae   : > { %v1371_v32 = vmax.f32 %v793_v25, 0.0 }
 0x1af   : > { %v797_v33 = vpop.f32.mrf.mxu0  ;;  %1036 = vmatmul.mubr.f32.gmra.mxu0 %v484_v26  ;;  %v1274_v34 = vpop.f32.mrf.mxu1  ;;  %v496_v26 = vld [vmem:[%s4141_s22 + $0x460] sm:$0xff] }
 0x1b0   : > { %v798_v36 = vadd.f32 %v4429_v20, %v797_v33  ;;  %3455 = vmatmul.mubr.f32.gmra.mxu1 %v1371_v32  ;;  %1040 = vmatprep.mubr.f32.mxu0 %v487_v30  ;;  %v499_v30 = vld [vmem:[%s4141_s22 + $0x478] sm:$0xff] }
 0x1b1   : > { %v799_v39 = vpop.f32.mrf.mxu0  ;;  %v4515_v41 = vpop.f32.mrf.mxu1 }
 0x1b2   : > { %v1372_v42 = vmax.f32 %v798_v36, 0.0  ;;  %v498_v39 = vld [vmem:[%s4141_s22 + $0x470] sm:$0xff] }
 0x1b3   : > { %v802_v44 = vpop.f32.mrf.mxu0  ;;  %1041 = vmatmul.mubr.f32.gmra.mxu0 %v486_v37  ;;  %v1279_v45 = vpop.f32.mrf.mxu1 }
 0x1b4   : > { %v803_v46 = vadd.f32 %v4429_v20, %v802_v44  ;;  %3457 = vmatprep.mubr.f32.mxu1 %v1372_v42  ;;  %1045 = vmatprep.mubr.f32.mxu0 %v489_v40  ;;  %v501_v42 = vld [vmem:[%s4141_s22 + $0x488] sm:$0xff] }
 0x1b5   : > { %v804_v49 = vpop.f32.mrf.mxu0  ;;  %v4520_v52 = vpop.f32.mrf.mxu1 }
 0x1b6   : > { %v1373_v53 = vmax.f32 %v803_v46, 0.0 }
 0x1b7   : > { %v807_v54 = vpop.f32.mrf.mxu0  ;;  %1046 = vmatmul.mubr.f32.gmra.mxu0 %v488_v48  ;;  %v1284_v55 = vpop.f32.mrf.mxu1 }
 0x1b8   : > { %v808_v57 = vadd.f32 %v4429_v20, %v807_v54  ;;  %3458 = vmatmul.mubr.f32.gmra.mxu1 %v1373_v53  ;;  %1050 = vmatprep.mubr.f32.mxu0 %v491_v50  ;;  %v500_v50 = vld [vmem:[%s4141_s22 + $0x480] sm:$0xff]  ;;  %v503_v54 = vld [vmem:[%s4141_s22 + $0x498] sm:$0xff] }
 0x1b9   : > { %v809_v60 = vpop.f32.mrf.mxu0  ;;  %v4525_v62 = vpop.f32.mrf.mxu1 }
 0x1ba   : > { %v1374_v63 = vmax.f32 %v808_v57, 0.0 }
 0x1bb   : > { %v812_v0 = vpop.f32.mrf.mxu0  ;;  %1051 = vmatmul.mubr.f32.gmra.mxu0 %v490_v58  ;;  %v1289_v2 = vpop.f32.mrf.mxu1 }
 0x1bc   : > { %v813_v4 = vadd.f32 %v4429_v20, %v812_v0  ;;  %3460 = vmatprep.mubr.f32.mxu1 %v1374_v63  ;;  %1055 = vmatprep.mubr.f32.mxu0 %v493_v61  ;;  %v502_v63 = vld [vmem:[%s4141_s22 + $0x490] sm:$0xff]  ;;  %v505_v2 = vld [vmem:[%s4141_s22 + $0x4a8] sm:$0xff] }
 0x1bd   : > { %v814_v6 = vpop.f32.mrf.mxu0  ;;  %v4530_v8 = vpop.f32.mrf.mxu1 }
 0x1be   : > { %v1375_v9 = vmax.f32 %v813_v4, 0.0 }
 0x1bf   : > { %v817_v12 = vpop.f32.mrf.mxu0  ;;  %1056 = vmatmul.mubr.f32.gmra.mxu0 %v492_v5  ;;  %v1294_v13 = vpop.f32.mrf.mxu1 }
 0x1c0   : > { %v818_v14 = vadd.f32 %v4429_v20, %v817_v12  ;;  %3461 = vmatmul.mubr.f32.gmra.mxu1 %v1375_v9  ;;  %1060 = vmatprep.mubr.f32.mxu0 %v495_v7  ;;  %v504_v12 = vld [vmem:[%s4141_s22 + $0x4a0] sm:$0xff] }
 0x1c1   : > { %v819_v16 = vpop.f32.mrf.mxu0  ;;  %v4535_v18 = vpop.f32.mrf.mxu1 }
 0x1c2   : > { %v1376_v22 = vmax.f32 %v818_v14, 0.0  ;;  %v507_v14 = vld [vmem:[%s4141_s22 + $0x4b8] sm:$0xff] }
 0x1c3   : > { %v822_v23 = vpop.f32.mrf.mxu0  ;;  %1061 = vmatmul.mubr.f32.gmra.mxu0 %v494_v15  ;;  %v1299_v24 = vpop.f32.mrf.mxu1 }
 0x1c4   : > { %v823_v25 = vadd.f32 %v4429_v20, %v822_v23  ;;  %3463 = vmatprep.mubr.f32.mxu1 %v1376_v22  ;;  %1065 = vmatprep.mubr.f32.mxu0 %v497_v17  ;;  %v506_v24 = vld [vmem:[%s4141_s22 + $0x4b0] sm:$0xff] }
 0x1c5   : > { %v824_v28 = vpop.f32.mrf.mxu0  ;;  %v4540_v32 = vpop.f32.mrf.mxu1 }
 0x1c6   : > { %v1377_v33 = vmax.f32 %v823_v25, 0.0 }
 0x1c7   : > { %v827_v34 = vpop.f32.mrf.mxu0  ;;  %1066 = vmatmul.mubr.f32.gmra.mxu0 %v496_v26  ;;  %v1304_v36 = vpop.f32.mrf.mxu1  ;;  %v509_v26 = vld [vmem:[%s4141_s22 + $0x4c8] sm:$0xff] }
 0x1c8   : > { %v828_v37 = vadd.f32 %v4429_v20, %v827_v34  ;;  %3464 = vmatmul.mubr.f32.gmra.mxu1 %v1377_v33  ;;  %1070 = vmatprep.mubr.f32.mxu0 %v499_v30 }
 0x1c9   : > { %v829_v40 = vpop.f32.mrf.mxu0  ;;  %v4545_v44 = vpop.f32.mrf.mxu1 }
 0x1ca   : > { %v1378_v45 = vmax.f32 %v828_v37, 0.0  ;;  %v508_v37 = vld [vmem:[%s4141_s22 + $0x4c0] sm:$0xff]  ;;  %v511_v40 = vld [vmem:[%s4141_s22 + $0x4d8] sm:$0xff] }
 0x1cb   : > { %v832_v46 = vpop.f32.mrf.mxu0  ;;  %1071 = vmatmul.mubr.f32.gmra.mxu0 %v498_v39  ;;  %v1309_v48 = vpop.f32.mrf.mxu1 }
 0x1cc   : > { %v833_v49 = vadd.f32 %v4429_v20, %v832_v46  ;;  %3466 = vmatprep.mubr.f32.mxu1 %v1378_v45  ;;  %1075 = vmatprep.mubr.f32.mxu0 %v501_v42 }
 0x1cd   : > { %v834_v53 = vpop.f32.mrf.mxu0  ;;  %v4550_v55 = vpop.f32.mrf.mxu1 }
 0x1ce   : > { %v1379_v57 = vmax.f32 %v833_v49, 0.0 }
 0x1cf   : > { %v837_v58 = vpop.f32.mrf.mxu0  ;;  %1076 = vmatmul.mubr.f32.gmra.mxu0 %v500_v50  ;;  %v1314_v60 = vpop.f32.mrf.mxu1  ;;  %v510_v50 = vld [vmem:[%s4141_s22 + $0x4d0] sm:$0xff] }
 0x1d0   : > { %v838_v61 = vadd.f32 %v4429_v20, %v837_v58  ;;  %3467 = vmatmul.mubr.f32.gmra.mxu1 %v1379_v57  ;;  %1080 = vmatprep.mubr.f32.mxu0 %v503_v54  ;;  %v513_v54 = vld [vmem:[%s4141_s22 + $0x4e8] sm:$0xff] }
 0x1d1   : > { %v839_v0 = vpop.f32.mrf.mxu0  ;;  %v4555_v4 = vpop.f32.mrf.mxu1 }
 0x1d2   : > { %v1380_v5 = vmax.f32 %v838_v61, 0.0  ;;  %v512_v0 = vld [vmem:[%s4141_s22 + $0x4e0] sm:$0xff] }
 0x1d3   : > { %v842_v6 = vpop.f32.mrf.mxu0  ;;  %1081 = vmatmul.mubr.f32.gmra.mxu0 %v502_v63  ;;  %v1319_v7 = vpop.f32.mrf.mxu1 }
 0x1d4   : > { %v843_v9 = vadd.f32 %v4429_v20, %v842_v6  ;;  %3469 = vmatprep.mubr.f32.mxu1 %v1380_v5  ;;  %1085 = vmatprep.mubr.f32.mxu0 %v505_v2  ;;  %v515_v5 = vld [vmem:[%s4141_s22 + $0x4f8] sm:$0xff] }
 0x1d5   : > { %v844_v13 = vpop.f32.mrf.mxu0  ;;  %v4560_v15 = vpop.f32.mrf.mxu1 }
 0x1d6   : > { %v1381_v16 = vmax.f32 %v843_v9, 0.0 }
 0x1d7   : > { %v847_v17 = vpop.f32.mrf.mxu0  ;;  %1086 = vmatmul.mubr.f32.gmra.mxu0 %v504_v12  ;;  %v1324_v22 = vpop.f32.mrf.mxu1 }
 0x1d8   : > { %v848_v23 = vadd.f32 %v4429_v20, %v847_v17  ;;  %3470 = vmatmul.mubr.f32.gmra.mxu1 %v1381_v16  ;;  %1090 = vmatprep.mubr.f32.mxu0 %v507_v14  ;;  %v514_v14 = vld [vmem:[%s4141_s22 + $0x4f0] sm:$0xff]  ;;  %v517_v17 = vld [vmem:[%s4141_s22 + $0x508] sm:$0xff] }
 0x1d9   : > { %v849_v25 = vpop.f32.mrf.mxu0  ;;  %v4565_v28 = vpop.f32.mrf.mxu1 }
 0x1da   : > { %v1382_v30 = vmax.f32 %v848_v23, 0.0 }
 0x1db   : > { %v852_v33 = vpop.f32.mrf.mxu0  ;;  %1091 = vmatmul.mubr.f32.gmra.mxu0 %v506_v24  ;;  %v1329_v34 = vpop.f32.mrf.mxu1 }
 0x1dc   : > { %v853_v36 = vadd.f32 %v4429_v20, %v852_v33  ;;  %3472 = vmatprep.mubr.f32.mxu1 %v1382_v30  ;;  %1095 = vmatprep.mubr.f32.mxu0 %v509_v26  ;;  %v516_v30 = vld [vmem:[%s4141_s22 + $0x500] sm:$0xff]  ;;  %v519_v34 = vld [vmem:[%s4141_s22 + $0x518] sm:$0xff] }
 0x1dd   : > { %v854_v39 = vpop.f32.mrf.mxu0  ;;  %v4570_v42 = vpop.f32.mrf.mxu1 }
 0x1de   : > { %v1383_v45 = vmax.f32 %v853_v36, 0.0 }
 0x1df   : > { %v857_v46 = vpop.f32.mrf.mxu0  ;;  %1096 = vmatmul.mubr.f32.gmra.mxu0 %v508_v37  ;;  %v1334_v48 = vpop.f32.mrf.mxu1 }
 0x1e0   : > { %v858_v49 = vadd.f32 %v4429_v20, %v857_v46  ;;  %3473 = vmatmul.mubr.f32.gmra.mxu1 %v1383_v45  ;;  %1100 = vmatprep.mubr.f32.mxu0 %v511_v40  ;;  %v518_v46 = vld [vmem:[%s4141_s22 + $0x510] sm:$0xff] }
 0x1e1   : > { %v859_v53 = vpop.f32.mrf.mxu0  ;;  %v4575_v57 = vpop.f32.mrf.mxu1 }
 0x1e2   : > { %v1384_v58 = vmax.f32 %v858_v49, 0.0  ;;  %v521_v49 = vld [vmem:[%s4141_s22 + $0x528] sm:$0xff] }
 0x1e3   : > { %v862_v60 = vpop.f32.mrf.mxu0  ;;  %1101 = vmatmul.mubr.f32.gmra.mxu0 %v510_v50  ;;  %v1339_v61 = vpop.f32.mrf.mxu1 }
 0x1e4   : > { %v863_v63 = vadd.f32 %v4429_v20, %v862_v60  ;;  %3475 = vmatprep.mubr.f32.mxu1 %v1384_v58  ;;  %1105 = vmatprep.mubr.f32.mxu0 %v513_v54  ;;  %v520_v58 = vld [vmem:[%s4141_s22 + $0x520] sm:$0xff]  ;;  %v523_v61 = vld [vmem:[%s4141_s22 + $0x538] sm:$0xff] }
 0x1e5   : > { %v864_v2 = vpop.f32.mrf.mxu0  ;;  %v4580_v6 = vpop.f32.mrf.mxu1 }
 0x1e6   : > { %v1385_v7 = vmax.f32 %v863_v63, 0.0 }
 0x1e7   : > { %v867_v9 = vpop.f32.mrf.mxu0  ;;  %1106 = vmatmul.mubr.f32.gmra.mxu0 %v512_v0  ;;  %v1344_v12 = vpop.f32.mrf.mxu1 }
 0x1e8   : > { %v868_v13 = vadd.f32 %v4429_v20, %v867_v9  ;;  %3476 = vmatmul.mubr.f32.gmra.mxu1 %v1385_v7  ;;  %1110 = vmatprep.mubr.f32.mxu0 %v515_v5  ;;  %v522_v5 = vld [vmem:[%s4141_s22 + $0x530] sm:$0xff]  ;;  %v525_v9 = vld [vmem:[%s4141_s22 + $0x548] sm:$0xff] }
 0x1e9   : > { %v869_v16 = vpop.f32.mrf.mxu0  ;;  %v4585_v22 = vpop.f32.mrf.mxu1 }
 0x1ea   : > { %v1386_v23 = vmax.f32 %v868_v13, 0.0  ;;  %v524_v16 = vld [vmem:[%s4141_s22 + $0x540] sm:$0xff] }
 0x1eb   : > { %v872_v24 = vpop.f32.mrf.mxu0  ;;  %1111 = vmatmul.mubr.f32.gmra.mxu0 %v514_v14  ;;  %v1349_v25 = vpop.f32.mrf.mxu1 }
 0x1ec   : > { %v873_v26 = vadd.f32 %v4429_v20, %v872_v24  ;;  %3478 = vmatprep.mubr.f32.mxu1 %v1386_v23  ;;  %1115 = vmatprep.mubr.f32.mxu0 %v517_v17  ;;  %v527_v23 = vld [vmem:[%s4141_s22 + $0x558] sm:$0xff] }
 0x1ed   : > { %v874_v33 = vpop.f32.mrf.mxu0  ;;  %v4590_v36 = vpop.f32.mrf.mxu1 }
 0x1ee   : > { %v1387_v37 = vmax.f32 %v873_v26, 0.0 }
 0x1ef   : > { %v877_v39 = vpop.f32.mrf.mxu0  ;;  %1116 = vmatmul.mubr.f32.gmra.mxu0 %v516_v30  ;;  %v1354_v40 = vpop.f32.mrf.mxu1  ;;  %v526_v30 = vld [vmem:[%s4141_s22 + $0x550] sm:$0xff] }
 0x1f0   : > { %v878_v45 = vadd.f32 %v4429_v20, %v877_v39  ;;  %3479 = vmatmul.mubr.f32.gmra.mxu1 %v1387_v37  ;;  %1120 = vmatprep.mubr.f32.mxu0 %v519_v34  ;;  %v529_v34 = vld [vmem:[%s4141_s22 + $0x568] sm:$0xff] }
 0x1f1   : > { %v879_v48 = vpop.f32.mrf.mxu0 }
 0x1f2   : > { %v1388_v50 = vmax.f32 %v878_v45, 0.0  ;;  %v528_v45 = vld [vmem:[%s4141_s22 + $0x560] sm:$0xff]  ;;  %v531_v48 = vld [vmem:[%s4141_s22 + $0x578] sm:$0xff] }
 0x1f3   : > { %v882_v53 = vpop.f32.mrf.mxu0  ;;  %1121 = vmatmul.mubr.f32.gmra.mxu0 %v518_v46 }
 0x1f4   : > { %v883_v54 = vadd.f32 %v4429_v20, %v882_v53  ;;  %3481 = vmatprep.mubr.f32.mxu1 %v1388_v50  ;;  %1125 = vmatprep.mubr.f32.mxu0 %v521_v49 }
 0x1f5   : > { %v884_v60 = vpop.f32.mrf.mxu0 }
 0x1f6   : > { %v1389_v63 = vmax.f32 %v883_v54, 0.0  ;;  %v530_v54 = vld [vmem:[%s4141_s22 + $0x570] sm:$0xff]  ;;  %v533_v60 = vld [vmem:[%s4141_s22 + $0x588] sm:$0xff] }
 0x1f7   : > { %v887_v0 = vpop.f32.mrf.mxu0  ;;  %1126 = vmatmul.mubr.f32.gmra.mxu0 %v520_v58 }
 0x1f8   : > { %v888_v2 = vadd.f32 %v4429_v20, %v887_v0  ;;  %3482 = vmatmul.mubr.f32.gmra.mxu1 %v1389_v63  ;;  %1130 = vmatprep.mubr.f32.mxu0 %v523_v61 }
 0x1f9   : > { %v889_v7 = vpop.f32.mrf.mxu0 }
 0x1fa   : > { %v1390_v12 = vmax.f32 %v888_v2, 0.0  ;;  %v532_v2 = vld [vmem:[%s4141_s22 + $0x580] sm:$0xff]  ;;  %v535_v7 = vld [vmem:[%s4141_s22 + $0x598] sm:$0xff] }
 0x1fb   : > { %v892_v13 = vpop.f32.mrf.mxu0  ;;  %1131 = vmatmul.mubr.f32.gmra.mxu0 %v522_v5 }
 0x1fc   : > { %v893_v14 = vadd.f32 %v4429_v20, %v892_v13  ;;  %3484 = vmatprep.mubr.f32.mxu1 %v1390_v12  ;;  %1135 = vmatprep.mubr.f32.mxu0 %v525_v9 }
 0x1fd   : > { %v894_v17 = vpop.f32.mrf.mxu0 }
 0x1fe   : > { %v1391_v24 = vmax.f32 %v893_v14, 0.0  ;;  %v534_v14 = vld [vmem:[%s4141_s22 + $0x590] sm:$0xff]  ;;  %v537_v17 = vld [vmem:[%s4141_s22 + $0x5a8] sm:$0xff] }
 0x1ff   : > { %v897_v25 = vpop.f32.mrf.mxu0  ;;  %1136 = vmatmul.mubr.f32.gmra.mxu0 %v524_v16 }
 0x200   : > { %v898_v26 = vadd.f32 %v4429_v20, %v897_v25  ;;  %3485 = vmatmul.mubr.f32.gmra.mxu1 %v1391_v24  ;;  %1140 = vmatprep.mubr.f32.mxu0 %v527_v23 }
 0x201   : > { %v899_v33 = vpop.f32.mrf.mxu0 }
 0x202   : > { %v1392_v37 = vmax.f32 %v898_v26, 0.0  ;;  %v536_v26 = vld [vmem:[%s4141_s22 + $0x5a0] sm:$0xff]  ;;  %v539_v33 = vld [vmem:[%s4141_s22 + $0x5b8] sm:$0xff] }
 0x203   : > { %v902_v39 = vpop.f32.mrf.mxu0  ;;  %1141 = vmatmul.mubr.f32.gmra.mxu0 %v526_v30 }
 0x204   : > { %v903_v40 = vadd.f32 %v4429_v20, %v902_v39  ;;  %3487 = vmatprep.mubr.f32.mxu1 %v1392_v37  ;;  %1145 = vmatprep.mubr.f32.mxu0 %v529_v34 }
 0x205   : > { %v904_v46 = vpop.f32.mrf.mxu0 }
 0x206   : > { %v1393_v49 = vmax.f32 %v903_v40, 0.0  ;;  %v538_v40 = vld [vmem:[%s4141_s22 + $0x5b0] sm:$0xff]  ;;  %v541_v46 = vld [vmem:[%s4141_s22 + $0x5c8] sm:$0xff] }
 0x207   : > { %v907_v50 = vpop.f32.mrf.mxu0  ;;  %1146 = vmatmul.mubr.f32.gmra.mxu0 %v528_v45 }
 0x208   : > { %v908_v53 = vadd.f32 %v4429_v20, %v907_v50  ;;  %3488 = vmatmul.mubr.f32.gmra.mxu1 %v1393_v49  ;;  %1150 = vmatprep.mubr.f32.mxu0 %v531_v48 }
 0x209   : > { %v909_v58 = vpop.f32.mrf.mxu0 }
 0x20a   : > { %v1394_v61 = vmax.f32 %v908_v53, 0.0  ;;  %v540_v53 = vld [vmem:[%s4141_s22 + $0x5c0] sm:$0xff]  ;;  %v543_v58 = vld [vmem:[%s4141_s22 + $0x5d8] sm:$0xff] }
 0x20b   : > { %v912_v63 = vpop.f32.mrf.mxu0  ;;  %1151 = vmatmul.mubr.f32.gmra.mxu0 %v530_v54 }
 0x20c   : > { %v913_v0 = vadd.f32 %v4429_v20, %v912_v63  ;;  %3490 = vmatprep.mubr.f32.mxu1 %v1394_v61  ;;  %1155 = vmatprep.mubr.f32.mxu0 %v533_v60 }
 0x20d   : > { %v914_v5 = vpop.f32.mrf.mxu0 }
 0x20e   : > { %v1395_v9 = vmax.f32 %v913_v0, 0.0  ;;  %v542_v0 = vld [vmem:[%s4141_s22 + $0x5d0] sm:$0xff]  ;;  %v545_v5 = vld [vmem:[%s4141_s22 + $0x5e8] sm:$0xff] }
 0x20f   : > { %v917_v12 = vpop.f32.mrf.mxu0  ;;  %1156 = vmatmul.mubr.f32.gmra.mxu0 %v532_v2 }
 0x210   : > { %v918_v13 = vadd.f32 %v4429_v20, %v917_v12  ;;  %3491 = vmatmul.mubr.f32.gmra.mxu1 %v1395_v9  ;;  %1160 = vmatprep.mubr.f32.mxu0 %v535_v7 }
 0x211   : > { %v919_v16 = vpop.f32.mrf.mxu0 }
 0x212   : > { %v1396_v23 = vmax.f32 %v918_v13, 0.0  ;;  %v544_v13 = vld [vmem:[%s4141_s22 + $0x5e0] sm:$0xff]  ;;  %v547_v16 = vld [vmem:[%s4141_s22 + $0x5f8] sm:$0xff] }
 0x213   : > { %v922_v24 = vpop.f32.mrf.mxu0  ;;  %1161 = vmatmul.mubr.f32.gmra.mxu0 %v534_v14 }
 0x214   : > { %v923_v25 = vadd.f32 %v4429_v20, %v922_v24  ;;  %3493 = vmatprep.mubr.f32.mxu1 %v1396_v23  ;;  %1165 = vmatprep.mubr.f32.mxu0 %v537_v17 }
 0x215   : > { %v924_v30 = vpop.f32.mrf.mxu0 }
 0x216   : > { %v1397_v34 = vmax.f32 %v923_v25, 0.0  ;;  %v546_v25 = vld [vmem:[%s4141_s22 + $0x5f0] sm:$0xff]  ;;  %s3247_s22 = sshll.u32 %s3229_s6, 7 }
 0x217   : > { %v927_v37 = vpop.f32.mrf.mxu0  ;;  %1166 = vmatmul.mubr.f32.gmra.mxu0 %v536_v26  ;;  %p351_p7 = scmp.lt.s32.totalorder %s3247_s22, 511 }
 0x218   : > { %v928_v39 = vadd.f32 %v4429_v20, %v927_v37  ;;  %3494 = vmatmul.mubr.f32.gmra.mxu1 %v1397_v34  ;;  %1170 = vmatprep.mubr.f32.mxu0 %v539_v33 }
 0x219   : > { %v929_v45 = vpop.f32.mrf.mxu0  ;;  %s5562_s22 = smov (!%p351_p7, %s3247_s22), 511 }
 0x21a   : > { %v1398_v48 = vmax.f32 %v928_v39, 0.0  ;;  %s3248_s29 = sshll.u32 %s5562_s22, 3 }
 0x21b   : > { %v932_v49 = vpop.f32.mrf.mxu0  ;;  %1171 = vmatmul.mubr.f32.gmra.mxu0 %v538_v40  ;;  %s4798_s21 = scalar_lea.vmem %s5544_s7, %s3248_s29 }
 0x21c   : > { %v933_v50 = vadd.f32 %v4429_v20, %v932_v49  ;;  %3496 = vmatprep.mubr.f32.mxu1 %v1398_v48  ;;  %1175 = vmatprep.mubr.f32.mxu0 %v541_v46 }
 0x21d   : > { %v934_v54 = vpop.f32.mrf.mxu0 }
 0x21e   : > { %v1399_v60 = vmax.f32 %v933_v50, 0.0 }
 0x21f   : > { %v937_v61 = vpop.f32.mrf.mxu0  ;;  %1176 = vmatmul.mubr.f32.gmra.mxu0 %v540_v53 }
 0x220   : > { %v938_v63 = vadd.f32 %v4429_v20, %v937_v61  ;;  %3497 = vmatmul.mubr.f32.gmra.mxu1 %v1399_v60  ;;  %1180 = vmatprep.mubr.f32.mxu0 %v543_v58  ;;  %v4639_v58 = vld [vmem:[#allocation8] ss:$0 sm:$0xff] }
 0x221   : > { %v939_v2 = vpop.f32.mrf.mxu0 }
 0x222   : > { %v1400_v7 = vmax.f32 %v938_v63, 0.0 }
 0x223   : > { %v942_v9 = vpop.f32.mrf.mxu0  ;;  %1181 = vmatmul.mubr.f32.gmra.mxu0 %v542_v0 }
 0x224   : > { %v943_v12 = vadd.f32 %v4429_v20, %v942_v9  ;;  %3499 = vmatprep.mubr.f32.mxu1 %v1400_v7  ;;  %1185 = vmatprep.mubr.f32.mxu0 %v545_v5  ;;  %v4643_v9 = vld [vmem:[#allocation10] ss:$0 sm:$0xff] }
 0x225   : > { %v944_v14 = vpop.f32.mrf.mxu0 }
 0x226   : > { %v1401_v17 = vmax.f32 %v943_v12, 0.0 }
 0x227   : > { %v947_v23 = vpop.f32.mrf.mxu0  ;;  %1186 = vmatmul.mubr.f32.gmra.mxu0 %v544_v13 }
 0x228   : > { %v948_v24 = vadd.f32 %v4429_v20, %v947_v23  ;;  %3500 = vmatmul.mubr.f32.gmra.mxu1 %v1401_v17  ;;  %1190 = vmatprep.mubr.f32.mxu0 %v547_v16  ;;  %v4646_v16 = vld [vmem:[#allocation7] ss:$0 sm:$0xff] }
 0x229   : > { %v949_v26 = vpop.f32.mrf.mxu0 }
 0x22a   : > { %v1402_v30 = vmax.f32 %v948_v24, 0.0 }
 0x22b   : > { %v952_v33 = vpop.f32.mrf.mxu0  ;;  %1191 = vmatmul.mubr.f32.gmra.mxu0 %v546_v25 }
 0x22c   : > { %v953_v34 = vadd.f32 %v4429_v20, %v952_v33  ;;  %3502 = vmatprep.mubr.f32.mxu1 %v1402_v30 }
 0x22d   : > { %v954_v37 = vpop.f32.mrf.mxu0 }
 0x22e   : > { %v1403_v39 = vmax.f32 %v953_v34, 0.0 }
 0x22f   : > { %v957_v40 = vpop.f32.mrf.mxu0 }
 0x230   : > { %v958_v45 = vadd.f32 %v4429_v20, %v957_v40  ;;  %3503 = vmatmul.mubr.f32.gmra.mxu1 %v1403_v39 }
 0x231   : > { %v959_v46 = vpop.f32.mrf.mxu0 }
 0x232   : > { %v1404_v48 = vmax.f32 %v958_v45, 0.0 }
 0x233   : > { %v962_v49 = vpop.f32.mrf.mxu0 }
 0x234   : > { %v963_v50 = vadd.f32 %v4429_v20, %v962_v49  ;;  %3505 = vmatprep.mubr.f32.mxu1 %v1404_v48 }
 0x235   : > { %v964_v53 = vpop.f32.mrf.mxu0 }
 0x236   : > { %v1405_v54 = vmax.f32 %v963_v50, 0.0 }
 0x237   : > { %v967_v60 = vpop.f32.mrf.mxu0 }
 0x238   : > { %v968_v61 = vadd.f32 %v4429_v20, %v967_v60  ;;  %v3435_v63 = vpop.f32.mrf.mxu1  ;;  %3506 = vmatmul.mubr.f32.gmra.mxu1 %v1405_v54 }
 0x239   : > { %v1579_v0 = vadd.f32 %v3435_v63, %v4639_v58  ;;  %v969_v2 = vpop.f32.mrf.mxu0 }
 0x23a   : > { %v1406_v5 = vmax.f32 %v968_v61, 0.0  ;;  %v1573_v7 = vpop.f32.mrf.mxu1 }
 0x23b   : > { %v2213_v12 = vmax.f32 %v1579_v0, 0.0  ;;  %v1574_v13 = vadd.f32 %v4639_v58, %v1573_v7  ;;  %v972_v14 = vpop.f32.mrf.mxu0 }
 0x23c   : > { %v973_v17 = vadd.f32 %v4646_v16, %v972_v14  ;;  %3508 = vmatprep.mubr.f32.mxu1 %v1406_v5 }
 0x23d   : > { %v2212_v20 = vmax.f32 %v1574_v13, 0.0  ;;  %v974_v23 = vpop.f32.mrf.mxu0  ;;  %v2348_v24 = vmul.f32 %v4643_v9, %v2213_v12 }
 0x23e   : > { %v1407_v25 = vmax.f32 %v973_v17, 0.0 }
 0x23f   : > { %v977_v26 = vpop.f32.mrf.mxu0  ;;  %v2479_v30 = vsel %vm2475_vm0, %v2348_v24, 0.0  ;;  %v2347_v33 = vmul.f32 %v4643_v9, %v2212_v20 }
 0x240   : > { %v978_v34 = vadd.f32 %v4646_v16, %v977_v26  ;;  %3509 = vmatmul.mubr.f32.gmra.mxu1 %v1407_v25  ;;  %2480 = vadd.xlane.f32.xlu0 %v2479_v30  ;;  %v3438_v37 = vpop.f32.mrf.mxu1 }
 0x241   : > { %v1589_v39 = vadd.f32 %v3438_v37, %v4639_v58  ;;  %v979_v40 = vpop.f32.mrf.mxu0  ;;  %v2476_v53 = vsel %vm2475_vm0, %v2347_v33, 0.0 }
 0x242   : > { %v1408_v45 = vmax.f32 %v978_v34, 0.0  ;;  %v1583_v46 = vpop.f32.mrf.mxu1 }
 0x243   : > { %v2215_v48 = vmax.f32 %v1589_v39, 0.0  ;;  %v1584_v49 = vadd.f32 %v4639_v58, %v1583_v46  ;;  %v982_v50 = vpop.f32.mrf.mxu0 }
 0x244   : > { %v983_v54 = vadd.f32 %v4646_v16, %v982_v50  ;;  %3511 = vmatprep.mubr.f32.mxu1 %v1408_v45  ;;  %2477 = vadd.xlane.f32.xlu0 %v2476_v53 }
 0x245   : > { %v2214_v60 = vmax.f32 %v1584_v49, 0.0  ;;  %v984_v61 = vpop.f32.mrf.mxu0  ;;  %v2350_v63 = vmul.f32 %v4643_v9, %v2215_v48 }
 0x246   : > { %v1409_v0 = vmax.f32 %v983_v54, 0.0 }
 0x247   : > { %v987_v2 = vpop.f32.mrf.mxu0  ;;  %v2485_v5 = vsel %vm2475_vm0, %v2350_v63, 0.0  ;;  %v2349_v7 = vmul.f32 %v4643_v9, %v2214_v60 }
 0x248   : > { %v988_v12 = vadd.f32 %v4646_v16, %v987_v2  ;;  %3512 = vmatmul.mubr.f32.gmra.mxu1 %v1409_v0  ;;  %2486 = vadd.xlane.f32.xlu1 %v2485_v5  ;;  %v3441_v13 = vpop.f32.mrf.mxu1 }
 0x249   : > { %v1599_v14 = vadd.f32 %v3441_v13, %v4639_v58  ;;  %v989_v17 = vpop.f32.mrf.mxu0  ;;  %v2482_v30 = vsel %vm2475_vm0, %v2349_v7, 0.0 }
 0x24a   : > { %v1410_v20 = vmax.f32 %v988_v12, 0.0  ;;  %v1593_v23 = vpop.f32.mrf.mxu1 }
 0x24b   : > { %v2217_v24 = vmax.f32 %v1599_v14, 0.0  ;;  %v1594_v25 = vadd.f32 %v4639_v58, %v1593_v23  ;;  %v992_v26 = vpop.f32.mrf.mxu0 }
 0x24c   : > { %v993_v33 = vadd.f32 %v4646_v16, %v992_v26  ;;  %3514 = vmatprep.mubr.f32.mxu1 %v1410_v20  ;;  %2483 = vadd.xlane.f32.xlu1 %v2482_v30 }
 0x24d   : > { %v2216_v34 = vmax.f32 %v1594_v25, 0.0  ;;  %v994_v37 = vpop.f32.mrf.mxu0  ;;  %v2352_v39 = vmul.f32 %v4643_v9, %v2217_v24 }
 0x24e   : > { %v1411_v40 = vmax.f32 %v993_v33, 0.0 }
 0x24f   : > { %v997_v45 = vpop.f32.mrf.mxu0  ;;  %v2491_v46 = vsel %vm2475_vm0, %v2352_v39, 0.0  ;;  %v2351_v48 = vmul.f32 %v4643_v9, %v2216_v34 }
 0x250   : > { %v998_v49 = vadd.f32 %v4646_v16, %v997_v45  ;;  %v3444_v50 = vpop.f32.mrf.mxu1  ;;  %3515 = vmatmul.mubr.f32.gmra.mxu1 %v1411_v40  ;;  %2492 = vadd.xlane.f32.xlu1 %v2491_v46 }
 0x251   : > { %v1609_v53 = vadd.f32 %v3444_v50, %v4639_v58  ;;  %v999_v54 = vpop.f32.mrf.mxu0  ;;  %v2488_v60 = vsel %vm2475_vm0, %v2351_v48, 0.0 }
 0x252   : > { %v1412_v61 = vmax.f32 %v998_v49, 0.0  ;;  %v1603_v63 = vpop.f32.mrf.mxu1  ;;  %2489 = vadd.xlane.f32.xlu0 %v2488_v60 }
 0x253   : > { %v2219_v0 = vmax.f32 %v1609_v53, 0.0  ;;  %v1604_v2 = vadd.f32 %v4639_v58, %v1603_v63  ;;  %v1002_v5 = vpop.f32.mrf.mxu0 }
 0x254   : > { %v1003_v7 = vadd.f32 %v4646_v16, %v1002_v5  ;;  %3517 = vmatprep.mubr.f32.mxu1 %v1412_v61 }
 0x255   : > { %v2218_v12 = vmax.f32 %v1604_v2, 0.0  ;;  %v1004_v13 = vpop.f32.mrf.mxu0  ;;  %v2354_v14 = vmul.f32 %v4643_v9, %v2219_v0 }
 0x256   : > { %v1413_v17 = vmax.f32 %v1003_v7, 0.0 }
 0x257   : > { %v1007_v20 = vpop.f32.mrf.mxu0  ;;  %v2497_v23 = vsel %vm2475_vm0, %v2354_v14, 0.0  ;;  %v2353_v24 = vmul.f32 %v4643_v9, %v2218_v12 }
 0x258   : > { %v1008_v25 = vadd.f32 %v4646_v16, %v1007_v20  ;;  %v3447_v26 = vpop.f32.mrf.mxu1  ;;  %3518 = vmatmul.mubr.f32.gmra.mxu1 %v1413_v17  ;;  %2498 = vadd.xlane.f32.xlu1 %v2497_v23 }
 0x259   : > { %v1619_v30 = vadd.f32 %v3447_v26, %v4639_v58  ;;  %v1009_v33 = vpop.f32.mrf.mxu0  ;;  %v2494_v34 = vsel %vm2475_vm0, %v2353_v24, 0.0 }
 0x25a   : > { %v1414_v37 = vmax.f32 %v1008_v25, 0.0  ;;  %v1613_v39 = vpop.f32.mrf.mxu1  ;;  %2495 = vadd.xlane.f32.xlu0 %v2494_v34 }
 0x25b   : > { %v2221_v40 = vmax.f32 %v1619_v30, 0.0  ;;  %v1614_v45 = vadd.f32 %v4639_v58, %v1613_v39  ;;  %v1012_v46 = vpop.f32.mrf.mxu0 }
 0x25c   : > { %v1013_v48 = vadd.f32 %v4646_v16, %v1012_v46  ;;  %3520 = vmatprep.mubr.f32.mxu1 %v1414_v37 }
 0x25d   : > { %v2220_v49 = vmax.f32 %v1614_v45, 0.0  ;;  %v1014_v50 = vpop.f32.mrf.mxu0  ;;  %v2356_v53 = vmul.f32 %v4643_v9, %v2221_v40 }
 0x25e   : > { %v1415_v54 = vmax.f32 %v1013_v48, 0.0 }
 0x25f   : > { %v1017_v60 = vpop.f32.mrf.mxu0  ;;  %v2503_v61 = vsel %vm2475_vm0, %v2356_v53, 0.0  ;;  %v2355_v63 = vmul.f32 %v4643_v9, %v2220_v49 }
 0x260   : > { %v1018_v0 = vadd.f32 %v4646_v16, %v1017_v60  ;;  %v3450_v2 = vpop.f32.mrf.mxu1  ;;  %3521 = vmatmul.mubr.f32.gmra.mxu1 %v1415_v54  ;;  %2504 = vadd.xlane.f32.xlu1 %v2503_v61 }
 0x261   : > { %v1629_v5 = vadd.f32 %v3450_v2, %v4639_v58  ;;  %v1019_v7 = vpop.f32.mrf.mxu0  ;;  %v2500_v12 = vsel %vm2475_vm0, %v2355_v63, 0.0 }
 0x262   : > { %v1416_v13 = vmax.f32 %v1018_v0, 0.0  ;;  %v1623_v14 = vpop.f32.mrf.mxu1  ;;  %2501 = vadd.xlane.f32.xlu0 %v2500_v12 }
 0x263   : > { %v2223_v17 = vmax.f32 %v1629_v5, 0.0  ;;  %v1624_v20 = vadd.f32 %v4639_v58, %v1623_v14  ;;  %v1022_v23 = vpop.f32.mrf.mxu0 }
 0x264   : > { %v1023_v24 = vadd.f32 %v4646_v16, %v1022_v23  ;;  %3523 = vmatprep.mubr.f32.mxu1 %v1416_v13 }
 0x265   : > { %v2222_v25 = vmax.f32 %v1624_v20, 0.0  ;;  %v1024_v26 = vpop.f32.mrf.mxu0  ;;  %v2358_v30 = vmul.f32 %v4643_v9, %v2223_v17 }
 0x266   : > { %v1417_v33 = vmax.f32 %v1023_v24, 0.0 }
 0x267   : > { %v1027_v34 = vpop.f32.mrf.mxu0  ;;  %v2509_v37 = vsel %vm2475_vm0, %v2358_v30, 0.0  ;;  %v2357_v39 = vmul.f32 %v4643_v9, %v2222_v25 }
 0x268   : > { %v1028_v40 = vadd.f32 %v4646_v16, %v1027_v34  ;;  %v3453_v45 = vpop.f32.mrf.mxu1  ;;  %3524 = vmatmul.mubr.f32.gmra.mxu1 %v1417_v33  ;;  %2510 = vadd.xlane.f32.xlu1 %v2509_v37 }
 0x269   : > { %v1639_v46 = vadd.f32 %v3453_v45, %v4639_v58  ;;  %v1029_v48 = vpop.f32.mrf.mxu0  ;;  %v2506_v49 = vsel %vm2475_vm0, %v2357_v39, 0.0 }
 0x26a   : > { %v1418_v50 = vmax.f32 %v1028_v40, 0.0  ;;  %v1633_v53 = vpop.f32.mrf.mxu1  ;;  %2507 = vadd.xlane.f32.xlu0 %v2506_v49 }
 0x26b   : > { %v2225_v54 = vmax.f32 %v1639_v46, 0.0  ;;  %v1634_v60 = vadd.f32 %v4639_v58, %v1633_v53  ;;  %v1032_v61 = vpop.f32.mrf.mxu0 }
 0x26c   : > { %v1033_v63 = vadd.f32 %v4646_v16, %v1032_v61  ;;  %3526 = vmatprep.mubr.f32.mxu1 %v1418_v50 }
 0x26d   : > { %v2224_v0 = vmax.f32 %v1634_v60, 0.0  ;;  %v1034_v2 = vpop.f32.mrf.mxu0  ;;  %v2360_v5 = vmul.f32 %v4643_v9, %v2225_v54 }
 0x26e   : > { %v1419_v7 = vmax.f32 %v1033_v63, 0.0 }
 0x26f   : > { %v1037_v12 = vpop.f32.mrf.mxu0  ;;  %v2515_v13 = vsel %vm2475_vm0, %v2360_v5, 0.0  ;;  %v2359_v14 = vmul.f32 %v4643_v9, %v2224_v0 }
 0x270   : > { %v1038_v17 = vadd.f32 %v4646_v16, %v1037_v12  ;;  %v3456_v20 = vpop.f32.mrf.mxu1  ;;  %3527 = vmatmul.mubr.f32.gmra.mxu1 %v1419_v7  ;;  %2516 = vadd.xlane.f32.xlu1 %v2515_v13 }
 0x271   : > { %v1649_v23 = vadd.f32 %v3456_v20, %v4639_v58  ;;  %v1039_v24 = vpop.f32.mrf.mxu0  ;;  %v2512_v25 = vsel %vm2475_vm0, %v2359_v14, 0.0 }
 0x272   : > { %v1420_v26 = vmax.f32 %v1038_v17, 0.0  ;;  %v1643_v30 = vpop.f32.mrf.mxu1  ;;  %2513 = vadd.xlane.f32.xlu0 %v2512_v25 }
 0x273   : > { %v2227_v33 = vmax.f32 %v1649_v23, 0.0  ;;  %v1644_v34 = vadd.f32 %v4639_v58, %v1643_v30  ;;  %v1042_v37 = vpop.f32.mrf.mxu0 }
 0x274   : > { %v1043_v39 = vadd.f32 %v4646_v16, %v1042_v37  ;;  %3529 = vmatprep.mubr.f32.mxu1 %v1420_v26 }
 0x275   : > { %v2226_v40 = vmax.f32 %v1644_v34, 0.0  ;;  %v1044_v45 = vpop.f32.mrf.mxu0  ;;  %v2362_v46 = vmul.f32 %v4643_v9, %v2227_v33 }
 0x276   : > { %v1421_v48 = vmax.f32 %v1043_v39, 0.0 }
 0x277   : > { %v1047_v49 = vpop.f32.mrf.mxu0  ;;  %v2521_v50 = vsel %vm2475_vm0, %v2362_v46, 0.0  ;;  %v2361_v53 = vmul.f32 %v4643_v9, %v2226_v40 }
 0x278   : > { %v1048_v54 = vadd.f32 %v4646_v16, %v1047_v49  ;;  %v3459_v60 = vpop.f32.mrf.mxu1  ;;  %3530 = vmatmul.mubr.f32.gmra.mxu1 %v1421_v48  ;;  %2522 = vadd.xlane.f32.xlu1 %v2521_v50 }
 0x279   : > { %v1659_v61 = vadd.f32 %v3459_v60, %v4639_v58  ;;  %v1049_v63 = vpop.f32.mrf.mxu0  ;;  %v2518_v0 = vsel %vm2475_vm0, %v2361_v53, 0.0 }
 0x27a   : > { %v1422_v2 = vmax.f32 %v1048_v54, 0.0  ;;  %v1653_v5 = vpop.f32.mrf.mxu1  ;;  %2519 = vadd.xlane.f32.xlu0 %v2518_v0 }
 0x27b   : > { %v2229_v7 = vmax.f32 %v1659_v61, 0.0  ;;  %v1654_v12 = vadd.f32 %v4639_v58, %v1653_v5  ;;  %v1052_v13 = vpop.f32.mrf.mxu0 }
 0x27c   : > { %v1053_v14 = vadd.f32 %v4646_v16, %v1052_v13  ;;  %3532 = vmatprep.mubr.f32.mxu1 %v1422_v2 }
 0x27d   : > { %v2228_v17 = vmax.f32 %v1654_v12, 0.0  ;;  %v1054_v20 = vpop.f32.mrf.mxu0  ;;  %v2364_v23 = vmul.f32 %v4643_v9, %v2229_v7 }
 0x27e   : > { %v1423_v24 = vmax.f32 %v1053_v14, 0.0 }
 0x27f   : > { %v1057_v25 = vpop.f32.mrf.mxu0  ;;  %v2527_v26 = vsel %vm2475_vm0, %v2364_v23, 0.0  ;;  %v2363_v30 = vmul.f32 %v4643_v9, %v2228_v17 }
 0x280   : > { %v1058_v33 = vadd.f32 %v4646_v16, %v1057_v25  ;;  %v3462_v34 = vpop.f32.mrf.mxu1  ;;  %3533 = vmatmul.mubr.f32.gmra.mxu1 %v1423_v24  ;;  %2528 = vadd.xlane.f32.xlu1 %v2527_v26 }
 0x281   : > { %v1669_v37 = vadd.f32 %v3462_v34, %v4639_v58  ;;  %v1059_v39 = vpop.f32.mrf.mxu0  ;;  %v2524_v40 = vsel %vm2475_vm0, %v2363_v30, 0.0 }
 0x282   : > { %v1424_v45 = vmax.f32 %v1058_v33, 0.0  ;;  %v1663_v46 = vpop.f32.mrf.mxu1  ;;  %2525 = vadd.xlane.f32.xlu0 %v2524_v40 }
 0x283   : > { %v2231_v48 = vmax.f32 %v1669_v37, 0.0  ;;  %v1664_v49 = vadd.f32 %v4639_v58, %v1663_v46  ;;  %v1062_v50 = vpop.f32.mrf.mxu0 }
 0x284   : > { %v1063_v53 = vadd.f32 %v4646_v16, %v1062_v50  ;;  %3535 = vmatprep.mubr.f32.mxu1 %v1424_v45 }
 0x285   : > { %v2230_v54 = vmax.f32 %v1664_v49, 0.0  ;;  %v1064_v60 = vpop.f32.mrf.mxu0  ;;  %v2366_v61 = vmul.f32 %v4643_v9, %v2231_v48 }
 0x286   : > { %v1425_v63 = vmax.f32 %v1063_v53, 0.0 }
 0x287   : > { %v1067_v0 = vpop.f32.mrf.mxu0  ;;  %v2533_v2 = vsel %vm2475_vm0, %v2366_v61, 0.0  ;;  %v2365_v5 = vmul.f32 %v4643_v9, %v2230_v54 }
 0x288   : > { %v1068_v7 = vadd.f32 %v4646_v16, %v1067_v0  ;;  %v3465_v12 = vpop.f32.mrf.mxu1  ;;  %3536 = vmatmul.mubr.f32.gmra.mxu1 %v1425_v63  ;;  %2534 = vadd.xlane.f32.xlu1 %v2533_v2 }
 0x289   : > { %v1679_v13 = vadd.f32 %v3465_v12, %v4639_v58  ;;  %v1069_v14 = vpop.f32.mrf.mxu0  ;;  %v2530_v17 = vsel %vm2475_vm0, %v2365_v5, 0.0 }
 0x28a   : > { %v1426_v20 = vmax.f32 %v1068_v7, 0.0  ;;  %v1673_v23 = vpop.f32.mrf.mxu1  ;;  %2531 = vadd.xlane.f32.xlu0 %v2530_v17 }
 0x28b   : > { %v2233_v24 = vmax.f32 %v1679_v13, 0.0  ;;  %v1674_v25 = vadd.f32 %v4639_v58, %v1673_v23  ;;  %v1072_v26 = vpop.f32.mrf.mxu0 }
 0x28c   : > { %v1073_v30 = vadd.f32 %v4646_v16, %v1072_v26  ;;  %3538 = vmatprep.mubr.f32.mxu1 %v1426_v20 }
 0x28d   : > { %v2232_v33 = vmax.f32 %v1674_v25, 0.0  ;;  %v1074_v34 = vpop.f32.mrf.mxu0  ;;  %v2368_v37 = vmul.f32 %v4643_v9, %v2233_v24 }
 0x28e   : > { %v1427_v39 = vmax.f32 %v1073_v30, 0.0 }
 0x28f   : > { %v1077_v40 = vpop.f32.mrf.mxu0  ;;  %v2539_v45 = vsel %vm2475_vm0, %v2368_v37, 0.0  ;;  %v2367_v46 = vmul.f32 %v4643_v9, %v2232_v33 }
 0x290   : > { %v1078_v48 = vadd.f32 %v4646_v16, %v1077_v40  ;;  %v3468_v49 = vpop.f32.mrf.mxu1  ;;  %3539 = vmatmul.mubr.f32.gmra.mxu1 %v1427_v39  ;;  %2540 = vadd.xlane.f32.xlu1 %v2539_v45 }
 0x291   : > { %v1689_v50 = vadd.f32 %v3468_v49, %v4639_v58  ;;  %v1079_v53 = vpop.f32.mrf.mxu0  ;;  %v2536_v54 = vsel %vm2475_vm0, %v2367_v46, 0.0 }
 0x292   : > { %v1428_v60 = vmax.f32 %v1078_v48, 0.0  ;;  %v1683_v61 = vpop.f32.mrf.mxu1  ;;  %2537 = vadd.xlane.f32.xlu0 %v2536_v54 }
 0x293   : > { %v2235_v63 = vmax.f32 %v1689_v50, 0.0  ;;  %v1684_v0 = vadd.f32 %v4639_v58, %v1683_v61  ;;  %v1082_v2 = vpop.f32.mrf.mxu0 }
 0x294   : > { %v1083_v5 = vadd.f32 %v4646_v16, %v1082_v2  ;;  %3541 = vmatprep.mubr.f32.mxu1 %v1428_v60 }
 0x295   : > { %v2234_v7 = vmax.f32 %v1684_v0, 0.0  ;;  %v1084_v12 = vpop.f32.mrf.mxu0  ;;  %v2370_v13 = vmul.f32 %v4643_v9, %v2235_v63 }
 0x296   : > { %v1429_v14 = vmax.f32 %v1083_v5, 0.0 }
 0x297   : > { %v1087_v17 = vpop.f32.mrf.mxu0  ;;  %v2545_v20 = vsel %vm2475_vm0, %v2370_v13, 0.0  ;;  %v2369_v23 = vmul.f32 %v4643_v9, %v2234_v7 }
 0x298   : > { %v1088_v24 = vadd.f32 %v4646_v16, %v1087_v17  ;;  %v3471_v25 = vpop.f32.mrf.mxu1  ;;  %3542 = vmatmul.mubr.f32.gmra.mxu1 %v1429_v14  ;;  %2546 = vadd.xlane.f32.xlu1 %v2545_v20 }
 0x299   : > { %v1699_v26 = vadd.f32 %v3471_v25, %v4639_v58  ;;  %v1089_v30 = vpop.f32.mrf.mxu0  ;;  %v2542_v33 = vsel %vm2475_vm0, %v2369_v23, 0.0 }
 0x29a   : > { %v1430_v34 = vmax.f32 %v1088_v24, 0.0  ;;  %v1693_v37 = vpop.f32.mrf.mxu1  ;;  %2543 = vadd.xlane.f32.xlu0 %v2542_v33 }
 0x29b   : > { %v2237_v39 = vmax.f32 %v1699_v26, 0.0  ;;  %v1694_v40 = vadd.f32 %v4639_v58, %v1693_v37  ;;  %v1092_v45 = vpop.f32.mrf.mxu0 }
 0x29c   : > { %v1093_v46 = vadd.f32 %v4646_v16, %v1092_v45  ;;  %3544 = vmatprep.mubr.f32.mxu1 %v1430_v34 }
 0x29d   : > { %v2236_v48 = vmax.f32 %v1694_v40, 0.0  ;;  %v1094_v49 = vpop.f32.mrf.mxu0  ;;  %v2372_v50 = vmul.f32 %v4643_v9, %v2237_v39 }
 0x29e   : > { %v1431_v53 = vmax.f32 %v1093_v46, 0.0 }
 0x29f   : > { %v1097_v54 = vpop.f32.mrf.mxu0  ;;  %v2551_v60 = vsel %vm2475_vm0, %v2372_v50, 0.0  ;;  %v2371_v61 = vmul.f32 %v4643_v9, %v2236_v48 }
 0x2a0   : > { %v1098_v63 = vadd.f32 %v4646_v16, %v1097_v54  ;;  %v3474_v0 = vpop.f32.mrf.mxu1  ;;  %3545 = vmatmul.mubr.f32.gmra.mxu1 %v1431_v53  ;;  %2552 = vadd.xlane.f32.xlu1 %v2551_v60 }
 0x2a1   : > { %v1709_v2 = vadd.f32 %v3474_v0, %v4639_v58  ;;  %v1099_v5 = vpop.f32.mrf.mxu0  ;;  %v2548_v7 = vsel %vm2475_vm0, %v2371_v61, 0.0 }
 0x2a2   : > { %v1432_v12 = vmax.f32 %v1098_v63, 0.0  ;;  %v1703_v13 = vpop.f32.mrf.mxu1  ;;  %2549 = vadd.xlane.f32.xlu0 %v2548_v7 }
 0x2a3   : > { %v2239_v14 = vmax.f32 %v1709_v2, 0.0  ;;  %v1704_v17 = vadd.f32 %v4639_v58, %v1703_v13  ;;  %v1102_v20 = vpop.f32.mrf.mxu0 }
 0x2a4   : > { %v1103_v23 = vadd.f32 %v4646_v16, %v1102_v20  ;;  %3547 = vmatprep.mubr.f32.mxu1 %v1432_v12 }
 0x2a5   : > { %v2238_v24 = vmax.f32 %v1704_v17, 0.0  ;;  %v1104_v25 = vpop.f32.mrf.mxu0  ;;  %v2374_v26 = vmul.f32 %v4643_v9, %v2239_v14 }
 0x2a6   : > { %v1433_v30 = vmax.f32 %v1103_v23, 0.0 }
 0x2a7   : > { %v1107_v33 = vpop.f32.mrf.mxu0  ;;  %v2557_v34 = vsel %vm2475_vm0, %v2374_v26, 0.0  ;;  %v2373_v37 = vmul.f32 %v4643_v9, %v2238_v24 }
 0x2a8   : > { %v1108_v39 = vadd.f32 %v4646_v16, %v1107_v33  ;;  %v3477_v40 = vpop.f32.mrf.mxu1  ;;  %3548 = vmatmul.mubr.f32.gmra.mxu1 %v1433_v30  ;;  %2558 = vadd.xlane.f32.xlu1 %v2557_v34 }
 0x2a9   : > { %v1719_v45 = vadd.f32 %v3477_v40, %v4639_v58  ;;  %v1109_v46 = vpop.f32.mrf.mxu0  ;;  %v2554_v48 = vsel %vm2475_vm0, %v2373_v37, 0.0 }
 0x2aa   : > { %v1434_v49 = vmax.f32 %v1108_v39, 0.0  ;;  %v1713_v50 = vpop.f32.mrf.mxu1  ;;  %2555 = vadd.xlane.f32.xlu0 %v2554_v48 }
 0x2ab   : > { %v2241_v53 = vmax.f32 %v1719_v45, 0.0  ;;  %v1714_v54 = vadd.f32 %v4639_v58, %v1713_v50  ;;  %v1112_v60 = vpop.f32.mrf.mxu0 }
 0x2ac   : > { %v1113_v61 = vadd.f32 %v4646_v16, %v1112_v60  ;;  %3550 = vmatprep.mubr.f32.mxu1 %v1434_v49 }
 0x2ad   : > { %v2240_v63 = vmax.f32 %v1714_v54, 0.0  ;;  %v1114_v0 = vpop.f32.mrf.mxu0  ;;  %v2376_v2 = vmul.f32 %v4643_v9, %v2241_v53 }
 0x2ae   : > { %v1435_v5 = vmax.f32 %v1113_v61, 0.0 }
 0x2af   : > { %v1117_v7 = vpop.f32.mrf.mxu0  ;;  %v2563_v12 = vsel %vm2475_vm0, %v2376_v2, 0.0  ;;  %v2375_v13 = vmul.f32 %v4643_v9, %v2240_v63 }
 0x2b0   : > { %v1118_v14 = vadd.f32 %v4646_v16, %v1117_v7  ;;  %v3480_v17 = vpop.f32.mrf.mxu1  ;;  %3551 = vmatmul.mubr.f32.gmra.mxu1 %v1435_v5  ;;  %2564 = vadd.xlane.f32.xlu1 %v2563_v12 }
 0x2b1   : > { %v1729_v20 = vadd.f32 %v3480_v17, %v4639_v58  ;;  %v1119_v23 = vpop.f32.mrf.mxu0  ;;  %v2560_v24 = vsel %vm2475_vm0, %v2375_v13, 0.0 }
 0x2b2   : > { %v1436_v25 = vmax.f32 %v1118_v14, 0.0  ;;  %v1723_v26 = vpop.f32.mrf.mxu1  ;;  %2561 = vadd.xlane.f32.xlu0 %v2560_v24 }
 0x2b3   : > { %v2243_v30 = vmax.f32 %v1729_v20, 0.0  ;;  %v1724_v33 = vadd.f32 %v4639_v58, %v1723_v26  ;;  %v1122_v34 = vpop.f32.mrf.mxu0 }
 0x2b4   : > { %v1123_v37 = vadd.f32 %v4646_v16, %v1122_v34  ;;  %3553 = vmatprep.mubr.f32.mxu1 %v1436_v25 }
 0x2b5   : > { %v2242_v39 = vmax.f32 %v1724_v33, 0.0  ;;  %v1124_v40 = vpop.f32.mrf.mxu0  ;;  %v2378_v45 = vmul.f32 %v4643_v9, %v2243_v30 }
 0x2b6   : > { %v1437_v46 = vmax.f32 %v1123_v37, 0.0 }
 0x2b7   : > { %v1127_v48 = vpop.f32.mrf.mxu0  ;;  %v2569_v49 = vsel %vm2475_vm0, %v2378_v45, 0.0  ;;  %v2377_v50 = vmul.f32 %v4643_v9, %v2242_v39 }
 0x2b8   : > { %v1128_v53 = vadd.f32 %v4646_v16, %v1127_v48  ;;  %v3483_v54 = vpop.f32.mrf.mxu1  ;;  %3554 = vmatmul.mubr.f32.gmra.mxu1 %v1437_v46  ;;  %2570 = vadd.xlane.f32.xlu1 %v2569_v49 }
 0x2b9   : > { %v1739_v60 = vadd.f32 %v3483_v54, %v4639_v58  ;;  %v1129_v61 = vpop.f32.mrf.mxu0  ;;  %v2566_v63 = vsel %vm2475_vm0, %v2377_v50, 0.0 }
 0x2ba   : > { %v1438_v0 = vmax.f32 %v1128_v53, 0.0  ;;  %v1733_v2 = vpop.f32.mrf.mxu1  ;;  %2567 = vadd.xlane.f32.xlu0 %v2566_v63 }
 0x2bb   : > { %v2245_v5 = vmax.f32 %v1739_v60, 0.0  ;;  %v1734_v7 = vadd.f32 %v4639_v58, %v1733_v2  ;;  %v1132_v12 = vpop.f32.mrf.mxu0  ;;  %v4790_v2 = vld [vmem:[#allocation2] ss:$0 sm:$0xff] }
 0x2bc   : > { %v1133_v13 = vadd.f32 %v4646_v16, %v1132_v12  ;;  %3556 = vmatprep.mubr.f32.mxu1 %v1438_v0 }
 0x2bd   : > { %v2244_v14 = vmax.f32 %v1734_v7, 0.0  ;;  %v1134_v17 = vpop.f32.mrf.mxu0  ;;  %v2380_v20 = vmul.f32 %v4643_v9, %v2245_v5 }
 0x2be   : > { %v1439_v23 = vmax.f32 %v1133_v13, 0.0 }
 0x2bf   : > { %v1137_v24 = vpop.f32.mrf.mxu0  ;;  %v2575_v25 = vsel %vm2475_vm0, %v2380_v20, 0.0  ;;  %v2379_v26 = vmul.f32 %v4643_v9, %v2244_v14 }
 0x2c0   : > { %v1138_v30 = vadd.f32 %v4646_v16, %v1137_v24  ;;  %v3486_v33 = vpop.f32.mrf.mxu1  ;;  %3557 = vmatmul.mubr.f32.gmra.mxu1 %v1439_v23  ;;  %2576 = vadd.xlane.f32.xlu1 %v2575_v25 }
 0x2c1   : > { %v1749_v34 = vadd.f32 %v3486_v33, %v4639_v58  ;;  %v1139_v37 = vpop.f32.mrf.mxu0  ;;  %v2572_v39 = vsel %vm2475_vm0, %v2379_v26, 0.0 }
 0x2c2   : > { %v1440_v40 = vmax.f32 %v1138_v30, 0.0  ;;  %v1743_v45 = vpop.f32.mrf.mxu1  ;;  %2573 = vadd.xlane.f32.xlu0 %v2572_v39 }
 0x2c3   : > { %v2247_v46 = vmax.f32 %v1749_v34, 0.0  ;;  %v1744_v48 = vadd.f32 %v4639_v58, %v1743_v45  ;;  %v1142_v49 = vpop.f32.mrf.mxu0 }
 0x2c4   : > { %v1143_v50 = vadd.f32 %v4646_v16, %v1142_v49  ;;  %3559 = vmatprep.mubr.f32.mxu1 %v1440_v40 }
 0x2c5   : > { %v2246_v53 = vmax.f32 %v1744_v48, 0.0  ;;  %v1144_v54 = vpop.f32.mrf.mxu0  ;;  %v2382_v60 = vmul.f32 %v4643_v9, %v2247_v46 }
 0x2c6   : > { %v1441_v61 = vmax.f32 %v1143_v50, 0.0 }
 0x2c7   : > { %v1147_v63 = vpop.f32.mrf.mxu0  ;;  %v2581_v0 = vsel %vm2475_vm0, %v2382_v60, 0.0  ;;  %v2381_v5 = vmul.f32 %v4643_v9, %v2246_v53 }
 0x2c8   : > { %v1148_v7 = vadd.f32 %v4646_v16, %v1147_v63  ;;  %v3489_v12 = vpop.f32.mrf.mxu1  ;;  %3560 = vmatmul.mubr.f32.gmra.mxu1 %v1441_v61  ;;  %2582 = vadd.xlane.f32.xlu1 %v2581_v0 }
 0x2c9   : > { %v1759_v13 = vadd.f32 %v3489_v12, %v4639_v58  ;;  %v1149_v14 = vpop.f32.mrf.mxu0  ;;  %v2481_v17 = vpop.xlane.xlu0 %2480  ;;  %v2578_v20 = vsel %vm2475_vm0, %v2381_v5, 0.0 }
 0x2ca   : > { %v1442_v23 = vmax.f32 %v1148_v7, 0.0  ;;  %v2868_v24 = vadd.f32 %v4790_v2, %v2481_v17  ;;  %v1753_v25 = vpop.f32.mrf.mxu1  ;;  %2579 = vadd.xlane.f32.xlu0 %v2578_v20 }
 0x2cb   : > { %v2249_v26 = vmax.f32 %v1759_v13, 0.0  ;;  %v1754_v30 = vadd.f32 %v4639_v58, %v1753_v25  ;;  %v1152_v33 = vpop.f32.mrf.mxu0 }
 0x2cc   : > { %2997 = vst.msk [vmem:[%s4798_s21 + $0x8] sm:$0xff] %vm2995_vm1, %v2868_v24  ;;  %v1153_v34 = vadd.f32 %v4646_v16, %v1152_v33  ;;  %3562 = vmatprep.mubr.f32.mxu1 %v1442_v23 }
 0x2cd   : > { %v2248_v37 = vmax.f32 %v1754_v30, 0.0  ;;  %v1154_v39 = vpop.f32.mrf.mxu0  ;;  %v2478_v40 = vpop.xlane.xlu0 %2477  ;;  %v2384_v45 = vmul.f32 %v4643_v9, %v2249_v26 }
 0x2ce   : > { %v1443_v46 = vmax.f32 %v1153_v34, 0.0  ;;  %v2867_v48 = vadd.f32 %v4790_v2, %v2478_v40 }
 0x2cf   : > { %v1157_v49 = vpop.f32.mrf.mxu0  ;;  %v2587_v50 = vsel %vm2475_vm0, %v2384_v45, 0.0  ;;  %v2383_v53 = vmul.f32 %v4643_v9, %v2248_v37 }
 0x2d0   : > { %2996 = vst.msk [vmem:[%s4798_s21] sm:$0xff] %vm2995_vm1, %v2867_v48  ;;  %v1158_v54 = vadd.f32 %v4646_v16, %v1157_v49  ;;  %v3492_v60 = vpop.f32.mrf.mxu1  ;;  %3563 = vmatmul.mubr.f32.gmra.mxu1 %v1443_v46  ;;  %2588 = vadd.xlane.f32.xlu1 %v2587_v50 }
 0x2d1   : > { %v1769_v61 = vadd.f32 %v3492_v60, %v4639_v58  ;;  %v1159_v63 = vpop.f32.mrf.mxu0  ;;  %v2487_v0 = vpop.xlane.xlu1 %2486  ;;  %v2584_v5 = vsel %vm2475_vm0, %v2383_v53, 0.0 }
 0x2d2   : > { %v1444_v7 = vmax.f32 %v1158_v54, 0.0  ;;  %v2870_v12 = vadd.f32 %v4790_v2, %v2487_v0  ;;  %v1763_v13 = vpop.f32.mrf.mxu1  ;;  %2585 = vadd.xlane.f32.xlu0 %v2584_v5 }
 0x2d3   : > { %v2251_v14 = vmax.f32 %v1769_v61, 0.0  ;;  %v1764_v17 = vadd.f32 %v4639_v58, %v1763_v13  ;;  %v1162_v20 = vpop.f32.mrf.mxu0 }
 0x2d4   : > { %2999 = vst.msk [vmem:[%s4798_s21 + $0x18] sm:$0xff] %vm2995_vm1, %v2870_v12  ;;  %v1163_v23 = vadd.f32 %v4646_v16, %v1162_v20  ;;  %3565 = vmatprep.mubr.f32.mxu1 %v1444_v7 }
 0x2d5   : > { %v2250_v24 = vmax.f32 %v1764_v17, 0.0  ;;  %v1164_v25 = vpop.f32.mrf.mxu0  ;;  %v2484_v26 = vpop.xlane.xlu1 %2483  ;;  %v2386_v30 = vmul.f32 %v4643_v9, %v2251_v14 }
 0x2d6   : > { %v1445_v33 = vmax.f32 %v1163_v23, 0.0  ;;  %v2869_v34 = vadd.f32 %v4790_v2, %v2484_v26 }
 0x2d7   : > { %v1167_v37 = vpop.f32.mrf.mxu0  ;;  %v2593_v39 = vsel %vm2475_vm0, %v2386_v30, 0.0  ;;  %v2385_v40 = vmul.f32 %v4643_v9, %v2250_v24 }
 0x2d8   : > { %2998 = vst.msk [vmem:[%s4798_s21 + $0x10] sm:$0xff] %vm2995_vm1, %v2869_v34  ;;  %v1168_v45 = vadd.f32 %v4646_v16, %v1167_v37  ;;  %v3495_v46 = vpop.f32.mrf.mxu1  ;;  %3566 = vmatmul.mubr.f32.gmra.mxu1 %v1445_v33  ;;  %2594 = vadd.xlane.f32.xlu1 %v2593_v39 }
 0x2d9   : > { %v1779_v48 = vadd.f32 %v3495_v46, %v4639_v58  ;;  %v1169_v49 = vpop.f32.mrf.mxu0  ;;  %v2493_v50 = vpop.xlane.xlu1 %2492  ;;  %v2590_v53 = vsel %vm2475_vm0, %v2385_v40, 0.0 }
 0x2da   : > { %v1446_v54 = vmax.f32 %v1168_v45, 0.0  ;;  %v2872_v60 = vadd.f32 %v4790_v2, %v2493_v50  ;;  %v1773_v61 = vpop.f32.mrf.mxu1  ;;  %2591 = vadd.xlane.f32.xlu0 %v2590_v53 }
 0x2db   : > { %v2253_v63 = vmax.f32 %v1779_v48, 0.0  ;;  %v1774_v0 = vadd.f32 %v4639_v58, %v1773_v61  ;;  %v1172_v5 = vpop.f32.mrf.mxu0  ;;  %v2490_v7 = vpop.xlane.xlu0 %2489 }
 0x2dc   : > { %3001 = vst.msk [vmem:[%s4798_s21 + $0x28] sm:$0xff] %vm2995_vm1, %v2872_v60  ;;  %v1173_v12 = vadd.f32 %v4646_v16, %v1172_v5  ;;  %v2871_v13 = vadd.f32 %v4790_v2, %v2490_v7  ;;  %3568 = vmatprep.mubr.f32.mxu1 %v1446_v54 }
 0x2dd   : > { %v2252_v14 = vmax.f32 %v1774_v0, 0.0  ;;  %v1174_v17 = vpop.f32.mrf.mxu0  ;;  %v2388_v20 = vmul.f32 %v4643_v9, %v2253_v63 }
 0x2de   : > { %v1447_v23 = vmax.f32 %v1173_v12, 0.0  ;;  %3000 = vst.msk [vmem:[%s4798_s21 + $0x20] sm:$0xff] %vm2995_vm1, %v2871_v13 }
 0x2df   : > { %v1177_v24 = vpop.f32.mrf.mxu0  ;;  %v2599_v25 = vsel %vm2475_vm0, %v2388_v20, 0.0  ;;  %v2387_v26 = vmul.f32 %v4643_v9, %v2252_v14  ;;  %v4855_v20 = vld [vmem:[#allocation8] ss:$0 sm:$0xff] }
 0x2e0   : > { %v1178_v30 = vadd.f32 %v4646_v16, %v1177_v24  ;;  %v3498_v33 = vpop.f32.mrf.mxu1  ;;  %3569 = vmatmul.mubr.f32.gmra.mxu1 %v1447_v23  ;;  %2600 = vadd.xlane.f32.xlu1 %v2599_v25 }
 0x2e1   : > { %v1789_v34 = vadd.f32 %v3498_v33, %v4639_v58  ;;  %v1179_v37 = vpop.f32.mrf.mxu0  ;;  %v2499_v39 = vpop.xlane.xlu1 %2498  ;;  %v2596_v40 = vsel %vm2475_vm0, %v2387_v26, 0.0 }
 0x2e2   : > { %v1448_v45 = vmax.f32 %v1178_v30, 0.0  ;;  %v2874_v46 = vadd.f32 %v4790_v2, %v2499_v39  ;;  %v1783_v48 = vpop.f32.mrf.mxu1  ;;  %2597 = vadd.xlane.f32.xlu0 %v2596_v40 }
 0x2e3   : > { %v2255_v49 = vmax.f32 %v1789_v34, 0.0  ;;  %v1784_v50 = vadd.f32 %v4639_v58, %v1783_v48  ;;  %v1182_v53 = vpop.f32.mrf.mxu0  ;;  %v2496_v54 = vpop.xlane.xlu0 %2495 }
 0x2e4   : > { %3003 = vst.msk [vmem:[%s4798_s21 + $0x38] sm:$0xff] %vm2995_vm1, %v2874_v46  ;;  %v1183_v60 = vadd.f32 %v4646_v16, %v1182_v53  ;;  %v2873_v61 = vadd.f32 %v4790_v2, %v2496_v54  ;;  %3571 = vmatprep.mubr.f32.mxu1 %v1448_v45  ;;  %v4869_v53 = vld [vmem:[#allocation10] ss:$0 sm:$0xff] }
 0x2e5   : > { %v2254_v63 = vmax.f32 %v1784_v50, 0.0  ;;  %v1184_v0 = vpop.f32.mrf.mxu0  ;;  %v2390_v5 = vmul.f32 %v4643_v9, %v2255_v49 }
 0x2e6   : > { %v1449_v7 = vmax.f32 %v1183_v60, 0.0  ;;  %3002 = vst.msk [vmem:[%s4798_s21 + $0x30] sm:$0xff] %vm2995_vm1, %v2873_v61 }
 0x2e7   : > { %v1187_v12 = vpop.f32.mrf.mxu0  ;;  %v2605_v13 = vsel %vm2475_vm0, %v2390_v5, 0.0  ;;  %v2389_v58 = vmul.f32 %v4643_v9, %v2254_v63  ;;  %v4860_v9 = vld [vmem:[#allocation7] ss:$0 sm:$0xff] }
 0x2e8   : > { %v1188_v14 = vadd.f32 %v4646_v16, %v1187_v12  ;;  %v3501_v17 = vpop.f32.mrf.mxu1  ;;  %3572 = vmatmul.mubr.f32.gmra.mxu1 %v1449_v7  ;;  %2606 = vadd.xlane.f32.xlu1 %v2605_v13  ;;  %v1198_v16 = vadd.f32 %v4860_v9, %v4435_v27  ;;  %v1203_v27 = vadd.f32 %v4860_v9, %v4440_v35 }
 0x2e9   : > { %v1799_v23 = vadd.f32 %v4855_v20, %v3501_v17  ;;  %v1189_v24 = vpop.f32.mrf.mxu0  ;;  %v2505_v25 = vpop.xlane.xlu1 %2504  ;;  %v2602_v26 = vsel %vm2475_vm0, %v2389_v58, 0.0  ;;  %v1208_v63 = vadd.f32 %v4860_v9, %v4445_v43 }
 0x2ea   : > { %v1450_v30 = vmax.f32 %v1188_v14, 0.0  ;;  %v2876_v33 = vadd.f32 %v4790_v2, %v2505_v25  ;;  %v1793_v34 = vpop.f32.mrf.mxu1  ;;  %2603 = vadd.xlane.f32.xlu0 %v2602_v26  ;;  %v1452_v61 = vmax.f32 %v1198_v16, 0.0  ;;  %v1453_v58 = vmax.f32 %v1203_v27, 0.0 }
 0x2eb   : > { %v2257_v37 = vmax.f32 %v1799_v23, 0.0  ;;  %v1794_v39 = vadd.f32 %v4855_v20, %v1793_v34  ;;  %v1192_v40 = vpop.f32.mrf.mxu0  ;;  %v2502_v45 = vpop.xlane.xlu0 %2501  ;;  %v1213_v14 = vadd.f32 %v4860_v9, %v4450_v51  ;;  %v1454_v23 = vmax.f32 %v1208_v63, 0.0 }
 0x2ec   : > { %3005 = vst.msk [vmem:[%s4798_s21 + $0x48] sm:$0xff] %vm2995_vm1, %v2876_v33  ;;  %v1193_v46 = vadd.f32 %v4860_v9, %v1192_v40  ;;  %v2875_v48 = vadd.f32 %v4790_v2, %v2502_v45  ;;  %3574 = vmatprep.mubr.f32.mxu1 %v1450_v30  ;;  %v1218_v24 = vadd.f32 %v4860_v9, %v4455_v59 }
 0x2ed   : > { %v2256_v49 = vmax.f32 %v1794_v39, 0.0  ;;  %v1194_v50 = vpop.f32.mrf.mxu0  ;;  %v2392_v54 = vmul.f32 %v4869_v53, %v2257_v37  ;;  %v1455_v16 = vmax.f32 %v1213_v14, 0.0  ;;  %v1223_v37 = vadd.f32 %v4860_v9, %v4460_v3 }
 0x2ee   : > { %v1451_v60 = vmax.f32 %v1193_v46, 0.0  ;;  %3004 = vst.msk [vmem:[%s4798_s21 + $0x40] sm:$0xff] %vm2995_vm1, %v2875_v48  ;;  %v1456_v59 = vmax.f32 %v1218_v24, 0.0  ;;  %v1228_v39 = vadd.f32 %v4860_v9, %v4465_v11 }
 0x2ef   : > { %v2611_v0 = vsel %vm2475_vm0, %v2392_v54, 0.0  ;;  %v2391_v5 = vmul.f32 %v4869_v53, %v2256_v49  ;;  %v1457_v50 = vmax.f32 %v1223_v37, 0.0  ;;  %v1233_v54 = vadd.f32 %v4860_v9, %v4470_v19 }
 0x2f0   : > { %v3504_v7 = vpop.f32.mrf.mxu1  ;;  %3575 = vmatmul.mubr.f32.gmra.mxu1 %v1451_v60  ;;  %2612 = vadd.xlane.f32.xlu1 %v2611_v0  ;;  %v1458_v60 = vmax.f32 %v1228_v39, 0.0 }
 0x2f1   : > { %v1809_v12 = vadd.f32 %v4855_v20, %v3504_v7  ;;  %3577 = vmatprep.mubr.f32.mxu1 %v1452_v61  ;;  %v2511_v13 = vpop.xlane.xlu1 %2510  ;;  %v2608_v35 = vsel %vm2475_vm0, %v2391_v5, 0.0  ;;  %v1238_v61 = vadd.f32 %v4860_v9, %v4475_v29 }
 0x2f2   : > { %v2878_v43 = vadd.f32 %v4790_v2, %v2511_v13  ;;  %v1803_v17 = vpop.f32.mrf.mxu1  ;;  %2609 = vadd.xlane.f32.xlu0 %v2608_v35  ;;  %v1459_v13 = vmax.f32 %v1233_v54, 0.0  ;;  %v1243_v35 = vadd.f32 %v4860_v9, %v4480_v38 }
 0x2f3   : > { %v2259_v25 = vmax.f32 %v1809_v12, 0.0  ;;  %v1804_v26 = vadd.f32 %v4855_v20, %v1803_v17  ;;  %v2508_v30 = vpop.xlane.xlu0 %2507  ;;  %v1460_v29 = vmax.f32 %v1238_v61, 0.0 }
 0x2f4   : > { %3007 = vst.msk [vmem:[%s4798_s21 + $0x58] sm:$0xff] %vm2995_vm1, %v2878_v43  ;;  %v2877_v33 = vadd.f32 %v4790_v2, %v2508_v30  ;;  %3578 = vmatmul.mubr.f32.gmra.mxu1 %v1453_v58  ;;  %v1248_v58 = vadd.f32 %v4860_v9, %v4485_v47 }
 0x2f5   : > { %v2258_v34 = vmax.f32 %v1804_v26, 0.0  ;;  %3580 = vmatprep.mubr.f32.mxu1 %v1454_v23  ;;  %v2394_v51 = vmul.f32 %v4869_v53, %v2259_v25  ;;  %v1461_v25 = vmax.f32 %v1243_v35, 0.0  ;;  %v1253_v26 = vadd.f32 %v4860_v9, %v4490_v56 }
 0x2f6   : > { %3006 = vst.msk [vmem:[%s4798_s21 + $0x50] sm:$0xff] %vm2995_vm1, %v2877_v33  ;;  %v1462_v33 = vmax.f32 %v1248_v58, 0.0  ;;  %v1283_v35 = vadd.f32 %v4860_v9, %v4520_v52 }
 0x2f7   : > { %v2617_v40 = vsel %vm2475_vm0, %v2394_v51, 0.0  ;;  %v2393_v45 = vmul.f32 %v4869_v53, %v2258_v34  ;;  %v1258_v34 = vadd.f32 %v4860_v9, %v4495_v1 }
 0x2f8   : > { %v3507_v46 = vpop.f32.mrf.mxu1  ;;  %3581 = vmatmul.mubr.f32.gmra.mxu1 %v1455_v16  ;;  %2618 = vadd.xlane.f32.xlu1 %v2617_v40  ;;  %v1463_v40 = vmax.f32 %v1253_v26, 0.0 }
 0x2f9   : > { %v1819_v48 = vadd.f32 %v4855_v20, %v3507_v46  ;;  %3583 = vmatprep.mubr.f32.mxu1 %v1456_v59  ;;  %v2517_v49 = vpop.xlane.xlu1 %2516  ;;  %v2614_v3 = vsel %vm2475_vm0, %v2393_v45, 0.0  ;;  %v1263_v45 = vadd.f32 %v4860_v9, %v4500_v10  ;;  %v1464_v1 = vmax.f32 %v1258_v34, 0.0 }
 0x2fa   : > { %v2880_v11 = vadd.f32 %v4790_v2, %v2517_v49  ;;  %v1813_v27 = vpop.f32.mrf.mxu1  ;;  %2615 = vadd.xlane.f32.xlu0 %v2614_v3  ;;  %v1268_v46 = vadd.f32 %v4860_v9, %v4505_v21 }
 0x2fb   : > { %v2261_v63 = vmax.f32 %v1819_v48, 0.0  ;;  %v1814_v0 = vadd.f32 %v4855_v20, %v1813_v27  ;;  %v2514_v5 = vpop.xlane.xlu0 %2513  ;;  %v1273_v27 = vadd.f32 %v4860_v9, %v4510_v31 }
 0x2fc   : > { %3009 = vst.msk [vmem:[%s4798_s21 + $0x68] sm:$0xff] %vm2995_vm1, %v2880_v11  ;;  %v2879_v7 = vadd.f32 %v4790_v2, %v2514_v5  ;;  %3584 = vmatmul.mubr.f32.gmra.mxu1 %v1457_v50  ;;  %v1465_v11 = vmax.f32 %v1263_v45, 0.0  ;;  %v1466_v61 = vmax.f32 %v1268_v46, 0.0 }
 0x2fd   : > { %v2260_v12 = vmax.f32 %v1814_v0, 0.0  ;;  %3586 = vmatprep.mubr.f32.mxu1 %v1458_v60  ;;  %v2396_v19 = vmul.f32 %v4869_v53, %v2261_v63  ;;  %v1278_v63 = vadd.f32 %v4860_v9, %v4515_v41 }
 0x2fe   : > { %3008 = vst.msk [vmem:[%s4798_s21 + $0x60] sm:$0xff] %vm2995_vm1, %v2879_v7 }
 0x2ff   : > { %v2623_v14 = vsel %vm2475_vm0, %v2396_v19, 0.0  ;;  %v2395_v43 = vmul.f32 %v4869_v53, %v2260_v12  ;;  %v1468_v41 = vmax.f32 %v1278_v63, 0.0  ;;  %v1323_v63 = vadd.f32 %v4860_v9, %v4560_v15 }
 0x300   : > { %v3510_v17 = vpop.f32.mrf.mxu1  ;;  %3587 = vmatmul.mubr.f32.gmra.mxu1 %v1459_v13  ;;  %2624 = vadd.xlane.f32.xlu1 %v2623_v14  ;;  %v1467_v13 = vmax.f32 %v1273_v27, 0.0 }
 0x301   : > { %v1829_v23 = vadd.f32 %v4855_v20, %v3510_v17  ;;  %3589 = vmatprep.mubr.f32.mxu1 %v1460_v29  ;;  %v2523_v24 = vpop.xlane.xlu1 %2522  ;;  %v2620_v38 = vsel %vm2475_vm0, %v2395_v43, 0.0  ;;  %v1288_v29 = vadd.f32 %v4860_v9, %v4525_v62 }
 0x302   : > { %v2882_v47 = vadd.f32 %v4790_v2, %v2523_v24  ;;  %v1823_v30 = vpop.f32.mrf.mxu1  ;;  %2621 = vadd.xlane.f32.xlu0 %v2620_v38  ;;  %v1469_v24 = vmax.f32 %v1283_v35, 0.0  ;;  %v1293_v38 = vadd.f32 %v4860_v9, %v4530_v8  ;;  %v1333_v35 = vadd.f32 %v4860_v9, %v4570_v42 }
 0x303   : > { %v2263_v51 = vmax.f32 %v1829_v23, 0.0  ;;  %v1824_v16 = vadd.f32 %v4855_v20, %v1823_v30  ;;  %v2520_v37 = vpop.xlane.xlu0 %2519  ;;  %v1470_v26 = vmax.f32 %v1288_v29, 0.0 }
 0x304   : > { %3011 = vst.msk [vmem:[%s4798_s21 + $0x78] sm:$0xff] %vm2995_vm1, %v2882_v47  ;;  %v2881_v59 = vadd.f32 %v4790_v2, %v2520_v37  ;;  %3590 = vmatmul.mubr.f32.gmra.mxu1 %v1461_v25  ;;  %v1298_v47 = vadd.f32 %v4860_v9, %v4535_v18  ;;  %v1471_v37 = vmax.f32 %v1293_v38, 0.0  ;;  %v1343_v38 = vadd.f32 %v4860_v9, %v4580_v6 }
 0x305   : > { %v2262_v39 = vmax.f32 %v1824_v16, 0.0  ;;  %3592 = vmatprep.mubr.f32.mxu1 %v1462_v33  ;;  %v2398_v56 = vmul.f32 %v4869_v53, %v2263_v51 }
 0x306   : > { %3010 = vst.msk [vmem:[%s4798_s21 + $0x70] sm:$0xff] %vm2995_vm1, %v2881_v59  ;;  %v1303_v59 = vadd.f32 %v4860_v9, %v4540_v32  ;;  %v1472_v18 = vmax.f32 %v1298_v47, 0.0 }
 0x307   : > { %v2629_v48 = vsel %vm2475_vm0, %v2398_v56, 0.0  ;;  %v2397_v49 = vmul.f32 %v4869_v53, %v2262_v39  ;;  %v1308_v39 = vadd.f32 %v4860_v9, %v4545_v44 }
 0x308   : > { %v3513_v3 = vpop.f32.mrf.mxu1  ;;  %3593 = vmatmul.mubr.f32.gmra.mxu1 %v1463_v40  ;;  %2630 = vadd.xlane.f32.xlu1 %v2629_v48  ;;  %v1473_v48 = vmax.f32 %v1303_v59, 0.0 }
 0x309   : > { %v1839_v50 = vadd.f32 %v4855_v20, %v3513_v3  ;;  %3595 = vmatprep.mubr.f32.mxu1 %v1464_v1  ;;  %v2529_v54 = vpop.xlane.xlu1 %2528  ;;  %v2626_v10 = vsel %vm2475_vm0, %v2397_v49, 0.0  ;;  %v1313_v49 = vadd.f32 %v4860_v9, %v4550_v55 }
 0x30a   : > { %v2884_v21 = vadd.f32 %v4790_v2, %v2529_v54  ;;  %v1833_v60 = vpop.f32.mrf.mxu1  ;;  %2627 = vadd.xlane.f32.xlu0 %v2626_v10  ;;  %v1318_v54 = vadd.f32 %v4860_v9, %v4555_v4 }
 0x30b   : > { %v2265_v0 = vmax.f32 %v1839_v50, 0.0  ;;  %v1834_v5 = vadd.f32 %v4855_v20, %v1833_v60  ;;  %v2526_v7 = vpop.xlane.xlu0 %2525  ;;  %v1474_v50 = vmax.f32 %v1308_v39, 0.0 }
 0x30c   : > { %3013 = vst.msk [vmem:[%s4798_s21 + $0x88] sm:$0xff] %vm2995_vm1, %v2884_v21  ;;  %v2883_v12 = vadd.f32 %v4790_v2, %v2526_v7  ;;  %3596 = vmatmul.mubr.f32.gmra.mxu1 %v1465_v11  ;;  %v1476_v4 = vmax.f32 %v1318_v54, 0.0 }
 0x30d   : > { %v2264_v19 = vmax.f32 %v1834_v5, 0.0  ;;  %3598 = vmatprep.mubr.f32.mxu1 %v1466_v61  ;;  %v2400_v31 = vmul.f32 %v4869_v53, %v2265_v0  ;;  %v1475_v61 = vmax.f32 %v1313_v49, 0.0  ;;  %v1328_v0 = vadd.f32 %v4860_v9, %v4565_v28 }
 0x30e   : > { %3012 = vst.msk [vmem:[%s4798_s21 + $0x80] sm:$0xff] %vm2995_vm1, %v2883_v12 }
 0x30f   : > { %v2635_v58 = vsel %vm2475_vm0, %v2400_v31, 0.0  ;;  %v2399_v14 = vmul.f32 %v4869_v53, %v2264_v19  ;;  %v1478_v29 = vmax.f32 %v1328_v0, 0.0 }
 0x310   : > { %v3516_v43 = vpop.f32.mrf.mxu1  ;;  %3599 = vmatmul.mubr.f32.gmra.mxu1 %v1467_v13  ;;  %2636 = vadd.xlane.f32.xlu1 %v2635_v58  ;;  %v1477_v13 = vmax.f32 %v1323_v63, 0.0  ;;  %v1338_v58 = vadd.f32 %v4860_v9, %v4575_v57 }
 0x311   : > { %v1849_v17 = vadd.f32 %v4855_v20, %v3516_v43  ;;  %3601 = vmatprep.mubr.f32.mxu1 %v1468_v41  ;;  %v2535_v23 = vpop.xlane.xlu1 %2534  ;;  %v2632_v52 = vsel %vm2475_vm0, %v2399_v14, 0.0 }
 0x312   : > { %v2886_v62 = vadd.f32 %v4790_v2, %v2535_v23  ;;  %v1843_v25 = vpop.f32.mrf.mxu1  ;;  %2633 = vadd.xlane.f32.xlu0 %v2632_v52  ;;  %v1480_v57 = vmax.f32 %v1338_v58, 0.0 }
 0x313   : > { %v2267_v30 = vmax.f32 %v1849_v17, 0.0  ;;  %v1844_v33 = vadd.f32 %v4855_v20, %v1843_v25  ;;  %v2532_v34 = vpop.xlane.xlu0 %2531 }
 0x314   : > { %3015 = vst.msk [vmem:[%s4798_s21 + $0x98] sm:$0xff] %vm2995_vm1, %v2886_v62  ;;  %v2885_v51 = vadd.f32 %v4790_v2, %v2532_v34  ;;  %3602 = vmatmul.mubr.f32.gmra.mxu1 %v1469_v24  ;;  %v1479_v24 = vmax.f32 %v1333_v35, 0.0  ;;  %v1348_v62 = vadd.f32 %v4860_v9, %v4585_v22  ;;  %v1481_v34 = vmax.f32 %v1343_v38, 0.0 }
 0x315   : > { %v2266_v16 = vmax.f32 %v1844_v33, 0.0  ;;  %3604 = vmatprep.mubr.f32.mxu1 %v1470_v26  ;;  %v2402_v8 = vmul.f32 %v4869_v53, %v2267_v30 }
 0x316   : > { %3014 = vst.msk [vmem:[%s4798_s21 + $0x90] sm:$0xff] %vm2995_vm1, %v2885_v51  ;;  %v1353_v51 = vadd.f32 %v4860_v9, %v4590_v36 }
 0x317   : > { %v2641_v56 = vsel %vm2475_vm0, %v2402_v8, 0.0  ;;  %v2401_v40 = vmul.f32 %v4869_v53, %v2266_v16  ;;  %v1482_v8 = vmax.f32 %v1348_v62, 0.0 }
 0x318   : > { %v3519_v45 = vpop.f32.mrf.mxu1  ;;  %3605 = vmatmul.mubr.f32.gmra.mxu1 %v1471_v37  ;;  %2642 = vadd.xlane.f32.xlu1 %v2641_v56 }
 0x319   : > { %v1859_v1 = vadd.f32 %v4855_v20, %v3519_v45  ;;  %3607 = vmatprep.mubr.f32.mxu1 %v1472_v18  ;;  %v2541_v46 = vpop.xlane.xlu1 %2540  ;;  %v2638_v32 = vsel %vm2475_vm0, %v2401_v40, 0.0  ;;  %v1483_v45 = vmax.f32 %v1353_v51, 0.0 }
 0x31a   : > { %v2888_v44 = vadd.f32 %v4790_v2, %v2541_v46  ;;  %v1853_v3 = vpop.f32.mrf.mxu1  ;;  %2639 = vadd.xlane.f32.xlu0 %v2638_v32 }
 0x31b   : > { %v2269_v10 = vmax.f32 %v1859_v1, 0.0  ;;  %v1854_v11 = vadd.f32 %v4855_v20, %v1853_v3  ;;  %v2538_v27 = vpop.xlane.xlu0 %2537 }
 0x31c   : > { %3017 = vst.msk [vmem:[%s4798_s21 + $0xa8] sm:$0xff] %vm2995_vm1, %v2888_v44  ;;  %v2887_v21 = vadd.f32 %v4790_v2, %v2538_v27  ;;  %3608 = vmatmul.mubr.f32.gmra.mxu1 %v1473_v48 }
 0x31d   : > { %v2268_v60 = vmax.f32 %v1854_v11, 0.0  ;;  %3610 = vmatprep.mubr.f32.mxu1 %v1474_v50  ;;  %v2404_v55 = vmul.f32 %v4869_v53, %v2269_v10 }
 0x31e   : > { %3016 = vst.msk [vmem:[%s4798_s21 + $0xa0] sm:$0xff] %vm2995_vm1, %v2887_v21 }
 0x31f   : > { %v2647_v5 = vsel %vm2475_vm0, %v2404_v55, 0.0  ;;  %v2403_v7 = vmul.f32 %v4869_v53, %v2268_v60 }
 0x320   : > { %v3522_v12 = vpop.f32.mrf.mxu1  ;;  %3611 = vmatmul.mubr.f32.gmra.mxu1 %v1475_v61  ;;  %2648 = vadd.xlane.f32.xlu1 %v2647_v5 }
 0x321   : > { %v1869_v19 = vadd.f32 %v4855_v20, %v3522_v12  ;;  %3613 = vmatprep.mubr.f32.mxu1 %v1476_v4  ;;  %v2547_v31 = vpop.xlane.xlu1 %2546  ;;  %v2644_v15 = vsel %vm2475_vm0, %v2403_v7, 0.0 }
 0x322   : > { %v2890_v28 = vadd.f32 %v4790_v2, %v2547_v31  ;;  %v1863_v41 = vpop.f32.mrf.mxu1  ;;  %2645 = vadd.xlane.f32.xlu0 %v2644_v15 }
 0x323   : > { %v2271_v14 = vmax.f32 %v1869_v19, 0.0  ;;  %v1864_v43 = vadd.f32 %v4855_v20, %v1863_v41  ;;  %v2544_v17 = vpop.xlane.xlu0 %2543 }
 0x324   : > { %3019 = vst.msk [vmem:[%s4798_s21 + $0xb8] sm:$0xff] %vm2995_vm1, %v2890_v28  ;;  %v2889_v23 = vadd.f32 %v4790_v2, %v2544_v17  ;;  %3614 = vmatmul.mubr.f32.gmra.mxu1 %v1477_v13 }
 0x325   : > { %v2270_v52 = vmax.f32 %v1864_v43, 0.0  ;;  %3616 = vmatprep.mubr.f32.mxu1 %v1478_v29  ;;  %v2406_v42 = vmul.f32 %v4869_v53, %v2271_v14 }
 0x326   : > { %3018 = vst.msk [vmem:[%s4798_s21 + $0xb0] sm:$0xff] %vm2995_vm1, %v2889_v23 }
 0x327   : > { %v2653_v25 = vsel %vm2475_vm0, %v2406_v42, 0.0  ;;  %v2405_v26 = vmul.f32 %v4869_v53, %v2270_v52 }
 0x328   : > { %v3525_v47 = vpop.f32.mrf.mxu1  ;;  %3617 = vmatmul.mubr.f32.gmra.mxu1 %v1479_v24  ;;  %2654 = vadd.xlane.f32.xlu1 %v2653_v25 }
 0x329   : > { %v1879_v30 = vadd.f32 %v4855_v20, %v3525_v47  ;;  %3619 = vmatprep.mubr.f32.mxu1 %v1480_v57  ;;  %v2553_v33 = vpop.xlane.xlu1 %2552  ;;  %v2650_v6 = vsel %vm2475_vm0, %v2405_v26, 0.0 }
 0x32a   : > { %v2892_v22 = vadd.f32 %v4790_v2, %v2553_v33  ;;  %v1873_v16 = vpop.f32.mrf.mxu1  ;;  %2651 = vadd.xlane.f32.xlu0 %v2650_v6 }
 0x32b   : > { %v2273_v37 = vmax.f32 %v1879_v30, 0.0  ;;  %v1874_v59 = vadd.f32 %v4855_v20, %v1873_v16  ;;  %v2550_v18 = vpop.xlane.xlu0 %2549 }
 0x32c   : > { %3021 = vst.msk [vmem:[%s4798_s21 + $0xc8] sm:$0xff] %vm2995_vm1, %v2892_v22  ;;  %v2891_v39 = vadd.f32 %v4790_v2, %v2550_v18  ;;  %3620 = vmatmul.mubr.f32.gmra.mxu1 %v1481_v34 }
 0x32d   : > { %v2272_v56 = vmax.f32 %v1874_v59, 0.0  ;;  %3622 = vmatprep.mubr.f32.mxu1 %v1482_v8  ;;  %v2408_v40 = vmul.f32 %v4869_v53, %v2273_v37 }
 0x32e   : > { %3020 = vst.msk [vmem:[%s4798_s21 + $0xc0] sm:$0xff] %vm2995_vm1, %v2891_v39 }
 0x32f   : > { %v2659_v36 = vsel %vm2475_vm0, %v2408_v40, 0.0  ;;  %v2407_v9 = vmul.f32 %v4869_v53, %v2272_v56 }
 0x330   : > { %v3528_v1 = vpop.f32.mrf.mxu1  ;;  %3623 = vmatmul.mubr.f32.gmra.mxu1 %v1483_v45  ;;  %2660 = vadd.xlane.f32.xlu1 %v2659_v36 }
 0x331   : > { %v1889_v46 = vadd.f32 %v4855_v20, %v3528_v1  ;;  %v2559_v32 = vpop.xlane.xlu1 %2558  ;;  %v2656_v48 = vsel %vm2475_vm0, %v2407_v9, 0.0 }
 0x332   : > { %v2894_v49 = vadd.f32 %v4790_v2, %v2559_v32  ;;  %v1883_v44 = vpop.f32.mrf.mxu1  ;;  %2657 = vadd.xlane.f32.xlu0 %v2656_v48 }
 0x333   : > { %v2275_v3 = vmax.f32 %v1889_v46, 0.0  ;;  %v1884_v50 = vadd.f32 %v4855_v20, %v1883_v44  ;;  %v2556_v54 = vpop.xlane.xlu0 %2555 }
 0x334   : > { %3023 = vst.msk [vmem:[%s4798_s21 + $0xd8] sm:$0xff] %vm2995_vm1, %v2894_v49  ;;  %v2893_v10 = vadd.f32 %v4790_v2, %v2556_v54 }
 0x335   : > { %v2274_v11 = vmax.f32 %v1884_v50, 0.0  ;;  %v2410_v27 = vmul.f32 %v4869_v53, %v2275_v3 }
 0x336   : > { %3022 = vst.msk [vmem:[%s4798_s21 + $0xd0] sm:$0xff] %vm2995_vm1, %v2893_v10 }
 0x337   : > { %v2665_v21 = vsel %vm2475_vm0, %v2410_v27, 0.0  ;;  %v2409_v60 = vmul.f32 %v4869_v53, %v2274_v11 }
 0x338   : > { %v3531_v55 = vpop.f32.mrf.mxu1  ;;  %2666 = vadd.xlane.f32.xlu1 %v2665_v21 }
 0x339   : > { %v1899_v61 = vadd.f32 %v4855_v20, %v3531_v55  ;;  %v2565_v63 = vpop.xlane.xlu1 %2564  ;;  %v2662_v4 = vsel %vm2475_vm0, %v2409_v60, 0.0 }
 0x33a   : > { %v2896_v0 = vadd.f32 %v4790_v2, %v2565_v63  ;;  %v1893_v5 = vpop.f32.mrf.mxu1  ;;  %2663 = vadd.xlane.f32.xlu0 %v2662_v4 }
 0x33b   : > { %v2277_v7 = vmax.f32 %v1899_v61, 0.0  ;;  %v1894_v12 = vadd.f32 %v4855_v20, %v1893_v5  ;;  %v2562_v19 = vpop.xlane.xlu0 %2561 }
 0x33c   : > { %3025 = vst.msk [vmem:[%s4798_s21 + $0xe8] sm:$0xff] %vm2995_vm1, %v2896_v0  ;;  %v2895_v31 = vadd.f32 %v4790_v2, %v2562_v19 }
 0x33d   : > { %v2276_v15 = vmax.f32 %v1894_v12, 0.0  ;;  %v2412_v13 = vmul.f32 %v4869_v53, %v2277_v7 }
 0x33e   : > { %3024 = vst.msk [vmem:[%s4798_s21 + $0xe0] sm:$0xff] %vm2995_vm1, %v2895_v31 }
 0x33f   : > { %v2671_v35 = vsel %vm2475_vm0, %v2412_v13, 0.0  ;;  %v2411_v28 = vmul.f32 %v4869_v53, %v2276_v15 }
 0x340   : > { %v3534_v41 = vpop.f32.mrf.mxu1  ;;  %2672 = vadd.xlane.f32.xlu1 %v2671_v35 }
 0x341   : > { %v1909_v29 = vadd.f32 %v4855_v20, %v3534_v41  ;;  %v2571_v58 = vpop.xlane.xlu1 %2570  ;;  %v2668_v14 = vsel %vm2475_vm0, %v2411_v28, 0.0 }
 0x342   : > { %v2898_v43 = vadd.f32 %v4790_v2, %v2571_v58  ;;  %v1903_v17 = vpop.f32.mrf.mxu1  ;;  %2669 = vadd.xlane.f32.xlu0 %v2668_v14 }
 0x343   : > { %v2279_v23 = vmax.f32 %v1909_v29, 0.0  ;;  %v1904_v52 = vadd.f32 %v4855_v20, %v1903_v17  ;;  %v2568_v42 = vpop.xlane.xlu0 %2567 }
 0x344   : > { %3027 = vst.msk [vmem:[%s4798_s21 + $0xf8] sm:$0xff] %vm2995_vm1, %v2898_v43  ;;  %v2897_v24 = vadd.f32 %v4790_v2, %v2568_v42 }
 0x345   : > { %v2278_v38 = vmax.f32 %v1904_v52, 0.0  ;;  %v2414_v57 = vmul.f32 %v4869_v53, %v2279_v23 }
 0x346   : > { %3026 = vst.msk [vmem:[%s4798_s21 + $0xf0] sm:$0xff] %vm2995_vm1, %v2897_v24 }
 0x347   : > { %v2677_v62 = vsel %vm2475_vm0, %v2414_v57, 0.0  ;;  %v2413_v25 = vmul.f32 %v4869_v53, %v2278_v38 }
 0x348   : > { %v3537_v26 = vpop.f32.mrf.mxu1  ;;  %2678 = vadd.xlane.f32.xlu1 %v2677_v62 }
 0x349   : > { %v1919_v47 = vadd.f32 %v4855_v20, %v3537_v26  ;;  %v2577_v30 = vpop.xlane.xlu1 %2576  ;;  %v2674_v33 = vsel %vm2475_vm0, %v2413_v25, 0.0  ;;  %v5120_v25 = vld [vmem:[#allocation2] ss:$0 sm:$0xff] }
 0x34a   : > { %v2900_v6 = vadd.f32 %v4790_v2, %v2577_v30  ;;  %v1913_v34 = vpop.f32.mrf.mxu1  ;;  %2675 = vadd.xlane.f32.xlu0 %v2674_v33 }
 0x34b   : > { %v2281_v51 = vmax.f32 %v1919_v47, 0.0  ;;  %v1914_v22 = vadd.f32 %v4855_v20, %v1913_v34  ;;  %v2574_v16 = vpop.xlane.xlu0 %2573 }
 0x34c   : > { %3029 = vst.msk [vmem:[%s4798_s21 + $0x108] sm:$0xff] %vm2995_vm1, %v2900_v6  ;;  %v2899_v8 = vadd.f32 %v4790_v2, %v2574_v16 }
 0x34d   : > { %v2280_v37 = vmax.f32 %v1914_v22, 0.0  ;;  %v2416_v59 = vmul.f32 %v4869_v53, %v2281_v51 }
 0x34e   : > { %3028 = vst.msk [vmem:[%s4798_s21 + $0x100] sm:$0xff] %vm2995_vm1, %v2899_v8 }
 0x34f   : > { %v2683_v18 = vsel %vm2475_vm0, %v2416_v59, 0.0  ;;  %v2415_v39 = vmul.f32 %v4869_v53, %v2280_v37 }
 0x350   : > { %v3540_v56 = vpop.f32.mrf.mxu1  ;;  %2684 = vadd.xlane.f32.xlu1 %v2683_v18 }
 0x351   : > { %v1929_v40 = vadd.f32 %v4855_v20, %v3540_v56  ;;  %v2583_v45 = vpop.xlane.xlu1 %2582  ;;  %v2680_v36 = vsel %vm2475_vm0, %v2415_v39, 0.0 }
 0x352   : > { %v2902_v9 = vadd.f32 %v4790_v2, %v2583_v45  ;;  %v1923_v1 = vpop.f32.mrf.mxu1  ;;  %2681 = vadd.xlane.f32.xlu0 %v2680_v36 }
 0x353   : > { %v2283_v46 = vmax.f32 %v1929_v40, 0.0  ;;  %v1924_v32 = vadd.f32 %v4855_v20, %v1923_v1  ;;  %v2580_v48 = vpop.xlane.xlu0 %2579 }
 0x354   : > { %3031 = vst.msk [vmem:[%s4798_s21 + $0x118] sm:$0xff] %vm2995_vm1, %v2902_v9  ;;  %v2901_v49 = vadd.f32 %v4790_v2, %v2580_v48 }
 0x355   : > { %v2282_v44 = vmax.f32 %v1924_v32, 0.0  ;;  %v2418_v3 = vmul.f32 %v4869_v53, %v2283_v46 }
 0x356   : > { %3030 = vst.msk [vmem:[%s4798_s21 + $0x110] sm:$0xff] %vm2995_vm1, %v2901_v49 }
 0x357   : > { %v2689_v50 = vsel %vm2475_vm0, %v2418_v3, 0.0  ;;  %v2417_v54 = vmul.f32 %v4869_v53, %v2282_v44 }
 0x358   : > { %v3543_v10 = vpop.f32.mrf.mxu1  ;;  %2690 = vadd.xlane.f32.xlu1 %v2689_v50 }
 0x359   : > { %v1939_v11 = vadd.f32 %v4855_v20, %v3543_v10  ;;  %v2589_v27 = vpop.xlane.xlu1 %2588  ;;  %v2686_v21 = vsel %vm2475_vm0, %v2417_v54, 0.0 }
 0x35a   : > { %v2904_v60 = vadd.f32 %v4790_v2, %v2589_v27  ;;  %v1933_v55 = vpop.f32.mrf.mxu1  ;;  %2687 = vadd.xlane.f32.xlu0 %v2686_v21 }
 0x35b   : > { %v2285_v61 = vmax.f32 %v1939_v11, 0.0  ;;  %v1934_v63 = vadd.f32 %v4855_v20, %v1933_v55  ;;  %v2586_v4 = vpop.xlane.xlu0 %2585 }
 0x35c   : > { %3033 = vst.msk [vmem:[%s4798_s21 + $0x128] sm:$0xff] %vm2995_vm1, %v2904_v60  ;;  %v2903_v0 = vadd.f32 %v4790_v2, %v2586_v4 }
 0x35d   : > { %v2284_v5 = vmax.f32 %v1934_v63, 0.0  ;;  %v2420_v7 = vmul.f32 %v4869_v53, %v2285_v61 }
 0x35e   : > { %3032 = vst.msk [vmem:[%s4798_s21 + $0x120] sm:$0xff] %vm2995_vm1, %v2903_v0 }
 0x35f   : > { %v2695_v12 = vsel %vm2475_vm0, %v2420_v7, 0.0  ;;  %v2419_v19 = vmul.f32 %v4869_v53, %v2284_v5 }
 0x360   : > { %v3546_v31 = vpop.f32.mrf.mxu1  ;;  %2696 = vadd.xlane.f32.xlu1 %v2695_v12 }
 0x361   : > { %v1949_v15 = vadd.f32 %v4855_v20, %v3546_v31  ;;  %v2595_v13 = vpop.xlane.xlu1 %2594  ;;  %v2692_v35 = vsel %vm2475_vm0, %v2419_v19, 0.0 }
 0x362   : > { %v2906_v28 = vadd.f32 %v4790_v2, %v2595_v13  ;;  %v1943_v41 = vpop.f32.mrf.mxu1  ;;  %2693 = vadd.xlane.f32.xlu0 %v2692_v35 }
 0x363   : > { %v2287_v29 = vmax.f32 %v1949_v15, 0.0  ;;  %v1944_v58 = vadd.f32 %v4855_v20, %v1943_v41  ;;  %v2592_v14 = vpop.xlane.xlu0 %2591 }
 0x364   : > { %3035 = vst.msk [vmem:[%s4798_s21 + $0x138] sm:$0xff] %vm2995_vm1, %v2906_v28  ;;  %v2905_v43 = vadd.f32 %v4790_v2, %v2592_v14 }
 0x365   : > { %v2286_v17 = vmax.f32 %v1944_v58, 0.0  ;;  %v2422_v23 = vmul.f32 %v4869_v53, %v2287_v29 }
 0x366   : > { %3034 = vst.msk [vmem:[%s4798_s21 + $0x130] sm:$0xff] %vm2995_vm1, %v2905_v43 }
 0x367   : > { %v2701_v52 = vsel %vm2475_vm0, %v2422_v23, 0.0  ;;  %v2421_v42 = vmul.f32 %v4869_v53, %v2286_v17 }
 0x368   : > { %v3549_v24 = vpop.f32.mrf.mxu1  ;;  %2702 = vadd.xlane.f32.xlu1 %v2701_v52 }
 0x369   : > { %v1959_v38 = vadd.f32 %v4855_v20, %v3549_v24  ;;  %v2601_v57 = vpop.xlane.xlu1 %2600  ;;  %v2698_v62 = vsel %vm2475_vm0, %v2421_v42, 0.0 }
 0x36a   : > { %v2908_v2 = vadd.f32 %v5120_v25, %v2601_v57  ;;  %v1953_v26 = vpop.f32.mrf.mxu1  ;;  %2699 = vadd.xlane.f32.xlu0 %v2698_v62 }
 0x36b   : > { %v2289_v47 = vmax.f32 %v1959_v38, 0.0  ;;  %v1954_v30 = vadd.f32 %v4855_v20, %v1953_v26  ;;  %v2598_v33 = vpop.xlane.xlu0 %2597 }
 0x36c   : > { %3037 = vst.msk [vmem:[%s4798_s21 + $0x148] sm:$0xff] %vm2995_vm1, %v2908_v2  ;;  %v2907_v6 = vadd.f32 %v5120_v25, %v2598_v33 }
 0x36d   : > { %v2288_v34 = vmax.f32 %v1954_v30, 0.0  ;;  %v2424_v51 = vmul.f32 %v4869_v53, %v2289_v47 }
 0x36e   : > { %3036 = vst.msk [vmem:[%s4798_s21 + $0x140] sm:$0xff] %vm2995_vm1, %v2907_v6 }
 0x36f   : > { %v2707_v22 = vsel %vm2475_vm0, %v2424_v51, 0.0  ;;  %v2423_v16 = vmul.f32 %v4869_v53, %v2288_v34 }
 0x370   : > { %v3552_v8 = vpop.f32.mrf.mxu1  ;;  %2708 = vadd.xlane.f32.xlu1 %v2707_v22 }
 0x371   : > { %v1969_v37 = vadd.f32 %v4855_v20, %v3552_v8  ;;  %v2607_v59 = vpop.xlane.xlu1 %2606  ;;  %v2704_v18 = vsel %vm2475_vm0, %v2423_v16, 0.0 }
 0x372   : > { %v2910_v39 = vadd.f32 %v5120_v25, %v2607_v59  ;;  %v1963_v56 = vpop.f32.mrf.mxu1  ;;  %2705 = vadd.xlane.f32.xlu0 %v2704_v18 }
 0x373   : > { %v2291_v40 = vmax.f32 %v1969_v37, 0.0  ;;  %v1964_v45 = vadd.f32 %v4855_v20, %v1963_v56  ;;  %v2604_v36 = vpop.xlane.xlu0 %2603 }
 0x374   : > { %3039 = vst.msk [vmem:[%s4798_s21 + $0x158] sm:$0xff] %vm2995_vm1, %v2910_v39  ;;  %v2909_v9 = vadd.f32 %v5120_v25, %v2604_v36 }
 0x375   : > { %v2290_v1 = vmax.f32 %v1964_v45, 0.0  ;;  %v2426_v46 = vmul.f32 %v4869_v53, %v2291_v40 }
 0x376   : > { %3038 = vst.msk [vmem:[%s4798_s21 + $0x150] sm:$0xff] %vm2995_vm1, %v2909_v9 }
 0x377   : > { %v2713_v32 = vsel %vm2475_vm0, %v2426_v46, 0.0  ;;  %v2425_v48 = vmul.f32 %v4869_v53, %v2290_v1 }
 0x378   : > { %v3555_v49 = vpop.f32.mrf.mxu1  ;;  %2714 = vadd.xlane.f32.xlu1 %v2713_v32 }
 0x379   : > { %v1979_v44 = vadd.f32 %v4855_v20, %v3555_v49  ;;  %v2613_v3 = vpop.xlane.xlu1 %2612  ;;  %v2710_v50 = vsel %vm2475_vm0, %v2425_v48, 0.0 }
 0x37a   : > { %v2912_v54 = vadd.f32 %v5120_v25, %v2613_v3  ;;  %v1973_v10 = vpop.f32.mrf.mxu1  ;;  %2711 = vadd.xlane.f32.xlu0 %v2710_v50 }
 0x37b   : > { %v2293_v11 = vmax.f32 %v1979_v44, 0.0  ;;  %v1974_v27 = vadd.f32 %v4855_v20, %v1973_v10  ;;  %v2610_v21 = vpop.xlane.xlu0 %2609 }
 0x37c   : > { %3041 = vst.msk [vmem:[%s4798_s21 + $0x168] sm:$0xff] %vm2995_vm1, %v2912_v54  ;;  %v2911_v60 = vadd.f32 %v5120_v25, %v2610_v21 }
 0x37d   : > { %v2292_v55 = vmax.f32 %v1974_v27, 0.0  ;;  %v2428_v61 = vmul.f32 %v4869_v53, %v2293_v11 }
 0x37e   : > { %3040 = vst.msk [vmem:[%s4798_s21 + $0x160] sm:$0xff] %vm2995_vm1, %v2911_v60 }
 0x37f   : > { %v2719_v63 = vsel %vm2475_vm0, %v2428_v61, 0.0  ;;  %v2427_v4 = vmul.f32 %v4869_v53, %v2292_v55  ;;  %v5204_v55 = vld [vmem:[#allocation8] ss:$0 sm:$0xff] }
 0x380   : > { %v3558_v0 = vpop.f32.mrf.mxu1  ;;  %2720 = vadd.xlane.f32.xlu1 %v2719_v63 }
 0x381   : > { %v1989_v5 = vadd.f32 %v4855_v20, %v3558_v0  ;;  %v2619_v7 = vpop.xlane.xlu1 %2618  ;;  %v2716_v12 = vsel %vm2475_vm0, %v2427_v4, 0.0 }
 0x382   : > { %v2914_v19 = vadd.f32 %v5120_v25, %v2619_v7  ;;  %v1983_v31 = vpop.f32.mrf.mxu1  ;;  %2717 = vadd.xlane.f32.xlu0 %v2716_v12 }
 0x383   : > { %v2295_v15 = vmax.f32 %v1989_v5, 0.0  ;;  %v1984_v13 = vadd.f32 %v4855_v20, %v1983_v31  ;;  %v2616_v35 = vpop.xlane.xlu0 %2615 }
 0x384   : > { %3043 = vst.msk [vmem:[%s4798_s21 + $0x178] sm:$0xff] %vm2995_vm1, %v2914_v19  ;;  %v2913_v28 = vadd.f32 %v5120_v25, %v2616_v35  ;;  %v5217_v35 = vld [vmem:[#allocation10] ss:$0 sm:$0xff] }
 0x385   : > { %v2294_v41 = vmax.f32 %v1984_v13, 0.0  ;;  %v2430_v29 = vmul.f32 %v4869_v53, %v2295_v15 }
 0x386   : > { %3042 = vst.msk [vmem:[%s4798_s21 + $0x170] sm:$0xff] %vm2995_vm1, %v2913_v28 }
 0x387   : > { %v2725_v58 = vsel %vm2475_vm0, %v2430_v29, 0.0  ;;  %v2429_v14 = vmul.f32 %v4869_v53, %v2294_v41 }
 0x388   : > { %v3561_v43 = vpop.f32.mrf.mxu1  ;;  %2726 = vadd.xlane.f32.xlu1 %v2725_v58 }
 0x389   : > { %v1999_v17 = vadd.f32 %v4855_v20, %v3561_v43  ;;  %v2625_v23 = vpop.xlane.xlu1 %2624  ;;  %v2722_v52 = vsel %vm2475_vm0, %v2429_v14, 0.0 }
 0x38a   : > { %v2916_v42 = vadd.f32 %v5120_v25, %v2625_v23  ;;  %v1993_v24 = vpop.f32.mrf.mxu1  ;;  %2723 = vadd.xlane.f32.xlu0 %v2722_v52 }
 0x38b   : > { %v2297_v38 = vmax.f32 %v1999_v17, 0.0  ;;  %v1994_v57 = vadd.f32 %v4855_v20, %v1993_v24  ;;  %v2622_v62 = vpop.xlane.xlu0 %2621 }
 0x38c   : > { %3045 = vst.msk [vmem:[%s4798_s21 + $0x188] sm:$0xff] %vm2995_vm1, %v2916_v42  ;;  %v2915_v2 = vadd.f32 %v5120_v25, %v2622_v62 }
 0x38d   : > { %v2296_v26 = vmax.f32 %v1994_v57, 0.0  ;;  %v2432_v47 = vmul.f32 %v4869_v53, %v2297_v38 }
 0x38e   : > { %3044 = vst.msk [vmem:[%s4798_s21 + $0x180] sm:$0xff] %vm2995_vm1, %v2915_v2 }
 0x38f   : > { %v2731_v30 = vsel %vm2475_vm0, %v2432_v47, 0.0  ;;  %v2431_v33 = vmul.f32 %v4869_v53, %v2296_v26 }
 0x390   : > { %v3564_v6 = vpop.f32.mrf.mxu1  ;;  %2732 = vadd.xlane.f32.xlu1 %v2731_v30 }
 0x391   : > { %v2009_v34 = vadd.f32 %v4855_v20, %v3564_v6  ;;  %v2631_v51 = vpop.xlane.xlu1 %2630  ;;  %v2728_v22 = vsel %vm2475_vm0, %v2431_v33, 0.0 }
 0x392   : > { %v2918_v16 = vadd.f32 %v5120_v25, %v2631_v51  ;;  %v2003_v8 = vpop.f32.mrf.mxu1  ;;  %2729 = vadd.xlane.f32.xlu0 %v2728_v22 }
 0x393   : > { %v2299_v37 = vmax.f32 %v2009_v34, 0.0  ;;  %v2004_v59 = vadd.f32 %v4855_v20, %v2003_v8  ;;  %v2628_v18 = vpop.xlane.xlu0 %2627 }
 0x394   : > { %3047 = vst.msk [vmem:[%s4798_s21 + $0x198] sm:$0xff] %vm2995_vm1, %v2918_v16  ;;  %v2917_v39 = vadd.f32 %v5120_v25, %v2628_v18 }
 0x395   : > { %v2298_v56 = vmax.f32 %v2004_v59, 0.0  ;;  %v2434_v40 = vmul.f32 %v4869_v53, %v2299_v37 }
 0x396   : > { %3046 = vst.msk [vmem:[%s4798_s21 + $0x190] sm:$0xff] %vm2995_vm1, %v2917_v39 }
 0x397   : > { %v2737_v45 = vsel %vm2475_vm0, %v2434_v40, 0.0  ;;  %v2433_v36 = vmul.f32 %v4869_v53, %v2298_v56 }
 0x398   : > { %v3567_v9 = vpop.f32.mrf.mxu1  ;;  %2738 = vadd.xlane.f32.xlu1 %v2737_v45 }
 0x399   : > { %v2019_v1 = vadd.f32 %v4855_v20, %v3567_v9  ;;  %v2637_v46 = vpop.xlane.xlu1 %2636  ;;  %v2734_v32 = vsel %vm2475_vm0, %v2433_v36, 0.0 }
 0x39a   : > { %v2920_v48 = vadd.f32 %v5120_v25, %v2637_v46  ;;  %v2013_v49 = vpop.f32.mrf.mxu1  ;;  %2735 = vadd.xlane.f32.xlu0 %v2734_v32 }
 0x39b   : > { %v2301_v44 = vmax.f32 %v2019_v1, 0.0  ;;  %v2014_v3 = vadd.f32 %v4855_v20, %v2013_v49  ;;  %v2634_v50 = vpop.xlane.xlu0 %2633 }
 0x39c   : > { %3049 = vst.msk [vmem:[%s4798_s21 + $0x1a8] sm:$0xff] %vm2995_vm1, %v2920_v48  ;;  %v2919_v54 = vadd.f32 %v5120_v25, %v2634_v50 }
 0x39d   : > { %v2300_v10 = vmax.f32 %v2014_v3, 0.0  ;;  %v2436_v11 = vmul.f32 %v4869_v53, %v2301_v44 }
 0x39e   : > { %3048 = vst.msk [vmem:[%s4798_s21 + $0x1a0] sm:$0xff] %vm2995_vm1, %v2919_v54 }
 0x39f   : > { %v2743_v27 = vsel %vm2475_vm0, %v2436_v11, 0.0  ;;  %v2435_v21 = vmul.f32 %v4869_v53, %v2300_v10 }
 0x3a0   : > { %v3570_v60 = vpop.f32.mrf.mxu1  ;;  %2744 = vadd.xlane.f32.xlu1 %v2743_v27 }
 0x3a1   : > { %v2029_v20 = vadd.f32 %v5204_v55, %v3570_v60  ;;  %v2643_v61 = vpop.xlane.xlu1 %2642  ;;  %v2740_v63 = vsel %vm2475_vm0, %v2435_v21, 0.0 }
 0x3a2   : > { %v2922_v4 = vadd.f32 %v5120_v25, %v2643_v61  ;;  %v2023_v0 = vpop.f32.mrf.mxu1  ;;  %2741 = vadd.xlane.f32.xlu0 %v2740_v63 }
 0x3a3   : > { %v2303_v5 = vmax.f32 %v2029_v20, 0.0  ;;  %v2024_v7 = vadd.f32 %v5204_v55, %v2023_v0  ;;  %v2640_v12 = vpop.xlane.xlu0 %2639 }
 0x3a4   : > { %3051 = vst.msk [vmem:[%s4798_s21 + $0x1b8] sm:$0xff] %vm2995_vm1, %v2922_v4  ;;  %v2921_v19 = vadd.f32 %v5120_v25, %v2640_v12 }
 0x3a5   : > { %v2302_v31 = vmax.f32 %v2024_v7, 0.0  ;;  %v2438_v15 = vmul.f32 %v4869_v53, %v2303_v5 }
 0x3a6   : > { %3050 = vst.msk [vmem:[%s4798_s21 + $0x1b0] sm:$0xff] %vm2995_vm1, %v2921_v19 }
 0x3a7   : > { %v2749_v13 = vsel %vm2475_vm0, %v2438_v15, 0.0  ;;  %v2437_v28 = vmul.f32 %v5217_v35, %v2302_v31 }
 0x3a8   : > { %v3573_v41 = vpop.f32.mrf.mxu1  ;;  %2750 = vadd.xlane.f32.xlu1 %v2749_v13 }
 0x3a9   : > { %v2039_v29 = vadd.f32 %v5204_v55, %v3573_v41  ;;  %v2649_v58 = vpop.xlane.xlu1 %2648  ;;  %v2746_v14 = vsel %vm2475_vm0, %v2437_v28, 0.0 }
 0x3aa   : > { %v2924_v43 = vadd.f32 %v5120_v25, %v2649_v58  ;;  %v2033_v53 = vpop.f32.mrf.mxu1  ;;  %2747 = vadd.xlane.f32.xlu0 %v2746_v14 }
 0x3ab   : > { %v2305_v17 = vmax.f32 %v2039_v29, 0.0  ;;  %v2034_v23 = vadd.f32 %v5204_v55, %v2033_v53  ;;  %v2646_v52 = vpop.xlane.xlu0 %2645 }
 0x3ac   : > { %3053 = vst.msk [vmem:[%s4798_s21 + $0x1c8] sm:$0xff] %vm2995_vm1, %v2924_v43  ;;  %v2923_v42 = vadd.f32 %v5120_v25, %v2646_v52 }
 0x3ad   : > { %v2304_v24 = vmax.f32 %v2034_v23, 0.0  ;;  %v2440_v38 = vmul.f32 %v5217_v35, %v2305_v17 }
 0x3ae   : > { %3052 = vst.msk [vmem:[%s4798_s21 + $0x1c0] sm:$0xff] %vm2995_vm1, %v2923_v42 }
 0x3af   : > { %v2755_v57 = vsel %vm2475_vm0, %v2440_v38, 0.0  ;;  %v2439_v62 = vmul.f32 %v5217_v35, %v2304_v24 }
 0x3b0   : > { %v3576_v2 = vpop.f32.mrf.mxu1  ;;  %2756 = vadd.xlane.f32.xlu1 %v2755_v57 }
 0x3b1   : > { %v2049_v26 = vadd.f32 %v5204_v55, %v3576_v2  ;;  %v2655_v47 = vpop.xlane.xlu1 %2654  ;;  %v2752_v30 = vsel %vm2475_vm0, %v2439_v62, 0.0 }
 0x3b2   : > { %v2926_v33 = vadd.f32 %v5120_v25, %v2655_v47  ;;  %v2043_v6 = vpop.f32.mrf.mxu1  ;;  %2753 = vadd.xlane.f32.xlu0 %v2752_v30 }
 0x3b3   : > { %v2307_v34 = vmax.f32 %v2049_v26, 0.0  ;;  %v2044_v51 = vadd.f32 %v5204_v55, %v2043_v6  ;;  %v2652_v22 = vpop.xlane.xlu0 %2651 }
 0x3b4   : > { %3055 = vst.msk [vmem:[%s4798_s21 + $0x1d8] sm:$0xff] %vm2995_vm1, %v2926_v33  ;;  %v2925_v16 = vadd.f32 %v5120_v25, %v2652_v22  ;;  %v3579_v8 = vpop.f32.mrf.mxu1 }
 0x3b5   : > { %v2306_v37 = vmax.f32 %v2044_v51, 0.0  ;;  %v2059_v59 = vadd.f32 %v5204_v55, %v3579_v8  ;;  %v2442_v18 = vmul.f32 %v5217_v35, %v2307_v34 }
 0x3b6   : > { %3054 = vst.msk [vmem:[%s4798_s21 + $0x1d0] sm:$0xff] %vm2995_vm1, %v2925_v16  ;;  %v2053_v39 = vpop.f32.mrf.mxu1 }
 0x3b7   : > { %v2309_v56 = vmax.f32 %v2059_v59, 0.0  ;;  %v2054_v40 = vadd.f32 %v5204_v55, %v2053_v39  ;;  %v2761_v45 = vsel %vm2475_vm0, %v2442_v18, 0.0  ;;  %v2441_v36 = vmul.f32 %v5217_v35, %v2306_v37 }
 0x3b8   : > { %v3582_v9 = vpop.f32.mrf.mxu1  ;;  %2762 = vadd.xlane.f32.xlu1 %v2761_v45 }
 0x3b9   : > { %v2308_v1 = vmax.f32 %v2054_v40, 0.0  ;;  %v2069_v46 = vadd.f32 %v5204_v55, %v3582_v9  ;;  %v2661_v32 = vpop.xlane.xlu1 %2660  ;;  %v2758_v48 = vsel %vm2475_vm0, %v2441_v36, 0.0  ;;  %v2444_v49 = vmul.f32 %v5217_v35, %v2309_v56 }
 0x3ba   : > { %v2928_v44 = vadd.f32 %v5120_v25, %v2661_v32  ;;  %v2063_v3 = vpop.f32.mrf.mxu1  ;;  %2759 = vadd.xlane.f32.xlu0 %v2758_v48 }
 0x3bb   : > { %v2311_v50 = vmax.f32 %v2069_v46, 0.0  ;;  %v2064_v54 = vadd.f32 %v5204_v55, %v2063_v3  ;;  %v2658_v10 = vpop.xlane.xlu0 %2657  ;;  %v2767_v11 = vsel %vm2475_vm0, %v2444_v49, 0.0  ;;  %v2443_v27 = vmul.f32 %v5217_v35, %v2308_v1 }
 0x3bc   : > { %3057 = vst.msk [vmem:[%s4798_s21 + $0x1e8] sm:$0xff] %vm2995_vm1, %v2928_v44  ;;  %v2927_v21 = vadd.f32 %v5120_v25, %v2658_v10  ;;  %v3585_v60 = vpop.f32.mrf.mxu1  ;;  %2768 = vadd.xlane.f32.xlu1 %v2767_v11 }
 0x3bd   : > { %v2446_v20 = vmul.f32 %v5217_v35, %v2311_v50  ;;  %v2310_v61 = vmax.f32 %v2064_v54, 0.0  ;;  %v2079_v63 = vadd.f32 %v5204_v55, %v3585_v60  ;;  %v2764_v4 = vsel %vm2475_vm0, %v2443_v27, 0.0 }
 0x3be   : > { %3056 = vst.msk [vmem:[%s4798_s21 + $0x1e0] sm:$0xff] %vm2995_vm1, %v2927_v21  ;;  %v2073_v0 = vpop.f32.mrf.mxu1  ;;  %2765 = vadd.xlane.f32.xlu0 %v2764_v4 }
 0x3bf   : > { %v2445_v5 = vmul.f32 %v5217_v35, %v2310_v61  ;;  %v2313_v7 = vmax.f32 %v2079_v63, 0.0  ;;  %v2074_v12 = vadd.f32 %v5204_v55, %v2073_v0  ;;  %v2773_v19 = vsel %vm2475_vm0, %v2446_v20, 0.0 }
 0x3c0   : > { %v3588_v31 = vpop.f32.mrf.mxu1  ;;  %2774 = vadd.xlane.f32.xlu1 %v2773_v19 }
 0x3c1   : > { %v2448_v15 = vmul.f32 %v5217_v35, %v2313_v7  ;;  %v2312_v13 = vmax.f32 %v2074_v12, 0.0  ;;  %v2089_v28 = vadd.f32 %v5204_v55, %v3588_v31  ;;  %v2667_v41 = vpop.xlane.xlu1 %2666  ;;  %v2770_v29 = vsel %vm2475_vm0, %v2445_v5, 0.0 }
 0x3c2   : > { %v2930_v58 = vadd.f32 %v5120_v25, %v2667_v41  ;;  %v2083_v14 = vpop.f32.mrf.mxu1  ;;  %2771 = vadd.xlane.f32.xlu0 %v2770_v29 }
 0x3c3   : > { %v2447_v43 = vmul.f32 %v5217_v35, %v2312_v13  ;;  %v2315_v53 = vmax.f32 %v2089_v28, 0.0  ;;  %v2084_v17 = vadd.f32 %v5204_v55, %v2083_v14  ;;  %v2664_v23 = vpop.xlane.xlu0 %2663  ;;  %v2779_v52 = vsel %vm2475_vm0, %v2448_v15, 0.0 }
 0x3c4   : > { %3059 = vst.msk [vmem:[%s4798_s21 + $0x1f8] sm:$0xff] %vm2995_vm1, %v2930_v58  ;;  %v2929_v42 = vadd.f32 %v5120_v25, %v2664_v23  ;;  %v3591_v24 = vpop.f32.mrf.mxu1  ;;  %2780 = vadd.xlane.f32.xlu1 %v2779_v52 }
 0x3c5   : > { %v2450_v38 = vmul.f32 %v5217_v35, %v2315_v53  ;;  %v2314_v57 = vmax.f32 %v2084_v17, 0.0  ;;  %v2099_v62 = vadd.f32 %v5204_v55, %v3591_v24  ;;  %v2776_v2 = vsel %vm2475_vm0, %v2447_v43, 0.0 }
 0x3c6   : > { %3058 = vst.msk [vmem:[%s4798_s21 + $0x1f0] sm:$0xff] %vm2995_vm1, %v2929_v42  ;;  %v2093_v26 = vpop.f32.mrf.mxu1  ;;  %2777 = vadd.xlane.f32.xlu0 %v2776_v2 }
 0x3c7   : > { %v2449_v47 = vmul.f32 %v5217_v35, %v2314_v57  ;;  %v2317_v30 = vmax.f32 %v2099_v62, 0.0  ;;  %v2094_v33 = vadd.f32 %v5204_v55, %v2093_v26  ;;  %v2785_v6 = vsel %vm2475_vm0, %v2450_v38, 0.0 }
 0x3c8   : > { %v3594_v34 = vpop.f32.mrf.mxu1  ;;  %2786 = vadd.xlane.f32.xlu1 %v2785_v6 }
 0x3c9   : > { %v2452_v51 = vmul.f32 %v5217_v35, %v2317_v30  ;;  %v2316_v22 = vmax.f32 %v2094_v33, 0.0  ;;  %v2109_v16 = vadd.f32 %v5204_v55, %v3594_v34  ;;  %v2673_v8 = vpop.xlane.xlu1 %2672  ;;  %v2782_v37 = vsel %vm2475_vm0, %v2449_v47, 0.0 }
 0x3ca   : > { %v2932_v59 = vadd.f32 %v5120_v25, %v2673_v8  ;;  %v2103_v18 = vpop.f32.mrf.mxu1  ;;  %2783 = vadd.xlane.f32.xlu0 %v2782_v37 }
 0x3cb   : > { %v2451_v39 = vmul.f32 %v5217_v35, %v2316_v22  ;;  %v2319_v56 = vmax.f32 %v2109_v16, 0.0  ;;  %v2104_v40 = vadd.f32 %v5204_v55, %v2103_v18  ;;  %v2670_v45 = vpop.xlane.xlu0 %2669  ;;  %v2791_v36 = vsel %vm2475_vm0, %v2452_v51, 0.0 }
 0x3cc   : > { %3061 = vst.msk [vmem:[%s4798_s21 + $0x208] sm:$0xff] %vm2995_vm1, %v2932_v59  ;;  %v2931_v9 = vadd.f32 %v5120_v25, %v2670_v45  ;;  %v3597_v1 = vpop.f32.mrf.mxu1  ;;  %2792 = vadd.xlane.f32.xlu1 %v2791_v36 }
 0x3cd   : > { %v2454_v46 = vmul.f32 %v5217_v35, %v2319_v56  ;;  %v2318_v32 = vmax.f32 %v2104_v40, 0.0  ;;  %v2119_v48 = vadd.f32 %v5204_v55, %v3597_v1  ;;  %v2788_v49 = vsel %vm2475_vm0, %v2451_v39, 0.0 }
 0x3ce   : > { %3060 = vst.msk [vmem:[%s4798_s21 + $0x200] sm:$0xff] %vm2995_vm1, %v2931_v9  ;;  %v2113_v44 = vpop.f32.mrf.mxu1  ;;  %2789 = vadd.xlane.f32.xlu0 %v2788_v49 }
 0x3cf   : > { %v2453_v3 = vmul.f32 %v5217_v35, %v2318_v32  ;;  %v2321_v50 = vmax.f32 %v2119_v48, 0.0  ;;  %v2114_v54 = vadd.f32 %v5204_v55, %v2113_v44  ;;  %v2797_v10 = vsel %vm2475_vm0, %v2454_v46, 0.0 }
 0x3d0   : > { %v3600_v11 = vpop.f32.mrf.mxu1  ;;  %2798 = vadd.xlane.f32.xlu1 %v2797_v10 }
 0x3d1   : > { %v2456_v27 = vmul.f32 %v5217_v35, %v2321_v50  ;;  %v2320_v21 = vmax.f32 %v2114_v54, 0.0  ;;  %v2129_v60 = vadd.f32 %v5204_v55, %v3600_v11  ;;  %v2679_v20 = vpop.xlane.xlu1 %2678  ;;  %v2794_v61 = vsel %vm2475_vm0, %v2453_v3, 0.0 }
 0x3d2   : > { %v2934_v63 = vadd.f32 %v5120_v25, %v2679_v20  ;;  %v2123_v4 = vpop.f32.mrf.mxu1  ;;  %2795 = vadd.xlane.f32.xlu0 %v2794_v61 }
 0x3d3   : > { %v2455_v0 = vmul.f32 %v5217_v35, %v2320_v21  ;;  %v2323_v5 = vmax.f32 %v2129_v60, 0.0  ;;  %v2124_v7 = vadd.f32 %v5204_v55, %v2123_v4  ;;  %v2676_v12 = vpop.xlane.xlu0 %2675  ;;  %v2803_v19 = vsel %vm2475_vm0, %v2456_v27, 0.0 }
 0x3d4   : > { %3063 = vst.msk [vmem:[%s4798_s21 + $0x218] sm:$0xff] %vm2995_vm1, %v2934_v63  ;;  %v2933_v31 = vadd.f32 %v5120_v25, %v2676_v12  ;;  %v3603_v15 = vpop.f32.mrf.mxu1  ;;  %2804 = vadd.xlane.f32.xlu1 %v2803_v19 }
 0x3d5   : > { %v2458_v13 = vmul.f32 %v5217_v35, %v2323_v5  ;;  %v2322_v28 = vmax.f32 %v2124_v7, 0.0  ;;  %v2139_v41 = vadd.f32 %v5204_v55, %v3603_v15  ;;  %v2800_v29 = vsel %vm2475_vm0, %v2455_v0, 0.0 }
 0x3d6   : > { %3062 = vst.msk [vmem:[%s4798_s21 + $0x210] sm:$0xff] %vm2995_vm1, %v2933_v31  ;;  %v2133_v58 = vpop.f32.mrf.mxu1  ;;  %2801 = vadd.xlane.f32.xlu0 %v2800_v29 }
 0x3d7   : > { %v2457_v14 = vmul.f32 %v5217_v35, %v2322_v28  ;;  %v2325_v43 = vmax.f32 %v2139_v41, 0.0  ;;  %v2134_v53 = vadd.f32 %v5204_v55, %v2133_v58  ;;  %v2809_v17 = vsel %vm2475_vm0, %v2458_v13, 0.0 }
 0x3d8   : > { %v3606_v23 = vpop.f32.mrf.mxu1  ;;  %2810 = vadd.xlane.f32.xlu1 %v2809_v17 }
 0x3d9   : > { %v2460_v52 = vmul.f32 %v5217_v35, %v2325_v43  ;;  %v2324_v42 = vmax.f32 %v2134_v53, 0.0  ;;  %v2149_v24 = vadd.f32 %v5204_v55, %v3606_v23  ;;  %v2685_v38 = vpop.xlane.xlu1 %2684  ;;  %v2806_v57 = vsel %vm2475_vm0, %v2457_v14, 0.0 }
 0x3da   : > { %v2936_v62 = vadd.f32 %v5120_v25, %v2685_v38  ;;  %v2143_v2 = vpop.f32.mrf.mxu1  ;;  %2807 = vadd.xlane.f32.xlu0 %v2806_v57 }
 0x3db   : > { %v2459_v26 = vmul.f32 %v5217_v35, %v2324_v42  ;;  %v2327_v47 = vmax.f32 %v2149_v24, 0.0  ;;  %v2144_v30 = vadd.f32 %v5204_v55, %v2143_v2  ;;  %v2682_v33 = vpop.xlane.xlu0 %2681  ;;  %v2815_v6 = vsel %vm2475_vm0, %v2460_v52, 0.0 }
 0x3dc   : > { %3065 = vst.msk [vmem:[%s4798_s21 + $0x228] sm:$0xff] %vm2995_vm1, %v2936_v62  ;;  %v2935_v34 = vadd.f32 %v5120_v25, %v2682_v33  ;;  %v3609_v51 = vpop.f32.mrf.mxu1  ;;  %2816 = vadd.xlane.f32.xlu1 %v2815_v6 }
 0x3dd   : > { %v2462_v22 = vmul.f32 %v5217_v35, %v2327_v47  ;;  %v2326_v16 = vmax.f32 %v2144_v30, 0.0  ;;  %v2159_v8 = vadd.f32 %v5204_v55, %v3609_v51  ;;  %v2812_v37 = vsel %vm2475_vm0, %v2459_v26, 0.0 }
 0x3de   : > { %3064 = vst.msk [vmem:[%s4798_s21 + $0x220] sm:$0xff] %vm2995_vm1, %v2935_v34  ;;  %v2153_v59 = vpop.f32.mrf.mxu1  ;;  %2813 = vadd.xlane.f32.xlu0 %v2812_v37 }
 0x3df   : > { %v2461_v18 = vmul.f32 %v5217_v35, %v2326_v16  ;;  %v2329_v39 = vmax.f32 %v2159_v8, 0.0  ;;  %v2154_v56 = vadd.f32 %v5204_v55, %v2153_v59  ;;  %v2821_v40 = vsel %vm2475_vm0, %v2462_v22, 0.0 }
 0x3e0   : > { %v3612_v45 = vpop.f32.mrf.mxu1  ;;  %2822 = vadd.xlane.f32.xlu1 %v2821_v40 }
 0x3e1   : > { %v2464_v36 = vmul.f32 %v5217_v35, %v2329_v39  ;;  %v2328_v9 = vmax.f32 %v2154_v56, 0.0  ;;  %v2169_v1 = vadd.f32 %v5204_v55, %v3612_v45  ;;  %v2691_v46 = vpop.xlane.xlu1 %2690  ;;  %v2818_v32 = vsel %vm2475_vm0, %v2461_v18, 0.0 }
 0x3e2   : > { %v2938_v48 = vadd.f32 %v5120_v25, %v2691_v46  ;;  %v2163_v49 = vpop.f32.mrf.mxu1  ;;  %2819 = vadd.xlane.f32.xlu0 %v2818_v32 }
 0x3e3   : > { %v2463_v44 = vmul.f32 %v5217_v35, %v2328_v9  ;;  %v2331_v3 = vmax.f32 %v2169_v1, 0.0  ;;  %v2164_v50 = vadd.f32 %v5204_v55, %v2163_v49  ;;  %v2688_v54 = vpop.xlane.xlu0 %2687  ;;  %v2827_v10 = vsel %vm2475_vm0, %v2464_v36, 0.0 }
 0x3e4   : > { %3067 = vst.msk [vmem:[%s4798_s21 + $0x238] sm:$0xff] %vm2995_vm1, %v2938_v48  ;;  %v2937_v11 = vadd.f32 %v5120_v25, %v2688_v54  ;;  %v3615_v27 = vpop.f32.mrf.mxu1  ;;  %2828 = vadd.xlane.f32.xlu1 %v2827_v10 }
 0x3e5   : > { %v2466_v21 = vmul.f32 %v5217_v35, %v2331_v3  ;;  %v2330_v60 = vmax.f32 %v2164_v50, 0.0  ;;  %v2179_v20 = vadd.f32 %v5204_v55, %v3615_v27  ;;  %v2824_v61 = vsel %vm2475_vm0, %v2463_v44, 0.0 }
 0x3e6   : > { %3066 = vst.msk [vmem:[%s4798_s21 + $0x230] sm:$0xff] %vm2995_vm1, %v2937_v11  ;;  %v2173_v63 = vpop.f32.mrf.mxu1  ;;  %2825 = vadd.xlane.f32.xlu0 %v2824_v61 }
 0x3e7   : > { %v2465_v4 = vmul.f32 %v5217_v35, %v2330_v60  ;;  %v2333_v0 = vmax.f32 %v2179_v20, 0.0  ;;  %v2174_v5 = vadd.f32 %v5204_v55, %v2173_v63  ;;  %v2833_v7 = vsel %vm2475_vm0, %v2466_v21, 0.0 }
 0x3e8   : > { %v3618_v12 = vpop.f32.mrf.mxu1  ;;  %2834 = vadd.xlane.f32.xlu1 %v2833_v7 }
 0x3e9   : > { %v2468_v19 = vmul.f32 %v5217_v35, %v2333_v0  ;;  %v2332_v31 = vmax.f32 %v2174_v5, 0.0  ;;  %v2189_v15 = vadd.f32 %v5204_v55, %v3618_v12  ;;  %v2697_v13 = vpop.xlane.xlu1 %2696  ;;  %v2830_v28 = vsel %vm2475_vm0, %v2465_v4, 0.0 }
 0x3ea   : > { %v2940_v41 = vadd.f32 %v5120_v25, %v2697_v13  ;;  %v2183_v29 = vpop.f32.mrf.mxu1  ;;  %2831 = vadd.xlane.f32.xlu0 %v2830_v28 }
 0x3eb   : > { %v2467_v58 = vmul.f32 %v5217_v35, %v2332_v31  ;;  %v2335_v14 = vmax.f32 %v2189_v15, 0.0  ;;  %v2184_v43 = vadd.f32 %v5204_v55, %v2183_v29  ;;  %v2694_v53 = vpop.xlane.xlu0 %2693  ;;  %v2839_v17 = vsel %vm2475_vm0, %v2468_v19, 0.0 }
 0x3ec   : > { %3069 = vst.msk [vmem:[%s4798_s21 + $0x248] sm:$0xff] %vm2995_vm1, %v2940_v41  ;;  %v2939_v23 = vadd.f32 %v5120_v25, %v2694_v53  ;;  %v3621_v52 = vpop.f32.mrf.mxu1  ;;  %2840 = vadd.xlane.f32.xlu1 %v2839_v17 }
 0x3ed   : > { %v2470_v42 = vmul.f32 %v5217_v35, %v2335_v14  ;;  %v2334_v24 = vmax.f32 %v2184_v43, 0.0  ;;  %v2199_v38 = vadd.f32 %v5204_v55, %v3621_v52  ;;  %v2836_v57 = vsel %vm2475_vm0, %v2467_v58, 0.0 }
 0x3ee   : > { %3068 = vst.msk [vmem:[%s4798_s21 + $0x240] sm:$0xff] %vm2995_vm1, %v2939_v23  ;;  %v2193_v62 = vpop.f32.mrf.mxu1  ;;  %2837 = vadd.xlane.f32.xlu0 %v2836_v57 }
 0x3ef   : > { %v2469_v2 = vmul.f32 %v5217_v35, %v2334_v24  ;;  %v2337_v26 = vmax.f32 %v2199_v38, 0.0  ;;  %v2194_v47 = vadd.f32 %v5204_v55, %v2193_v62  ;;  %v2845_v30 = vsel %vm2475_vm0, %v2470_v42, 0.0 }
 0x3f0   : > { %v3624_v33 = vpop.f32.mrf.mxu1  ;;  %2846 = vadd.xlane.f32.xlu1 %v2845_v30 }
 0x3f1   : > { %v2472_v6 = vmul.f32 %v5217_v35, %v2337_v26  ;;  %v2336_v34 = vmax.f32 %v2194_v47, 0.0  ;;  %v2209_v51 = vadd.f32 %v5204_v55, %v3624_v33  ;;  %v2703_v22 = vpop.xlane.xlu1 %2702  ;;  %v2842_v16 = vsel %vm2475_vm0, %v2469_v2, 0.0 }
 0x3f2   : > { %v2942_v8 = vadd.f32 %v5120_v25, %v2703_v22  ;;  %v2203_v37 = vpop.f32.mrf.mxu1  ;;  %2843 = vadd.xlane.f32.xlu0 %v2842_v16 }
 0x3f3   : > { %v2471_v59 = vmul.f32 %v5217_v35, %v2336_v34  ;;  %v2339_v18 = vmax.f32 %v2209_v51, 0.0  ;;  %v2204_v39 = vadd.f32 %v5204_v55, %v2203_v37  ;;  %v2700_v56 = vpop.xlane.xlu0 %2699  ;;  %v2851_v40 = vsel %vm2475_vm0, %v2472_v6, 0.0 }
 0x3f4   : > { %3071 = vst.msk [vmem:[%s4798_s21 + $0x258] sm:$0xff] %vm2995_vm1, %v2942_v8  ;;  %v2941_v45 = vadd.f32 %v5120_v25, %v2700_v56  ;;  %2852 = vadd.xlane.f32.xlu1 %v2851_v40 }
 0x3f5   : > { %v2474_v36 = vmul.f32 %v5217_v35, %v2339_v18  ;;  %v2338_v9 = vmax.f32 %v2204_v39, 0.0  ;;  %v2848_v1 = vsel %vm2475_vm0, %v2471_v59, 0.0 }
 0x3f6   : > { %3070 = vst.msk [vmem:[%s4798_s21 + $0x250] sm:$0xff] %vm2995_vm1, %v2941_v45  ;;  %2849 = vadd.xlane.f32.xlu0 %v2848_v1 }
 0x3f7   : > { %v2473_v55 = vmul.f32 %v5217_v35, %v2338_v9  ;;  %v2857_v46 = vsel %vm2475_vm0, %v2474_v36, 0.0 }
 0x3f8   : > { %2858 = vadd.xlane.f32.xlu1 %v2857_v46 }
 0x3f9   : > { %v2709_v32 = vpop.xlane.xlu1 %2708  ;;  %v2854_v48 = vsel %vm2475_vm0, %v2473_v55, 0.0 }
 0x3fa   : > { %v2944_v49 = vadd.f32 %v5120_v25, %v2709_v32  ;;  %2855 = vadd.xlane.f32.xlu0 %v2854_v48  ;;  %v3781_v48 = vld [vmem:[#allocation2] ss:$0 sm:$0xff] }
 0x3fb   : > { %v2706_v44 = vpop.xlane.xlu0 %2705 }
 0x3fc   : > { %3073 = vst.msk [vmem:[%s4798_s21 + $0x268] sm:$0xff] %vm2995_vm1, %v2944_v49  ;;  %v2943_v3 = vadd.f32 %v5120_v25, %v2706_v44 }
 0x3fe   : > { %3072 = vst.msk [vmem:[%s4798_s21 + $0x260] sm:$0xff] %vm2995_vm1, %v2943_v3 }
 0x401   : > { %v2715_v35 = vpop.xlane.xlu1 %2714 }
 0x402   : > { %v2946_v50 = vadd.f32 %v5120_v25, %v2715_v35 }
 0x403   : > { %v2712_v54 = vpop.xlane.xlu0 %2711 }
 0x404   : > { %3075 = vst.msk [vmem:[%s4798_s21 + $0x278] sm:$0xff] %vm2995_vm1, %v2946_v50  ;;  %v2945_v10 = vadd.f32 %v5120_v25, %v2712_v54 }
 0x406   : > { %3074 = vst.msk [vmem:[%s4798_s21 + $0x270] sm:$0xff] %vm2995_vm1, %v2945_v10 }
 0x409   : > { %v2721_v11 = vpop.xlane.xlu1 %2720 }
 0x40a   : > { %v2948_v27 = vadd.f32 %v5120_v25, %v2721_v11 }
 0x40b   : > { %v2718_v21 = vpop.xlane.xlu0 %2717 }
 0x40c   : > { %3077 = vst.msk [vmem:[%s4798_s21 + $0x288] sm:$0xff] %vm2995_vm1, %v2948_v27  ;;  %v2947_v60 = vadd.f32 %v5120_v25, %v2718_v21 }
 0x40e   : > { %3076 = vst.msk [vmem:[%s4798_s21 + $0x280] sm:$0xff] %vm2995_vm1, %v2947_v60 }
 0x411   : > { %v2727_v20 = vpop.xlane.xlu1 %2726 }
 0x412   : > { %v2950_v61 = vadd.f32 %v5120_v25, %v2727_v20 }
 0x413   : > { %v2724_v63 = vpop.xlane.xlu0 %2723 }
 0x414   : > { %3079 = vst.msk [vmem:[%s4798_s21 + $0x298] sm:$0xff] %vm2995_vm1, %v2950_v61  ;;  %v2949_v4 = vadd.f32 %v5120_v25, %v2724_v63 }
 0x416   : > { %3078 = vst.msk [vmem:[%s4798_s21 + $0x290] sm:$0xff] %vm2995_vm1, %v2949_v4 }
 0x419   : > { %v2733_v0 = vpop.xlane.xlu1 %2732 }
 0x41a   : > { %v2952_v5 = vadd.f32 %v5120_v25, %v2733_v0 }
 0x41b   : > { %v2730_v7 = vpop.xlane.xlu0 %2729 }
 0x41c   : > { %3081 = vst.msk [vmem:[%s4798_s21 + $0x2a8] sm:$0xff] %vm2995_vm1, %v2952_v5  ;;  %v2951_v12 = vadd.f32 %v5120_v25, %v2730_v7 }
 0x41e   : > { %3080 = vst.msk [vmem:[%s4798_s21 + $0x2a0] sm:$0xff] %vm2995_vm1, %v2951_v12 }
 0x421   : > { %v2739_v19 = vpop.xlane.xlu1 %2738 }
 0x422   : > { %v2954_v31 = vadd.f32 %v5120_v25, %v2739_v19 }
 0x423   : > { %v2736_v15 = vpop.xlane.xlu0 %2735 }
 0x424   : > { %3083 = vst.msk [vmem:[%s4798_s21 + $0x2b8] sm:$0xff] %vm2995_vm1, %v2954_v31  ;;  %v2953_v13 = vadd.f32 %v5120_v25, %v2736_v15 }
 0x426   : > { %3082 = vst.msk [vmem:[%s4798_s21 + $0x2b0] sm:$0xff] %vm2995_vm1, %v2953_v13 }
 0x429   : > { %v2745_v28 = vpop.xlane.xlu1 %2744 }
 0x42a   : > { %v2956_v41 = vadd.f32 %v5120_v25, %v2745_v28 }
 0x42b   : > { %v2742_v29 = vpop.xlane.xlu0 %2741 }
 0x42c   : > { %3085 = vst.msk [vmem:[%s4798_s21 + $0x2c8] sm:$0xff] %vm2995_vm1, %v2956_v41  ;;  %v2955_v58 = vadd.f32 %v5120_v25, %v2742_v29 }
 0x42e   : > { %3084 = vst.msk [vmem:[%s4798_s21 + $0x2c0] sm:$0xff] %vm2995_vm1, %v2955_v58 }
 0x431   : > { %v2751_v14 = vpop.xlane.xlu1 %2750 }
 0x432   : > { %v2958_v43 = vadd.f32 %v5120_v25, %v2751_v14 }
 0x433   : > { %v2748_v53 = vpop.xlane.xlu0 %2747 }
 0x434   : > { %3087 = vst.msk [vmem:[%s4798_s21 + $0x2d8] sm:$0xff] %vm2995_vm1, %v2958_v43  ;;  %v2957_v17 = vadd.f32 %v5120_v25, %v2748_v53 }
 0x436   : > { %3086 = vst.msk [vmem:[%s4798_s21 + $0x2d0] sm:$0xff] %vm2995_vm1, %v2957_v17 }
 0x439   : > { %v2757_v23 = vpop.xlane.xlu1 %2756 }
 0x43a   : > { %v2960_v52 = vadd.f32 %v5120_v25, %v2757_v23 }
 0x43b   : > { %v2754_v42 = vpop.xlane.xlu0 %2753 }
 0x43c   : > { %3089 = vst.msk [vmem:[%s4798_s21 + $0x2e8] sm:$0xff] %vm2995_vm1, %v2960_v52  ;;  %v2959_v24 = vadd.f32 %v5120_v25, %v2754_v42 }
 0x43e   : > { %3088 = vst.msk [vmem:[%s4798_s21 + $0x2e0] sm:$0xff] %vm2995_vm1, %v2959_v24 }
 0x441   : > { %v2763_v38 = vpop.xlane.xlu1 %2762 }
 0x442   : > { %v2962_v57 = vadd.f32 %v5120_v25, %v2763_v38 }
 0x443   : > { %v2760_v62 = vpop.xlane.xlu0 %2759 }
 0x444   : > { %3091 = vst.msk [vmem:[%s4798_s21 + $0x2f8] sm:$0xff] %vm2995_vm1, %v2962_v57  ;;  %v2961_v2 = vadd.f32 %v5120_v25, %v2760_v62 }
 0x445   : > { %v2769_v26 = vpop.xlane.xlu1 %2768 }
 0x446   : > { %3090 = vst.msk [vmem:[%s4798_s21 + $0x2f0] sm:$0xff] %vm2995_vm1, %v2961_v2  ;;  %v2964_v47 = vadd.f32 %v5120_v25, %v2769_v26 }
 0x447   : > { %v2766_v30 = vpop.xlane.xlu0 %2765 }
 0x448   : > { %3093 = vst.msk [vmem:[%s4798_s21 + $0x308] sm:$0xff] %vm2995_vm1, %v2964_v47  ;;  %v2963_v33 = vadd.f32 %v5120_v25, %v2766_v30 }
 0x449   : > { %v2775_v6 = vpop.xlane.xlu1 %2774 }
 0x44a   : > { %3092 = vst.msk [vmem:[%s4798_s21 + $0x300] sm:$0xff] %vm2995_vm1, %v2963_v33  ;;  %v2966_v34 = vadd.f32 %v5120_v25, %v2775_v6 }
 0x44b   : > { %v2772_v51 = vpop.xlane.xlu0 %2771 }
 0x44c   : > { %3095 = vst.msk [vmem:[%s4798_s21 + $0x318] sm:$0xff] %vm2995_vm1, %v2966_v34  ;;  %v2965_v22 = vadd.f32 %v5120_v25, %v2772_v51 }
 0x44d   : > { %v2781_v16 = vpop.xlane.xlu1 %2780 }
 0x44e   : > { %3094 = vst.msk [vmem:[%s4798_s21 + $0x310] sm:$0xff] %vm2995_vm1, %v2965_v22  ;;  %v2968_v8 = vadd.f32 %v5120_v25, %v2781_v16 }
 0x44f   : > { %v2778_v37 = vpop.xlane.xlu0 %2777 }
 0x450   : > { %3097 = vst.msk [vmem:[%s4798_s21 + $0x328] sm:$0xff] %vm2995_vm1, %v2968_v8  ;;  %v2967_v59 = vadd.f32 %v5120_v25, %v2778_v37 }
 0x451   : > { %v2787_v18 = vpop.xlane.xlu1 %2786 }
 0x452   : > { %3096 = vst.msk [vmem:[%s4798_s21 + $0x320] sm:$0xff] %vm2995_vm1, %v2967_v59  ;;  %v2970_v39 = vadd.f32 %v5120_v25, %v2787_v18 }
 0x453   : > { %v2784_v56 = vpop.xlane.xlu0 %2783 }
 0x454   : > { %3099 = vst.msk [vmem:[%s4798_s21 + $0x338] sm:$0xff] %vm2995_vm1, %v2970_v39  ;;  %v2969_v40 = vadd.f32 %v5120_v25, %v2784_v56 }
 0x455   : > { %v2793_v45 = vpop.xlane.xlu1 %2792 }
 0x456   : > { %3098 = vst.msk [vmem:[%s4798_s21 + $0x330] sm:$0xff] %vm2995_vm1, %v2969_v40  ;;  %v2972_v36 = vadd.f32 %v5120_v25, %v2793_v45 }
 0x457   : > { %v2790_v9 = vpop.xlane.xlu0 %2789 }
 0x458   : > { %3101 = vst.msk [vmem:[%s4798_s21 + $0x348] sm:$0xff] %vm2995_vm1, %v2972_v36  ;;  %v2971_v1 = vadd.f32 %v5120_v25, %v2790_v9 }
 0x459   : > { %v2799_v55 = vpop.xlane.xlu1 %2798 }
 0x45a   : > { %3100 = vst.msk [vmem:[%s4798_s21 + $0x340] sm:$0xff] %vm2995_vm1, %v2971_v1  ;;  %v2974_v46 = vadd.f32 %v5120_v25, %v2799_v55 }
 0x45b   : > { %v2796_v32 = vpop.xlane.xlu0 %2795 }
 0x45c   : > { %3103 = vst.msk [vmem:[%s4798_s21 + $0x358] sm:$0xff] %vm2995_vm1, %v2974_v46  ;;  %v2973_v49 = vadd.f32 %v3781_v48, %v2796_v32 }
 0x45d   : > { %v2805_v44 = vpop.xlane.xlu1 %2804 }
 0x45e   : > { %3102 = vst.msk [vmem:[%s4798_s21 + $0x350] sm:$0xff] %vm2995_vm1, %v2973_v49  ;;  %v2976_v3 = vadd.f32 %v3781_v48, %v2805_v44 }
 0x45f   : > { %v2802_v35 = vpop.xlane.xlu0 %2801 }
 0x460   : > { %3105 = vst.msk [vmem:[%s4798_s21 + $0x368] sm:$0xff] %vm2995_vm1, %v2976_v3  ;;  %v2975_v50 = vadd.f32 %v3781_v48, %v2802_v35 }
 0x461   : > { %v2811_v54 = vpop.xlane.xlu1 %2810 }
 0x462   : > { %3104 = vst.msk [vmem:[%s4798_s21 + $0x360] sm:$0xff] %vm2995_vm1, %v2975_v50  ;;  %v2978_v25 = vadd.f32 %v3781_v48, %v2811_v54 }
 0x463   : > { %v2808_v10 = vpop.xlane.xlu0 %2807 }
 0x464   : > { %3107 = vst.msk [vmem:[%s4798_s21 + $0x378] sm:$0xff] %vm2995_vm1, %v2978_v25  ;;  %v2977_v11 = vadd.f32 %v3781_v48, %v2808_v10 }
 0x465   : > { %v2817_v27 = vpop.xlane.xlu1 %2816 }
 0x466   : > { %3106 = vst.msk [vmem:[%s4798_s21 + $0x370] sm:$0xff] %vm2995_vm1, %v2977_v11  ;;  %v2980_v21 = vadd.f32 %v3781_v48, %v2817_v27 }
 0x467   : > { %v2814_v60 = vpop.xlane.xlu0 %2813 }
 0x468   : > { %3109 = vst.msk [vmem:[%s4798_s21 + $0x388] sm:$0xff] %vm2995_vm1, %v2980_v21  ;;  %v2979_v20 = vadd.f32 %v3781_v48, %v2814_v60 }
 0x469   : > { %v2823_v61 = vpop.xlane.xlu1 %2822 }
 0x46a   : > { %3108 = vst.msk [vmem:[%s4798_s21 + $0x380] sm:$0xff] %vm2995_vm1, %v2979_v20  ;;  %v2982_v63 = vadd.f32 %v3781_v48, %v2823_v61 }
 0x46b   : > { %v2820_v4 = vpop.xlane.xlu0 %2819 }
 0x46c   : > { %3111 = vst.msk [vmem:[%s4798_s21 + $0x398] sm:$0xff] %vm2995_vm1, %v2982_v63  ;;  %v2981_v0 = vadd.f32 %v3781_v48, %v2820_v4 }
 0x46d   : > { %v2829_v5 = vpop.xlane.xlu1 %2828 }
 0x46e   : > { %3110 = vst.msk [vmem:[%s4798_s21 + $0x390] sm:$0xff] %vm2995_vm1, %v2981_v0  ;;  %v2984_v7 = vadd.f32 %v3781_v48, %v2829_v5 }
 0x46f   : > { %v2826_v12 = vpop.xlane.xlu0 %2825 }
 0x470   : > { %3113 = vst.msk [vmem:[%s4798_s21 + $0x3a8] sm:$0xff] %vm2995_vm1, %v2984_v7  ;;  %v2983_v19 = vadd.f32 %v3781_v48, %v2826_v12 }
 0x471   : > { %v2835_v31 = vpop.xlane.xlu1 %2834 }
 0x472   : > { %3112 = vst.msk [vmem:[%s4798_s21 + $0x3a0] sm:$0xff] %vm2995_vm1, %v2983_v19  ;;  %v2986_v15 = vadd.f32 %v3781_v48, %v2835_v31 }
 0x473   : > { %v2832_v13 = vpop.xlane.xlu0 %2831 }
 0x474   : > { %3115 = vst.msk [vmem:[%s4798_s21 + $0x3b8] sm:$0xff] %vm2995_vm1, %v2986_v15  ;;  %v2985_v28 = vadd.f32 %v3781_v48, %v2832_v13 }
 0x475   : > { %v2841_v41 = vpop.xlane.xlu1 %2840 }
 0x476   : > { %3114 = vst.msk [vmem:[%s4798_s21 + $0x3b0] sm:$0xff] %vm2995_vm1, %v2985_v28  ;;  %v2988_v29 = vadd.f32 %v3781_v48, %v2841_v41 }
 0x477   : > { %v2838_v58 = vpop.xlane.xlu0 %2837 }
 0x478   : > { %3117 = vst.msk [vmem:[%s4798_s21 + $0x3c8] sm:$0xff] %vm2995_vm1, %v2988_v29  ;;  %v2987_v14 = vadd.f32 %v3781_v48, %v2838_v58 }
 0x479   : > { %v2847_v43 = vpop.xlane.xlu1 %2846 }
 0x47a   : > { %3116 = vst.msk [vmem:[%s4798_s21 + $0x3c0] sm:$0xff] %vm2995_vm1, %v2987_v14  ;;  %v2990_v53 = vadd.f32 %v3781_v48, %v2847_v43 }
 0x47b   : > { %v2844_v17 = vpop.xlane.xlu0 %2843 }
 0x47c   : > { %3119 = vst.msk [vmem:[%s4798_s21 + $0x3d8] sm:$0xff] %vm2995_vm1, %v2990_v53  ;;  %v2989_v23 = vadd.f32 %v3781_v48, %v2844_v17 }
 0x47d   : > { %v2853_v52 = vpop.xlane.xlu1 %2852 }
 0x47e   : > { %3118 = vst.msk [vmem:[%s4798_s21 + $0x3d0] sm:$0xff] %vm2995_vm1, %v2989_v23  ;;  %v2992_v42 = vadd.f32 %v3781_v48, %v2853_v52 }
 0x47f   : > { %v2850_v24 = vpop.xlane.xlu0 %2849 }
 0x480   : > { %3121 = vst.msk [vmem:[%s4798_s21 + $0x3e8] sm:$0xff] %vm2995_vm1, %v2992_v42  ;;  %v2991_v38 = vadd.f32 %v3781_v48, %v2850_v24 }
 0x481   : > { %v2859_v57 = vpop.xlane.xlu1 %2858 }
 0x482   : > { %3120 = vst.msk [vmem:[%s4798_s21 + $0x3e0] sm:$0xff] %vm2995_vm1, %v2991_v38  ;;  %v2994_v62 = vadd.f32 %v3781_v48, %v2859_v57 }
 0x483   : > { %v2856_v2 = vpop.xlane.xlu0 %2855 }
 0x484   : > { %3123 = vst.msk [vmem:[%s4798_s21 + $0x3f8] sm:$0xff] %vm2995_vm1, %v2994_v62  ;;  %v2993_v26 = vadd.f32 %v3781_v48, %v2856_v2 }
 0x486   : > { %3122 = vst.msk [vmem:[%s4798_s21 + $0x3f0] sm:$0xff] %vm2995_vm1, %v2993_v26 }
 0x487 PF: > { %p21_p0 = scmp.ge.s32.totalorder %s4092_s16, 6   ;;  %s5557_s26 = smov %s3948_s27 }
 0x488   : > { %s5558_s27 = smov %s3952_s28  ;;  %s5559_s28 = smov %s4103_s23 }
 0x489   : > { %s5560_s29 = smov %s4092_s16  ;;  %23 = sbr.rel (!%p21_p0) target bundleno = 8 (0x8), region = 104 }
 0x48e   :  { %3146 = vsyncpa [#allocation4], 1 }
 0x48f   :  { %3148 = vsyncpa [#allocation4 + $0x1], 1 }
 0x490   :  { %3149 = vsyncpa [#allocation6], 1 }
 0x491   :  { %3150 = vsyncpa [#allocation9], 1 }

</bundles_post_ra>
